<compile_context>
chip_gen: v7x
topology: tpu7x:2x2x1
jax: 0.10.0
libtpu: 0.0.40
codegen_flags: <defaults>
</compile_context>

<pallas_src>
import functools

import jax
import jax.numpy as jnp
from jax import lax
from jax.experimental import pallas as pl
from jax.experimental.pallas import tpu as pltpu

_MASKED_BIAS = -1e30           # additive bias for masked / padded key positions
_FULLY_MASKED_THRESH = -1e29   # running max below this => row saw no valid key


def _round_up(x, m):
    return (x + m - 1) // m * m


def _mhmq_flash_kernel(q_ref, k_ref, v_ref, bias_ref, wq_ref, wk_ref, wv_ref,
                       o_ref, pq_ref, m_ref, l_ref, acc_ref,
                       *, heads, kp, vp):
    """One (batch, q-tile, l-tile) grid step of flash-style MHMQ attention."""
    li = pl.program_id(2)

    @pl.when(li == 0)
    def _init():
        # Project queries once per (batch, q-tile); cache as bf16 for the MXU.
        # 1/temperature is already folded into wq in the wrapper.
        pq_ref[...] = jnp.dot(
            q_ref[0], wq_ref[...],
            preferred_element_type=jnp.float32).astype(pq_ref.dtype)
        m_ref[...] = jnp.full(m_ref.shape, -jnp.inf, dtype=m_ref.dtype)
        l_ref[...] = jnp.zeros(l_ref.shape, dtype=l_ref.dtype)
        acc_ref[...] = jnp.zeros(acc_ref.shape, dtype=acc_ref.dtype)

    cd = k_ref.dtype  # compute dtype for MXU operands (bf16 by default)

    # One wide projection matmul per tensor for this L tile (heads concatenated
    # along N, per-head K/V zero-padded to 128 lanes); single cast to bf16.
    pk = jnp.dot(k_ref[0], wk_ref[...],
                 preferred_element_type=jnp.float32).astype(cd)   # (TL, H*Kp)
    pv = jnp.dot(v_ref[0], wv_ref[...],
                 preferred_element_type=jnp.float32).astype(cd)   # (TL, H*Vp)
    bias = bias_ref[0].astype(jnp.float32)                        # (TQ, TL)

    for h in range(heads):                        # static, small head loop
        pq_h = pq_ref[:, h * kp:(h + 1) * kp]     # (TQ, Kp)  lane-aligned slice
        pk_h = pk[:, h * kp:(h + 1) * kp]         # (TL, Kp)
        pv_h = pv[:, h * vp:(h + 1) * vp]         # (TL, Vp)

        # relevance (TQ, TL): contract last dims, bf16 operands, f32 accumulate.
        s = lax.dot_general(pq_h, pk_h, (((1,), (1,)), ((), ())),
                            preferred_element_type=jnp.float32)
        s = s + bias

        # Online (flash) softmax update; all state lives in f32 VMEM scratch.
        m_prev = m_ref[h]                                          # (TQ, 1)
        m_new = jnp.maximum(m_prev, jnp.max(s, axis=-1, keepdims=True))
        alpha = jnp.exp(m_prev - m_new)
        p = jnp.exp(s - m_new)
        l_ref[h] = alpha * l_ref[h] + jnp.sum(p, axis=-1, keepdims=True)
        acc_ref[h] = alpha * acc_ref[h] + jnp.dot(
            p.astype(cd), pv_h, preferred_element_type=jnp.float32)
        m_ref[h] = m_new

    @pl.when(li == pl.num_programs(2) - 1)
    def _finalize():
        for h in range(heads):
            inv_l = pl.reciprocal(l_ref[h], approx=True)    # EUP slot
            out_h = acc_ref[h] * inv_l                      # (TQ, Vp)
            # Rows whose every key position is masked must emit zeros
            # (matches torch's masked_fill(probs, 0) for fully-masked rows).
            out_h = jnp.where(m_ref[h] > _FULLY_MASKED_THRESH, out_h, 0.0)
            # Lane-aligned, unmasked per-head store (no concat buffer).
            o_ref[0, :, h * vp:(h + 1) * vp] = out_h.astype(o_ref.dtype)


def multi_head_multi_query_attention(queries, keys, values, wq, wk, wv,
                                     mask=None, temperature=None,
                                     use_bf16=True):
    """Pallas implementation of MultiHeadMultiQueryAttention.forward."""
    B, Q, Dq = queries.shape
    _, L, Dk = keys.shape
    _, _, Dv = values.shape
    H, _, K = wq.shape
    V = wv.shape[-1]

    if temperature is None:
        temperature = float(Dq) ** 0.5
    temperature = float(temperature)

    cd = jnp.bfloat16 if use_bf16 else jnp.float32
    cd_bytes = jnp.dtype(cd).itemsize

    # ---- lane padding: per-head K/V padded to 128 lanes ----------------------
    Kp = _round_up(K, 128)
    Vp = _round_up(V, 128)

    # ---- generation-aware VMEM budget & tile selection -----------------------
    try:
        vmem_cap = int(getattr(pltpu.get_tpu_info(), "vmem_capacity_bytes",
                               64 << 20))
    except Exception:
        vmem_cap = 64 << 20  # conservative (v7x-sized) fallback
    # ~48 MiB on v7x (64 MiB physical), capped at 96 MiB on v5e/v6e (128 MiB).
    vmem_budget = min(vmem_cap * 3 // 4, 96 << 20)

    def vmem_estimate(tq, tl):
        # Double-buffered activation/mask/output blocks.
        blocks = (2 * (tq * Dq * cd_bytes + tl * (Dk + Dv) * cd_bytes
                       + tq * tl * 2)
                  + 2 * tq * H * Vp * 4)
        # Resident weight slabs (assume worst-case double buffering).
        weights = 2 * ((Dq + Dk) * H * Kp + Dv * H * Vp) * cd_bytes
        # Scratch: cached pq + m/l/acc (m, l pad their last dim to 128 lanes).
        scratch = (tq * H * Kp * cd_bytes + 2 * H * tq * 128 * 4
                   + H * tq * Vp * 4)
        # In-kernel intermediates: pk/pv (f32 result + bf16 copy), per-head
        # s/p temporaries and finalize temporaries.
        interm = (tl * H * (Kp + Vp) * (4 + cd_bytes)
                  + 4 * tq * tl * 4 + 2 * tq * Vp * 4)
        return blocks + weights + scratch + interm + (4 << 20)  # headroom

    def tile_candidates(rounded_dim, targets):
        cands = []
        for t in targets:
            c = t if t < rounded_dim else rounded_dim
            if c not in cands:
                cands.append(c)
        return cands

    # TQ: multiple of 16 (bf16 sublane packing).  TL: multiple of 128 whenever
    # it actually tiles L, so the mask block's lane dim stays tile-aligned;
    # 256-wide tiles feed the v6e/v7x MXU, smaller fallbacks suit v5e / tight VMEM.
    tq_cands = tile_candidates(_round_up(Q, 16), (256, 128, 64, 32, 16))
    tl_cands = tile_candidates(_round_up(L, 16), (256, 128))

    TQ, TL = tq_cands[-1], tl_cands[-1]
    chosen = False
    for tq in tq_cands:
        for tl in tl_cands:
            if vmem_estimate(tq, tl) <= vmem_budget:
                TQ, TL, chosen = tq, tl, True
                break
        if chosen:
            break

    Qp = _round_up(Q, TQ)
    Lp = _round_up(L, TL)
    n_qt = Qp // TQ
    n_lt = Lp // TL

    # ---- operand prep: padding, head concat, temperature folding -------------
    q_in = jnp.zeros((B, Qp, Dq), cd).at[:, :Q, :].set(queries.astype(cd))
    k_in = jnp.zeros((B, Lp, Dk), cd).at[:, :L, :].set(keys.astype(cd))
    v_in = jnp.zeros((B, Lp, Dv), cd).at[:, :L, :].set(values.astype(cd))

    # Additive mask bias, pre-transposed to (B, Q, L): 0 where valid, -1e30
    # where masked or padded.  Stored as bf16 (halves the per-step mask DMA).
    if mask is None:
        core = jnp.zeros((B, Q, L), jnp.float32)
    else:
        core = jnp.where(jnp.transpose(mask, (0, 2, 1)) > 0, 0.0, _MASKED_BIAS)
    bias = jnp.full((B, Qp, Lp), _MASKED_BIAS, dtype=jnp.bfloat16)
    bias = bias.at[:, :Q, :L].set(core.astype(jnp.bfloat16))

    def pad_heads(w, dp):
        # (H, Din, D) -> (Din, H*Dp), zero-padded per head along the output dim.
        h_, din, d = w.shape
        wp = jnp.zeros((h_, din, dp), w.dtype).at[:, :, :d].set(w)
        return jnp.transpose(wp, (1, 0, 2)).reshape(din, h_ * dp)

    wq_cat = pad_heads(wq / temperature, Kp).astype(cd)   # fold 1/temperature
    wk_cat = pad_heads(wk, Kp).astype(cd)
    wv_cat = pad_heads(wv, Vp).astype(cd)

    kernel = functools.partial(_mhmq_flash_kernel, heads=H, kp=Kp, vp=Vp)

    def build_and_run(single_buffer_weights):
        wkw = ({"pipeline_mode": pl.Buffered(1)} if single_buffer_weights
               else {})
        grid_spec = pltpu.PrefetchScalarGridSpec(
            num_scalar_prefetch=0,
            grid=(B, n_qt, n_lt),
            in_specs=[
                pl.BlockSpec((1, TQ, Dq), lambda b, qi, li: (b, qi, 0)),
                pl.BlockSpec((1, TL, Dk), lambda b, qi, li: (b, li, 0)),
                pl.BlockSpec((1, TL, Dv), lambda b, qi, li: (b, li, 0)),
                pl.BlockSpec((1, TQ, TL), lambda b, qi, li: (b, qi, li)),
                # Weight slabs: constant block index -> DMA'd once, resident.
                pl.BlockSpec((Dq, H * Kp), lambda b, qi, li: (0, 0), **wkw),
                pl.BlockSpec((Dk, H * Kp), lambda b, qi, li: (0, 0), **wkw),
                pl.BlockSpec((Dv, H * Vp), lambda b, qi, li: (0, 0), **wkw),
            ],
            out_specs=pl.BlockSpec((1, TQ, H * Vp),
                                   lambda b, qi, li: (b, qi, 0)),
            scratch_shapes=[
                pltpu.VMEM((TQ, H * Kp), cd),          # cached projected queries
                pltpu.VMEM((H, TQ, 1), jnp.float32),   # running max  m
                pltpu.VMEM((H, TQ, 1), jnp.float32),   # running sum  l
                pltpu.VMEM((H, TQ, Vp), jnp.float32),  # running accumulator
            ],
        )
        return pl.pallas_call(
            kernel,
            out_shape=jax.ShapeDtypeStruct((B, Qp, H * Vp), jnp.float32),
            grid_spec=grid_spec,
            compiler_params=pltpu.CompilerParams(
                dimension_semantics=("parallel", "parallel", "arbitrary"),
                vmem_limit_bytes=int(vmem_budget)),
        )(q_in, k_in, v_in, bias, wq_cat, wk_cat, wv_cat)

    try:
        out = build_and_run(True)   # single-buffered resident weight slabs
    except Exception:
        # TODO(synk): this JAX/Mosaic build rejects pl.Buffered(1) on input
        # BlockSpecs; fall back to default (double-buffered) weight residency.
        out = build_and_run(False)

    # Lane-dense (B, Qp, H*Vp) kernel output -> module layout (B, Q, H, V).
    return out.reshape(B, Qp, H, Vp)[:, :Q, :, :V]


def _reference(queries, keys, values, wq, wk, wv, mask, temperature,
               compute_dtype=jnp.float32):
    """Pure-JAX reference mirroring the torch einsum code.

    With compute_dtype=bf16 it applies the same operand roundings as the
    kernel (tight comparison); with f32 it is the exact module semantics.
    """
    cd = compute_dtype
    wq_s = (wq / temperature).astype(cd)
    pq = jnp.einsum('bqi,hik->bqhk', queries.astype(cd), wq_s,
                    preferred_element_type=jnp.float32).astype(cd)
    pk = jnp.einsum('bli,hik->blhk', keys.astype(cd), wk.astype(cd),
                    preferred_element_type=jnp.float32).astype(cd)
    pv = jnp.einsum('bli,hiv->blhv', values.astype(cd), wv.astype(cd),
                    preferred_element_type=jnp.float32).astype(cd)
    rel = jnp.einsum('bqhk,blhk->blqh', pq, pk,
                     preferred_element_type=jnp.float32)
    if mask is not None:
        m = (mask > 0)[..., None]                      # (B, L, Q, 1)
        rel = jnp.where(m, rel, _MASKED_BIAS)
    rel = rel - jnp.max(rel, axis=1, keepdims=True)
    e = jnp.exp(rel)
    probs = e / jnp.sum(e, axis=1, keepdims=True)
    if mask is not None:
        probs = jnp.where(m, probs, 0.0)
    return jnp.einsum('blhv,blqh->bqhv', pv, probs.astype(cd),
                      preferred_element_type=jnp.float32)


if __name__ == "__main__":
    # Small synthetic problem, deterministic init.
    B, Q, L = 2, 8, 16
    in_query_size, in_key_size, in_value_size = 32, 24, 20
    work_query_size, out_value_size, heads = 16, 28, 4
    temperature = float(in_query_size) ** 0.5

    key = jax.random.PRNGKey(0)
    kq, kk, kv, kwq, kwk, kwv, km = jax.random.split(key, 7)

    queries = jax.random.normal(kq, (B, Q, in_query_size), dtype=jnp.float32)
    keys = jax.random.normal(kk, (B, L, in_key_size), dtype=jnp.float32)
    values = jax.random.normal(kv, (B, L, in_value_size), dtype=jnp.float32)

    def xavier_normal(k, shape):
        fan_in, fan_out = shape[1], shape[0]
        std = (2.0 / (fan_in + fan_out)) ** 0.5
        return std * jax.random.normal(k, shape, dtype=jnp.float32)

    wq = xavier_normal(kwq, (heads, in_query_size, work_query_size))
    wk = xavier_normal(kwk, (heads, in_key_size, work_query_size))
    wv = xavier_normal(kwv, (heads, in_value_size, out_value_size))

    # Mask: 1 = present, 0 = padded; keep at least the first position valid.
    mask = (jax.random.uniform(km, (B, L, Q)) > 0.3).astype(jnp.float32)
    mask = mask.at[:, 0, :].set(1.0)

    out = multi_head_multi_query_attention(
        queries, keys, values, wq, wk, wv, mask=mask, temperature=temperature)
    out = jax.block_until_ready(out)
    assert out.shape == (B, Q, heads, out_value_size)

    # Tight check vs a reference that applies the same bf16 operand roundings.
    ref_bf16 = _reference(queries, keys, values, wq, wk, wv, mask, temperature,
                          compute_dtype=jnp.bfloat16)
    assert jnp.allclose(out, ref_bf16, atol=3e-2, rtol=3e-2), \
        "mismatch vs bf16 reference"

    # Looser sanity check vs the exact f32 module semantics.
    ref_f32 = _reference(queries, keys, values, wq, wk, wv, mask, temperature,
                         compute_dtype=jnp.float32)
    assert jnp.allclose(out, ref_f32, atol=1e-1, rtol=1e-1), \
        "mismatch vs f32 reference"

    print("KERNEL_OK")
</pallas_src>

<mosaic_0001>
module attributes {stable_mosaic.version = 11 : i64} {
  func.func @_mhmq_flash_kernel(%arg0: i32, %arg1: i32, %arg2: i32, %arg3: memref<1x16x32xbf16, #tpu.memory_space<vmem>>, %arg4: memref<1x16x24xbf16, #tpu.memory_space<vmem>>, %arg5: memref<1x16x20xbf16, #tpu.memory_space<vmem>>, %arg6: memref<1x16x16xbf16, #tpu.memory_space<vmem>>, %arg7: memref<32x512xbf16, #tpu.memory_space<vmem>>, %arg8: memref<24x512xbf16, #tpu.memory_space<vmem>>, %arg9: memref<20x512xbf16, #tpu.memory_space<vmem>>, %arg10: memref<1x16x512xf32, #tpu.memory_space<vmem>>, %arg11: memref<16x512xbf16, #tpu.memory_space<vmem>>, %arg12: memref<4x16x1xf32, #tpu.memory_space<vmem>>, %arg13: memref<4x16x1xf32, #tpu.memory_space<vmem>>, %arg14: memref<4x16x128xf32, #tpu.memory_space<vmem>>) attributes {dimension_semantics = [#tpu.dimension_semantics<parallel>, #tpu.dimension_semantics<parallel>, #tpu.dimension_semantics<arbitrary>], iteration_bounds = array<i64: 2, 1, 1>, scalar_prefetch = 0 : i64, scratch_operands = 4 : i64, tpu.core_type = #tpu.core_type<tc>, window_params = [{transform_indices = @transform_0, window_bounds = array<i64: 1, 16, 32>}, {transform_indices = @transform_1, window_bounds = array<i64: 1, 16, 24>}, {transform_indices = @transform_2, window_bounds = array<i64: 1, 16, 20>}, {transform_indices = @transform_3, window_bounds = array<i64: 1, 16, 16>}, {pipeline_mode = #tpu.pipeline_mode<synchronous>, transform_indices = @transform_4, window_bounds = array<i64: 32, 512>}, {pipeline_mode = #tpu.pipeline_mode<synchronous>, transform_indices = @transform_5, window_bounds = array<i64: 24, 512>}, {pipeline_mode = #tpu.pipeline_mode<synchronous>, transform_indices = @transform_6, window_bounds = array<i64: 20, 512>}, {transform_indices = @transform_7, window_bounds = array<i64: 1, 16, 512>}]} {
    %c0_i32 = arith.constant 0 : i32
    %0 = arith.cmpi eq, %arg2, %c0_i32 : i32
    %1 = arith.extui %0 : i1 to i32
    %c0_i32_0 = arith.constant 0 : i32
    %2 = arith.cmpi ne, %1, %c0_i32_0 : i32
    scf.if %2 {
      %c0_106 = arith.constant 0 : index
      %c0_107 = arith.constant 0 : index
      %c0_108 = arith.constant 0 : index
      %167 = vector.load %arg3[%c0_106, %c0_107, %c0_108] : memref<1x16x32xbf16, #tpu.memory_space<vmem>>, vector<1x16x32xbf16>
      %168 = vector.shape_cast %167 : vector<1x16x32xbf16> to vector<16x32xbf16>
      %c0_109 = arith.constant 0 : index
      %c0_110 = arith.constant 0 : index
      %169 = vector.load %arg7[%c0_109, %c0_110] : memref<32x512xbf16, #tpu.memory_space<vmem>>, vector<32x512xbf16>
      %cst_111 = arith.constant dense<0.000000e+00> : vector<16x512xf32>
      %170 = tpu.matmul %168, %169, %cst_111 {dimension_numbers = #tpu.dot_dimension_numbers<[1], [0], [0], [1], [0, 0, 1, 1], [], []>} : vector<16x32xbf16>, vector<32x512xbf16>, vector<16x512xf32> -> vector<16x512xf32>
      %171 = arith.truncf %170 : vector<16x512xf32> to vector<16x512xbf16>
      %c0_112 = arith.constant 0 : index
      %c0_113 = arith.constant 0 : index
      %172 = vector.load %arg11[%c0_112, %c0_113] : memref<16x512xbf16, #tpu.memory_space<vmem>>, vector<16x512xbf16>
      tpu.vector_store %arg11[%c0_112, %c0_113], %171 {strides = array<i32>} : memref<16x512xbf16, #tpu.memory_space<vmem>>, vector<16x512xbf16>,
      %cst_114 = arith.constant 0xFF800000 : f32
      %173 = vector.broadcast %cst_114 : f32 to vector<4x16x1xf32>
      %c0_115 = arith.constant 0 : index
      %c0_116 = arith.constant 0 : index
      %c0_117 = arith.constant 0 : index
      %174 = vector.load %arg12[%c0_115, %c0_116, %c0_117] : memref<4x16x1xf32, #tpu.memory_space<vmem>>, vector<4x16x1xf32>
      tpu.vector_store %arg12[%c0_115, %c0_116, %c0_117], %173 {strides = array<i32>} : memref<4x16x1xf32, #tpu.memory_space<vmem>>, vector<4x16x1xf32>,
      %cst_118 = arith.constant 0.000000e+00 : f32
      %175 = vector.broadcast %cst_118 : f32 to vector<4x16x1xf32>
      %c0_119 = arith.constant 0 : index
      %c0_120 = arith.constant 0 : index
      %c0_121 = arith.constant 0 : index
      %176 = vector.load %arg13[%c0_119, %c0_120, %c0_121] : memref<4x16x1xf32, #tpu.memory_space<vmem>>, vector<4x16x1xf32>
      tpu.vector_store %arg13[%c0_119, %c0_120, %c0_121], %175 {strides = array<i32>} : memref<4x16x1xf32, #tpu.memory_space<vmem>>, vector<4x16x1xf32>,
      %cst_122 = arith.constant 0.000000e+00 : f32
      %177 = vector.broadcast %cst_122 : f32 to vector<4x16x128xf32>
      %c0_123 = arith.constant 0 : index
      %c0_124 = arith.constant 0 : index
      %c0_125 = arith.constant 0 : index
      %178 = vector.load %arg14[%c0_123, %c0_124, %c0_125] : memref<4x16x128xf32, #tpu.memory_space<vmem>>, vector<4x16x128xf32>
      tpu.vector_store %arg14[%c0_123, %c0_124, %c0_125], %177 {strides = array<i32>} : memref<4x16x128xf32, #tpu.memory_space<vmem>>, vector<4x16x128xf32>,
    } else {
    }
    %c0 = arith.constant 0 : index
    %c0_1 = arith.constant 0 : index
    %c0_2 = arith.constant 0 : index
    %3 = vector.load %arg4[%c0, %c0_1, %c0_2] : memref<1x16x24xbf16, #tpu.memory_space<vmem>>, vector<1x16x24xbf16>
    %4 = vector.shape_cast %3 : vector<1x16x24xbf16> to vector<16x24xbf16>
    %c0_3 = arith.constant 0 : index
    %c0_4 = arith.constant 0 : index
    %5 = vector.load %arg8[%c0_3, %c0_4] : memref<24x512xbf16, #tpu.memory_space<vmem>>, vector<24x512xbf16>
    %cst = arith.constant dense<0.000000e+00> : vector<16x512xf32>
    %6 = tpu.matmul %4, %5, %cst {dimension_numbers = #tpu.dot_dimension_numbers<[1], [0], [0], [1], [0, 0, 1, 1], [], []>} : vector<16x24xbf16>, vector<24x512xbf16>, vector<16x512xf32> -> vector<16x512xf32>
    %7 = arith.truncf %6 : vector<16x512xf32> to vector<16x512xbf16>
    %c0_5 = arith.constant 0 : index
    %c0_6 = arith.constant 0 : index
    %c0_7 = arith.constant 0 : index
    %8 = vector.load %arg5[%c0_5, %c0_6, %c0_7] : memref<1x16x20xbf16, #tpu.memory_space<vmem>>, vector<1x16x20xbf16>
    %9 = vector.shape_cast %8 : vector<1x16x20xbf16> to vector<16x20xbf16>
    %c0_8 = arith.constant 0 : index
    %c0_9 = arith.constant 0 : index
    %10 = vector.load %arg9[%c0_8, %c0_9] : memref<20x512xbf16, #tpu.memory_space<vmem>>, vector<20x512xbf16>
    %cst_10 = arith.constant dense<0.000000e+00> : vector<16x512xf32>
    %11 = tpu.matmul %9, %10, %cst_10 {dimension_numbers = #tpu.dot_dimension_numbers<[1], [0], [0], [1], [0, 0, 1, 1], [], []>} : vector<16x20xbf16>, vector<20x512xbf16>, vector<16x512xf32> -> vector<16x512xf32>
    %12 = arith.truncf %11 : vector<16x512xf32> to vector<16x512xbf16>
    %c0_11 = arith.constant 0 : index
    %c0_12 = arith.constant 0 : index
    %c0_13 = arith.constant 0 : index
    %13 = vector.load %arg6[%c0_11, %c0_12, %c0_13] : memref<1x16x16xbf16, #tpu.memory_space<vmem>>, vector<1x16x16xbf16>
    %14 = vector.shape_cast %13 : vector<1x16x16xbf16> to vector<16x16xbf16>
    %15 = arith.extf %14 : vector<16x16xbf16> to vector<16x16xf32>
    %c0_14 = arith.constant 0 : index
    %c0_15 = arith.constant 0 : index
    %16 = vector.load %arg11[%c0_14, %c0_15] : memref<16x512xbf16, #tpu.memory_space<vmem>>, vector<16x128xbf16>
    %17 = vector.extract_strided_slice %7 {offsets = [0, 0], sizes = [16, 128], strides = [1, 1]} : vector<16x512xbf16> to vector<16x128xbf16>
    %18 = vector.extract_strided_slice %12 {offsets = [0, 0], sizes = [16, 128], strides = [1, 1]} : vector<16x512xbf16> to vector<16x128xbf16>
    %cst_16 = arith.constant dense<0.000000e+00> : vector<16x16xf32>
    %19 = tpu.matmul %16, %17, %cst_16 {dimension_numbers = #tpu.dot_dimension_numbers<[1], [1], [0], [0], [0, 0, 1, 0], [], []>} : vector<16x128xbf16>, vector<16x128xbf16>, vector<16x16xf32> -> vector<16x16xf32>
    %20 = arith.addf %19, %15 : vector<16x16xf32>
    %c0_17 = arith.constant 0 : index
    %c0_18 = arith.constant 0 : index
    %c0_19 = arith.constant 0 : index
    %21 = vector.load %arg12[%c0_17, %c0_18, %c0_19] : memref<4x16x1xf32, #tpu.memory_space<vmem>>, vector<1x16x1xf32>
    %22 = vector.shape_cast %21 : vector<1x16x1xf32> to vector<16x1xf32>
    %cst_20 = arith.constant dense<0xFF800000> : vector<16xf32>
    %23 = vector.multi_reduction <maximumf>, %20, %cst_20 [1] : vector<16x16xf32> to vector<16xf32>
    %24 = vector.shape_cast %23 : vector<16xf32> to vector<16x1xf32>
    %25 = arith.maximumf %22, %24 : vector<16x1xf32>
    %26 = arith.subf %22, %25 : vector<16x1xf32>
    %27 = math.exp %26 : vector<16x1xf32>
    %28 = vector.broadcast %25 : vector<16x1xf32> to vector<16x16xf32>
    %29 = arith.subf %20, %28 : vector<16x16xf32>
    %30 = math.exp %29 : vector<16x16xf32>
    %c0_21 = arith.constant 0 : index
    %c0_22 = arith.constant 0 : index
    %c0_23 = arith.constant 0 : index
    %31 = vector.load %arg13[%c0_21, %c0_22, %c0_23] : memref<4x16x1xf32, #tpu.memory_space<vmem>>, vector<1x16x1xf32>
    %32 = vector.shape_cast %31 : vector<1x16x1xf32> to vector<16x1xf32>
    %33 = arith.mulf %27, %32 : vector<16x1xf32>
    %cst_24 = arith.constant dense<0.000000e+00> : vector<16xf32>
    %34 = vector.multi_reduction <add>, %30, %cst_24 [1] : vector<16x16xf32> to vector<16xf32>
    %35 = vector.shape_cast %34 : vector<16xf32> to vector<16x1xf32>
    %36 = arith.addf %33, %35 : vector<16x1xf32>
    %c0_25 = arith.constant 0 : index
    %c0_26 = arith.constant 0 : index
    %c0_27 = arith.constant 0 : index
    %37 = vector.load %arg13[%c0_25, %c0_26, %c0_27] : memref<4x16x1xf32, #tpu.memory_space<vmem>>, vector<1x16x1xf32>
    %38 = vector.shape_cast %37 : vector<1x16x1xf32> to vector<16x1xf32>
    %39 = vector.shape_cast %36 : vector<16x1xf32> to vector<1x16x1xf32>
    tpu.vector_store %arg13[%c0_25, %c0_26, %c0_27], %39 {strides = array<i32>} : memref<4x16x1xf32, #tpu.memory_space<vmem>>, vector<1x16x1xf32>,
    %c0_28 = arith.constant 0 : index
    %c0_29 = arith.constant 0 : index
    %c0_30 = arith.constant 0 : index
    %40 = vector.load %arg14[%c0_28, %c0_29, %c0_30] : memref<4x16x128xf32, #tpu.memory_space<vmem>>, vector<1x16x128xf32>
    %41 = vector.shape_cast %40 : vector<1x16x128xf32> to vector<16x128xf32>
    %42 = vector.broadcast %27 : vector<16x1xf32> to vector<16x128xf32>
    %43 = arith.mulf %42, %41 : vector<16x128xf32>
    %44 = arith.truncf %30 : vector<16x16xf32> to vector<16x16xbf16>
    %cst_31 = arith.constant dense<0.000000e+00> : vector<16x128xf32>
    %45 = tpu.matmul %44, %18, %cst_31 {dimension_numbers = #tpu.dot_dimension_numbers<[1], [0], [0], [1], [0, 0, 1, 1], [], []>} : vector<16x16xbf16>, vector<16x128xbf16>, vector<16x128xf32> -> vector<16x128xf32>
    %46 = arith.addf %43, %45 : vector<16x128xf32>
    %c0_32 = arith.constant 0 : index
    %c0_33 = arith.constant 0 : index
    %c0_34 = arith.constant 0 : index
    %47 = vector.load %arg14[%c0_32, %c0_33, %c0_34] : memref<4x16x128xf32, #tpu.memory_space<vmem>>, vector<1x16x128xf32>
    %48 = vector.shape_cast %47 : vector<1x16x128xf32> to vector<16x128xf32>
    %49 = vector.shape_cast %46 : vector<16x128xf32> to vector<1x16x128xf32>
    tpu.vector_store %arg14[%c0_32, %c0_33, %c0_34], %49 {strides = array<i32>} : memref<4x16x128xf32, #tpu.memory_space<vmem>>, vector<1x16x128xf32>,
    %c0_35 = arith.constant 0 : index
    %c0_36 = arith.constant 0 : index
    %c0_37 = arith.constant 0 : index
    %50 = vector.load %arg12[%c0_35, %c0_36, %c0_37] : memref<4x16x1xf32, #tpu.memory_space<vmem>>, vector<1x16x1xf32>
    %51 = vector.shape_cast %50 : vector<1x16x1xf32> to vector<16x1xf32>
    %52 = vector.shape_cast %25 : vector<16x1xf32> to vector<1x16x1xf32>
    tpu.vector_store %arg12[%c0_35, %c0_36, %c0_37], %52 {strides = array<i32>} : memref<4x16x1xf32, #tpu.memory_space<vmem>>, vector<1x16x1xf32>,
    %c0_38 = arith.constant 0 : index
    %c128 = arith.constant 128 : index
    %53 = vector.load %arg11[%c0_38, %c128] : memref<16x512xbf16, #tpu.memory_space<vmem>>, vector<16x128xbf16>
    %54 = vector.extract_strided_slice %7 {offsets = [0, 128], sizes = [16, 128], strides = [1, 1]} : vector<16x512xbf16> to vector<16x128xbf16>
    %55 = vector.extract_strided_slice %12 {offsets = [0, 128], sizes = [16, 128], strides = [1, 1]} : vector<16x512xbf16> to vector<16x128xbf16>
    %cst_39 = arith.constant dense<0.000000e+00> : vector<16x16xf32>
    %56 = tpu.matmul %53, %54, %cst_39 {dimension_numbers = #tpu.dot_dimension_numbers<[1], [1], [0], [0], [0, 0, 1, 0], [], []>} : vector<16x128xbf16>, vector<16x128xbf16>, vector<16x16xf32> -> vector<16x16xf32>
    %57 = arith.addf %56, %15 : vector<16x16xf32>
    %c1 = arith.constant 1 : index
    %c0_40 = arith.constant 0 : index
    %c0_41 = arith.constant 0 : index
    %58 = vector.load %arg12[%c1, %c0_40, %c0_41] : memref<4x16x1xf32, #tpu.memory_space<vmem>>, vector<1x16x1xf32>
    %59 = vector.shape_cast %58 : vector<1x16x1xf32> to vector<16x1xf32>
    %cst_42 = arith.constant dense<0xFF800000> : vector<16xf32>
    %60 = vector.multi_reduction <maximumf>, %57, %cst_42 [1] : vector<16x16xf32> to vector<16xf32>
    %61 = vector.shape_cast %60 : vector<16xf32> to vector<16x1xf32>
    %62 = arith.maximumf %59, %61 : vector<16x1xf32>
    %63 = arith.subf %59, %62 : vector<16x1xf32>
    %64 = math.exp %63 : vector<16x1xf32>
    %65 = vector.broadcast %62 : vector<16x1xf32> to vector<16x16xf32>
    %66 = arith.subf %57, %65 : vector<16x16xf32>
    %67 = math.exp %66 : vector<16x16xf32>
    %c1_43 = arith.constant 1 : index
    %c0_44 = arith.constant 0 : index
    %c0_45 = arith.constant 0 : index
    %68 = vector.load %arg13[%c1_43, %c0_44, %c0_45] : memref<4x16x1xf32, #tpu.memory_space<vmem>>, vector<1x16x1xf32>
    %69 = vector.shape_cast %68 : vector<1x16x1xf32> to vector<16x1xf32>
    %70 = arith.mulf %64, %69 : vector<16x1xf32>
    %cst_46 = arith.constant dense<0.000000e+00> : vector<16xf32>
    %71 = vector.multi_reduction <add>, %67, %cst_46 [1] : vector<16x16xf32> to vector<16xf32>
    %72 = vector.shape_cast %71 : vector<16xf32> to vector<16x1xf32>
    %73 = arith.addf %70, %72 : vector<16x1xf32>
    %c1_47 = arith.constant 1 : index
    %c0_48 = arith.constant 0 : index
    %c0_49 = arith.constant 0 : index
    %74 = vector.load %arg13[%c1_47, %c0_48, %c0_49] : memref<4x16x1xf32, #tpu.memory_space<vmem>>, vector<1x16x1xf32>
    %75 = vector.shape_cast %74 : vector<1x16x1xf32> to vector<16x1xf32>
    %76 = vector.shape_cast %73 : vector<16x1xf32> to vector<1x16x1xf32>
    tpu.vector_store %arg13[%c1_47, %c0_48, %c0_49], %76 {strides = array<i32>} : memref<4x16x1xf32, #tpu.memory_space<vmem>>, vector<1x16x1xf32>,
    %c1_50 = arith.constant 1 : index
    %c0_51 = arith.constant 0 : index
    %c0_52 = arith.constant 0 : index
    %77 = vector.load %arg14[%c1_50, %c0_51, %c0_52] : memref<4x16x128xf32, #tpu.memory_space<vmem>>, vector<1x16x128xf32>
    %78 = vector.shape_cast %77 : vector<1x16x128xf32> to vector<16x128xf32>
    %79 = vector.broadcast %64 : vector<16x1xf32> to vector<16x128xf32>
    %80 = arith.mulf %79, %78 : vector<16x128xf32>
    %81 = arith.truncf %67 : vector<16x16xf32> to vector<16x16xbf16>
    %cst_53 = arith.constant dense<0.000000e+00> : vector<16x128xf32>
    %82 = tpu.matmul %81, %55, %cst_53 {dimension_numbers = #tpu.dot_dimension_numbers<[1], [0], [0], [1], [0, 0, 1, 1], [], []>} : vector<16x16xbf16>, vector<16x128xbf16>, vector<16x128xf32> -> vector<16x128xf32>
    %83 = arith.addf %80, %82 : vector<16x128xf32>
    %c1_54 = arith.constant 1 : index
    %c0_55 = arith.constant 0 : index
    %c0_56 = arith.constant 0 : index
    %84 = vector.load %arg14[%c1_54, %c0_55, %c0_56] : memref<4x16x128xf32, #tpu.memory_space<vmem>>, vector<1x16x128xf32>
    %85 = vector.shape_cast %84 : vector<1x16x128xf32> to vector<16x128xf32>
    %86 = vector.shape_cast %83 : vector<16x128xf32> to vector<1x16x128xf32>
    tpu.vector_store %arg14[%c1_54, %c0_55, %c0_56], %86 {strides = array<i32>} : memref<4x16x128xf32, #tpu.memory_space<vmem>>, vector<1x16x128xf32>,
    %c1_57 = arith.constant 1 : index
    %c0_58 = arith.constant 0 : index
    %c0_59 = arith.constant 0 : index
    %87 = vector.load %arg12[%c1_57, %c0_58, %c0_59] : memref<4x16x1xf32, #tpu.memory_space<vmem>>, vector<1x16x1xf32>
    %88 = vector.shape_cast %87 : vector<1x16x1xf32> to vector<16x1xf32>
    %89 = vector.shape_cast %62 : vector<16x1xf32> to vector<1x16x1xf32>
    tpu.vector_store %arg12[%c1_57, %c0_58, %c0_59], %89 {strides = array<i32>} : memref<4x16x1xf32, #tpu.memory_space<vmem>>, vector<1x16x1xf32>,
    %c0_60 = arith.constant 0 : index
    %c256 = arith.constant 256 : index
    %90 = vector.load %arg11[%c0_60, %c256] : memref<16x512xbf16, #tpu.memory_space<vmem>>, vector<16x128xbf16>
    %91 = vector.extract_strided_slice %7 {offsets = [0, 256], sizes = [16, 128], strides = [1, 1]} : vector<16x512xbf16> to vector<16x128xbf16>
    %92 = vector.extract_strided_slice %12 {offsets = [0, 256], sizes = [16, 128], strides = [1, 1]} : vector<16x512xbf16> to vector<16x128xbf16>
    %cst_61 = arith.constant dense<0.000000e+00> : vector<16x16xf32>
    %93 = tpu.matmul %90, %91, %cst_61 {dimension_numbers = #tpu.dot_dimension_numbers<[1], [1], [0], [0], [0, 0, 1, 0], [], []>} : vector<16x128xbf16>, vector<16x128xbf16>, vector<16x16xf32> -> vector<16x16xf32>
    %94 = arith.addf %93, %15 : vector<16x16xf32>
    %c2 = arith.constant 2 : index
    %c0_62 = arith.constant 0 : index
    %c0_63 = arith.constant 0 : index
    %95 = vector.load %arg12[%c2, %c0_62, %c0_63] : memref<4x16x1xf32, #tpu.memory_space<vmem>>, vector<1x16x1xf32>
    %96 = vector.shape_cast %95 : vector<1x16x1xf32> to vector<16x1xf32>
    %cst_64 = arith.constant dense<0xFF800000> : vector<16xf32>
    %97 = vector.multi_reduction <maximumf>, %94, %cst_64 [1] : vector<16x16xf32> to vector<16xf32>
    %98 = vector.shape_cast %97 : vector<16xf32> to vector<16x1xf32>
    %99 = arith.maximumf %96, %98 : vector<16x1xf32>
    %100 = arith.subf %96, %99 : vector<16x1xf32>
    %101 = math.exp %100 : vector<16x1xf32>
    %102 = vector.broadcast %99 : vector<16x1xf32> to vector<16x16xf32>
    %103 = arith.subf %94, %102 : vector<16x16xf32>
    %104 = math.exp %103 : vector<16x16xf32>
    %c2_65 = arith.constant 2 : index
    %c0_66 = arith.constant 0 : index
    %c0_67 = arith.constant 0 : index
    %105 = vector.load %arg13[%c2_65, %c0_66, %c0_67] : memref<4x16x1xf32, #tpu.memory_space<vmem>>, vector<1x16x1xf32>
    %106 = vector.shape_cast %105 : vector<1x16x1xf32> to vector<16x1xf32>
    %107 = arith.mulf %101, %106 : vector<16x1xf32>
    %cst_68 = arith.constant dense<0.000000e+00> : vector<16xf32>
    %108 = vector.multi_reduction <add>, %104, %cst_68 [1] : vector<16x16xf32> to vector<16xf32>
    %109 = vector.shape_cast %108 : vector<16xf32> to vector<16x1xf32>
    %110 = arith.addf %107, %109 : vector<16x1xf32>
    %c2_69 = arith.constant 2 : index
    %c0_70 = arith.constant 0 : index
    %c0_71 = arith.constant 0 : index
    %111 = vector.load %arg13[%c2_69, %c0_70, %c0_71] : memref<4x16x1xf32, #tpu.memory_space<vmem>>, vector<1x16x1xf32>
    %112 = vector.shape_cast %111 : vector<1x16x1xf32> to vector<16x1xf32>
    %113 = vector.shape_cast %110 : vector<16x1xf32> to vector<1x16x1xf32>
    tpu.vector_store %arg13[%c2_69, %c0_70, %c0_71], %113 {strides = array<i32>} : memref<4x16x1xf32, #tpu.memory_space<vmem>>, vector<1x16x1xf32>,
    %c2_72 = arith.constant 2 : index
    %c0_73 = arith.constant 0 : index
    %c0_74 = arith.constant 0 : index
    %114 = vector.load %arg14[%c2_72, %c0_73, %c0_74] : memref<4x16x128xf32, #tpu.memory_space<vmem>>, vector<1x16x128xf32>
    %115 = vector.shape_cast %114 : vector<1x16x128xf32> to vector<16x128xf32>
    %116 = vector.broadcast %101 : vector<16x1xf32> to vector<16x128xf32>
    %117 = arith.mulf %116, %115 : vector<16x128xf32>
    %118 = arith.truncf %104 : vector<16x16xf32> to vector<16x16xbf16>
    %cst_75 = arith.constant dense<0.000000e+00> : vector<16x128xf32>
    %119 = tpu.matmul %118, %92, %cst_75 {dimension_numbers = #tpu.dot_dimension_numbers<[1], [0], [0], [1], [0, 0, 1, 1], [], []>} : vector<16x16xbf16>, vector<16x128xbf16>, vector<16x128xf32> -> vector<16x128xf32>
    %120 = arith.addf %117, %119 : vector<16x128xf32>
    %c2_76 = arith.constant 2 : index
    %c0_77 = arith.constant 0 : index
    %c0_78 = arith.constant 0 : index
    %121 = vector.load %arg14[%c2_76, %c0_77, %c0_78] : memref<4x16x128xf32, #tpu.memory_space<vmem>>, vector<1x16x128xf32>
    %122 = vector.shape_cast %121 : vector<1x16x128xf32> to vector<16x128xf32>
    %123 = vector.shape_cast %120 : vector<16x128xf32> to vector<1x16x128xf32>
    tpu.vector_store %arg14[%c2_76, %c0_77, %c0_78], %123 {strides = array<i32>} : memref<4x16x128xf32, #tpu.memory_space<vmem>>, vector<1x16x128xf32>,
    %c2_79 = arith.constant 2 : index
    %c0_80 = arith.constant 0 : index
    %c0_81 = arith.constant 0 : index
    %124 = vector.load %arg12[%c2_79, %c0_80, %c0_81] : memref<4x16x1xf32, #tpu.memory_space<vmem>>, vector<1x16x1xf32>
    %125 = vector.shape_cast %124 : vector<1x16x1xf32> to vector<16x1xf32>
    %126 = vector.shape_cast %99 : vector<16x1xf32> to vector<1x16x1xf32>
    tpu.vector_store %arg12[%c2_79, %c0_80, %c0_81], %126 {strides = array<i32>} : memref<4x16x1xf32, #tpu.memory_space<vmem>>, vector<1x16x1xf32>,
    %c0_82 = arith.constant 0 : index
    %c384 = arith.constant 384 : index
    %127 = vector.load %arg11[%c0_82, %c384] : memref<16x512xbf16, #tpu.memory_space<vmem>>, vector<16x128xbf16>
    %128 = vector.extract_strided_slice %7 {offsets = [0, 384], sizes = [16, 128], strides = [1, 1]} : vector<16x512xbf16> to vector<16x128xbf16>
    %129 = vector.extract_strided_slice %12 {offsets = [0, 384], sizes = [16, 128], strides = [1, 1]} : vector<16x512xbf16> to vector<16x128xbf16>
    %cst_83 = arith.constant dense<0.000000e+00> : vector<16x16xf32>
    %130 = tpu.matmul %127, %128, %cst_83 {dimension_numbers = #tpu.dot_dimension_numbers<[1], [1], [0], [0], [0, 0, 1, 0], [], []>} : vector<16x128xbf16>, vector<16x128xbf16>, vector<16x16xf32> -> vector<16x16xf32>
    %131 = arith.addf %130, %15 : vector<16x16xf32>
    %c3 = arith.constant 3 : index
    %c0_84 = arith.constant 0 : index
    %c0_85 = arith.constant 0 : index
    %132 = vector.load %arg12[%c3, %c0_84, %c0_85] : memref<4x16x1xf32, #tpu.memory_space<vmem>>, vector<1x16x1xf32>
    %133 = vector.shape_cast %132 : vector<1x16x1xf32> to vector<16x1xf32>
    %cst_86 = arith.constant dense<0xFF800000> : vector<16xf32>
    %134 = vector.multi_reduction <maximumf>, %131, %cst_86 [1] : vector<16x16xf32> to vector<16xf32>
    %135 = vector.shape_cast %134 : vector<16xf32> to vector<16x1xf32>
    %136 = arith.maximumf %133, %135 : vector<16x1xf32>
    %137 = arith.subf %133, %136 : vector<16x1xf32>
    %138 = math.exp %137 : vector<16x1xf32>
    %139 = vector.broadcast %136 : vector<16x1xf32> to vector<16x16xf32>
    %140 = arith.subf %131, %139 : vector<16x16xf32>
    %141 = math.exp %140 : vector<16x16xf32>
    %c3_87 = arith.constant 3 : index
    %c0_88 = arith.constant 0 : index
    %c0_89 = arith.constant 0 : index
    %142 = vector.load %arg13[%c3_87, %c0_88, %c0_89] : memref<4x16x1xf32, #tpu.memory_space<vmem>>, vector<1x16x1xf32>
    %143 = vector.shape_cast %142 : vector<1x16x1xf32> to vector<16x1xf32>
    %144 = arith.mulf %138, %143 : vector<16x1xf32>
    %cst_90 = arith.constant dense<0.000000e+00> : vector<16xf32>
    %145 = vector.multi_reduction <add>, %141, %cst_90 [1] : vector<16x16xf32> to vector<16xf32>
    %146 = vector.shape_cast %145 : vector<16xf32> to vector<16x1xf32>
    %147 = arith.addf %144, %146 : vector<16x1xf32>
    %c3_91 = arith.constant 3 : index
    %c0_92 = arith.constant 0 : index
    %c0_93 = arith.constant 0 : index
    %148 = vector.load %arg13[%c3_91, %c0_92, %c0_93] : memref<4x16x1xf32, #tpu.memory_space<vmem>>, vector<1x16x1xf32>
    %149 = vector.shape_cast %148 : vector<1x16x1xf32> to vector<16x1xf32>
    %150 = vector.shape_cast %147 : vector<16x1xf32> to vector<1x16x1xf32>
    tpu.vector_store %arg13[%c3_91, %c0_92, %c0_93], %150 {strides = array<i32>} : memref<4x16x1xf32, #tpu.memory_space<vmem>>, vector<1x16x1xf32>,
    %c3_94 = arith.constant 3 : index
    %c0_95 = arith.constant 0 : index
    %c0_96 = arith.constant 0 : index
    %151 = vector.load %arg14[%c3_94, %c0_95, %c0_96] : memref<4x16x128xf32, #tpu.memory_space<vmem>>, vector<1x16x128xf32>
    %152 = vector.shape_cast %151 : vector<1x16x128xf32> to vector<16x128xf32>
    %153 = vector.broadcast %138 : vector<16x1xf32> to vector<16x128xf32>
    %154 = arith.mulf %153, %152 : vector<16x128xf32>
    %155 = arith.truncf %141 : vector<16x16xf32> to vector<16x16xbf16>
    %cst_97 = arith.constant dense<0.000000e+00> : vector<16x128xf32>
    %156 = tpu.matmul %155, %129, %cst_97 {dimension_numbers = #tpu.dot_dimension_numbers<[1], [0], [0], [1], [0, 0, 1, 1], [], []>} : vector<16x16xbf16>, vector<16x128xbf16>, vector<16x128xf32> -> vector<16x128xf32>
    %157 = arith.addf %154, %156 : vector<16x128xf32>
    %c3_98 = arith.constant 3 : index
    %c0_99 = arith.constant 0 : index
    %c0_100 = arith.constant 0 : index
    %158 = vector.load %arg14[%c3_98, %c0_99, %c0_100] : memref<4x16x128xf32, #tpu.memory_space<vmem>>, vector<1x16x128xf32>
    %159 = vector.shape_cast %158 : vector<1x16x128xf32> to vector<16x128xf32>
    %160 = vector.shape_cast %157 : vector<16x128xf32> to vector<1x16x128xf32>
    tpu.vector_store %arg14[%c3_98, %c0_99, %c0_100], %160 {strides = array<i32>} : memref<4x16x128xf32, #tpu.memory_space<vmem>>, vector<1x16x128xf32>,
    %c3_101 = arith.constant 3 : index
    %c0_102 = arith.constant 0 : index
    %c0_103 = arith.constant 0 : index
    %161 = vector.load %arg12[%c3_101, %c0_102, %c0_103] : memref<4x16x1xf32, #tpu.memory_space<vmem>>, vector<1x16x1xf32>
    %162 = vector.shape_cast %161 : vector<1x16x1xf32> to vector<16x1xf32>
    %163 = vector.shape_cast %136 : vector<16x1xf32> to vector<1x16x1xf32>
    tpu.vector_store %arg12[%c3_101, %c0_102, %c0_103], %163 {strides = array<i32>} : memref<4x16x1xf32, #tpu.memory_space<vmem>>, vector<1x16x1xf32>,
    %c0_i32_104 = arith.constant 0 : i32
    %164 = arith.cmpi eq, %arg2, %c0_i32_104 : i32
    %165 = arith.extui %164 : i1 to i32
    %c0_i32_105 = arith.constant 0 : i32
    %166 = arith.cmpi ne, %165, %c0_i32_105 : i32
    scf.if %166 {
      %c0_106 = arith.constant 0 : index
      %c0_107 = arith.constant 0 : index
      %c0_108 = arith.constant 0 : index
      %167 = vector.load %arg13[%c0_106, %c0_107, %c0_108] : memref<4x16x1xf32, #tpu.memory_space<vmem>>, vector<1x16x1xf32>
      %168 = vector.shape_cast %167 : vector<1x16x1xf32> to vector<16x1xf32>
      %169 = tpu.reciprocal %168 {approx = true} : vector<16x1xf32> -> vector<16x1xf32>
      %c0_109 = arith.constant 0 : index
      %c0_110 = arith.constant 0 : index
      %c0_111 = arith.constant 0 : index
      %170 = vector.load %arg14[%c0_109, %c0_110, %c0_111] : memref<4x16x128xf32, #tpu.memory_space<vmem>>, vector<1x16x128xf32>
      %171 = vector.shape_cast %170 : vector<1x16x128xf32> to vector<16x128xf32>
      %172 = vector.broadcast %169 : vector<16x1xf32> to vector<16x128xf32>
      %173 = arith.mulf %171, %172 : vector<16x128xf32>
      %c0_112 = arith.constant 0 : index
      %c0_113 = arith.constant 0 : index
      %c0_114 = arith.constant 0 : index
      %174 = vector.load %arg12[%c0_112, %c0_113, %c0_114] : memref<4x16x1xf32, #tpu.memory_space<vmem>>, vector<1x16x1xf32>
      %175 = vector.shape_cast %174 : vector<1x16x1xf32> to vector<16x1xf32>
      %cst_115 = arith.constant -1.000000e+29 : f32
      %176 = vector.broadcast %cst_115 : f32 to vector<16x1xf32>
      %177 = arith.cmpf ogt, %175, %176 : vector<16x1xf32>
      %cst_116 = arith.constant 0.000000e+00 : f32
      %178 = vector.shape_cast %177 : vector<16x1xi1> to vector<16x1xi1>
      %179 = vector.broadcast %178 : vector<16x1xi1> to vector<16x128xi1>
      %180 = vector.broadcast %cst_116 : f32 to vector<16x128xf32>
      %181 = arith.select %179, %173, %180 : vector<16x128xi1>, vector<16x128xf32>
      %c0_117 = arith.constant 0 : index
      %c0_118 = arith.constant 0 : index
      %c0_119 = arith.constant 0 : index
      %182 = vector.load %arg10[%c0_117, %c0_118, %c0_119] : memref<1x16x512xf32, #tpu.memory_space<vmem>>, vector<1x16x128xf32>
      %183 = vector.shape_cast %182 : vector<1x16x128xf32> to vector<16x128xf32>
      %184 = vector.shape_cast %181 : vector<16x128xf32> to vector<1x16x128xf32>
      tpu.vector_store %arg10[%c0_117, %c0_118, %c0_119], %184 {strides = array<i32>} : memref<1x16x512xf32, #tpu.memory_space<vmem>>, vector<1x16x128xf32>,
      %c1_120 = arith.constant 1 : index
      %c0_121 = arith.constant 0 : index
      %c0_122 = arith.constant 0 : index
      %185 = vector.load %arg13[%c1_120, %c0_121, %c0_122] : memref<4x16x1xf32, #tpu.memory_space<vmem>>, vector<1x16x1xf32>
      %186 = vector.shape_cast %185 : vector<1x16x1xf32> to vector<16x1xf32>
      %187 = tpu.reciprocal %186 {approx = true} : vector<16x1xf32> -> vector<16x1xf32>
      %c1_123 = arith.constant 1 : index
      %c0_124 = arith.constant 0 : index
      %c0_125 = arith.constant 0 : index
      %188 = vector.load %arg14[%c1_123, %c0_124, %c0_125] : memref<4x16x128xf32, #tpu.memory_space<vmem>>, vector<1x16x128xf32>
      %189 = vector.shape_cast %188 : vector<1x16x128xf32> to vector<16x128xf32>
      %190 = vector.broadcast %187 : vector<16x1xf32> to vector<16x128xf32>
      %191 = arith.mulf %189, %190 : vector<16x128xf32>
      %c1_126 = arith.constant 1 : index
      %c0_127 = arith.constant 0 : index
      %c0_128 = arith.constant 0 : index
      %192 = vector.load %arg12[%c1_126, %c0_127, %c0_128] : memref<4x16x1xf32, #tpu.memory_space<vmem>>, vector<1x16x1xf32>
      %193 = vector.shape_cast %192 : vector<1x16x1xf32> to vector<16x1xf32>
      %cst_129 = arith.constant -1.000000e+29 : f32
      %194 = vector.broadcast %cst_129 : f32 to vector<16x1xf32>
      %195 = arith.cmpf ogt, %193, %194 : vector<16x1xf32>
      %cst_130 = arith.constant 0.000000e+00 : f32
      %196 = vector.shape_cast %195 : vector<16x1xi1> to vector<16x1xi1>
      %197 = vector.broadcast %196 : vector<16x1xi1> to vector<16x128xi1>
      %198 = vector.broadcast %cst_130 : f32 to vector<16x128xf32>
      %199 = arith.select %197, %191, %198 : vector<16x128xi1>, vector<16x128xf32>
      %c0_131 = arith.constant 0 : index
      %c0_132 = arith.constant 0 : index
      %c128_133 = arith.constant 128 : index
      %200 = vector.load %arg10[%c0_131, %c0_132, %c128_133] : memref<1x16x512xf32, #tpu.memory_space<vmem>>, vector<1x16x128xf32>
      %201 = vector.shape_cast %200 : vector<1x16x128xf32> to vector<16x128xf32>
      %202 = vector.shape_cast %199 : vector<16x128xf32> to vector<1x16x128xf32>
      tpu.vector_store %arg10[%c0_131, %c0_132, %c128_133], %202 {strides = array<i32>} : memref<1x16x512xf32, #tpu.memory_space<vmem>>, vector<1x16x128xf32>,
      %c2_134 = arith.constant 2 : index
      %c0_135 = arith.constant 0 : index
      %c0_136 = arith.constant 0 : index
      %203 = vector.load %arg13[%c2_134, %c0_135, %c0_136] : memref<4x16x1xf32, #tpu.memory_space<vmem>>, vector<1x16x1xf32>
      %204 = vector.shape_cast %203 : vector<1x16x1xf32> to vector<16x1xf32>
      %205 = tpu.reciprocal %204 {approx = true} : vector<16x1xf32> -> vector<16x1xf32>
      %c2_137 = arith.constant 2 : index
      %c0_138 = arith.constant 0 : index
      %c0_139 = arith.constant 0 : index
      %206 = vector.load %arg14[%c2_137, %c0_138, %c0_139] : memref<4x16x128xf32, #tpu.memory_space<vmem>>, vector<1x16x128xf32>
      %207 = vector.shape_cast %206 : vector<1x16x128xf32> to vector<16x128xf32>
      %208 = vector.broadcast %205 : vector<16x1xf32> to vector<16x128xf32>
      %209 = arith.mulf %207, %208 : vector<16x128xf32>
      %c2_140 = arith.constant 2 : index
      %c0_141 = arith.constant 0 : index
      %c0_142 = arith.constant 0 : index
      %210 = vector.load %arg12[%c2_140, %c0_141, %c0_142] : memref<4x16x1xf32, #tpu.memory_space<vmem>>, vector<1x16x1xf32>
      %211 = vector.shape_cast %210 : vector<1x16x1xf32> to vector<16x1xf32>
      %cst_143 = arith.constant -1.000000e+29 : f32
      %212 = vector.broadcast %cst_143 : f32 to vector<16x1xf32>
      %213 = arith.cmpf ogt, %211, %212 : vector<16x1xf32>
      %cst_144 = arith.constant 0.000000e+00 : f32
      %214 = vector.shape_cast %213 : vector<16x1xi1> to vector<16x1xi1>
      %215 = vector.broadcast %214 : vector<16x1xi1> to vector<16x128xi1>
      %216 = vector.broadcast %cst_144 : f32 to vector<16x128xf32>
      %217 = arith.select %215, %209, %216 : vector<16x128xi1>, vector<16x128xf32>
      %c0_145 = arith.constant 0 : index
      %c0_146 = arith.constant 0 : index
      %c256_147 = arith.constant 256 : index
      %218 = vector.load %arg10[%c0_145, %c0_146, %c256_147] : memref<1x16x512xf32, #tpu.memory_space<vmem>>, vector<1x16x128xf32>
      %219 = vector.shape_cast %218 : vector<1x16x128xf32> to vector<16x128xf32>
      %220 = vector.shape_cast %217 : vector<16x128xf32> to vector<1x16x128xf32>
      tpu.vector_store %arg10[%c0_145, %c0_146, %c256_147], %220 {strides = array<i32>} : memref<1x16x512xf32, #tpu.memory_space<vmem>>, vector<1x16x128xf32>,
      %c3_148 = arith.constant 3 : index
      %c0_149 = arith.constant 0 : index
      %c0_150 = arith.constant 0 : index
      %221 = vector.load %arg13[%c3_148, %c0_149, %c0_150] : memref<4x16x1xf32, #tpu.memory_space<vmem>>, vector<1x16x1xf32>
      %222 = vector.shape_cast %221 : vector<1x16x1xf32> to vector<16x1xf32>
      %223 = tpu.reciprocal %222 {approx = true} : vector<16x1xf32> -> vector<16x1xf32>
      %c3_151 = arith.constant 3 : index
      %c0_152 = arith.constant 0 : index
      %c0_153 = arith.constant 0 : index
      %224 = vector.load %arg14[%c3_151, %c0_152, %c0_153] : memref<4x16x128xf32, #tpu.memory_space<vmem>>, vector<1x16x128xf32>
      %225 = vector.shape_cast %224 : vector<1x16x128xf32> to vector<16x128xf32>
      %226 = vector.broadcast %223 : vector<16x1xf32> to vector<16x128xf32>
      %227 = arith.mulf %225, %226 : vector<16x128xf32>
      %c3_154 = arith.constant 3 : index
      %c0_155 = arith.constant 0 : index
      %c0_156 = arith.constant 0 : index
      %228 = vector.load %arg12[%c3_154, %c0_155, %c0_156] : memref<4x16x1xf32, #tpu.memory_space<vmem>>, vector<1x16x1xf32>
      %229 = vector.shape_cast %228 : vector<1x16x1xf32> to vector<16x1xf32>
      %cst_157 = arith.constant -1.000000e+29 : f32
      %230 = vector.broadcast %cst_157 : f32 to vector<16x1xf32>
      %231 = arith.cmpf ogt, %229, %230 : vector<16x1xf32>
      %cst_158 = arith.constant 0.000000e+00 : f32
      %232 = vector.shape_cast %231 : vector<16x1xi1> to vector<16x1xi1>
      %233 = vector.broadcast %232 : vector<16x1xi1> to vector<16x128xi1>
      %234 = vector.broadcast %cst_158 : f32 to vector<16x128xf32>
      %235 = arith.select %233, %227, %234 : vector<16x128xi1>, vector<16x128xf32>
      %c0_159 = arith.constant 0 : index
      %c0_160 = arith.constant 0 : index
      %c384_161 = arith.constant 384 : index
      %236 = vector.load %arg10[%c0_159, %c0_160, %c384_161] : memref<1x16x512xf32, #tpu.memory_space<vmem>>, vector<1x16x128xf32>
      %237 = vector.shape_cast %236 : vector<1x16x128xf32> to vector<16x128xf32>
      %238 = vector.shape_cast %235 : vector<16x128xf32> to vector<1x16x128xf32>
      tpu.vector_store %arg10[%c0_159, %c0_160, %c384_161], %238 {strides = array<i32>} : memref<1x16x512xf32, #tpu.memory_space<vmem>>, vector<1x16x128xf32>,
    } else {
    }
    return
  }
  func.func @transform_0(%arg0: i32, %arg1: i32, %arg2: i32) -> (i32, i32, i32) {
    %c0_i32 = arith.constant 0 : i32
    %c0_i32_0 = arith.constant 0 : i32
    return %arg0, %arg1, %c0_i32 : i32, i32, i32
  }
  func.func @transform_1(%arg0: i32, %arg1: i32, %arg2: i32) -> (i32, i32, i32) {
    %c0_i32 = arith.constant 0 : i32
    %c0_i32_0 = arith.constant 0 : i32
    return %arg0, %arg2, %c0_i32 : i32, i32, i32
  }
  func.func @transform_2(%arg0: i32, %arg1: i32, %arg2: i32) -> (i32, i32, i32) {
    %c0_i32 = arith.constant 0 : i32
    %c0_i32_0 = arith.constant 0 : i32
    return %arg0, %arg2, %c0_i32 : i32, i32, i32
  }
  func.func @transform_3(%arg0: i32, %arg1: i32, %arg2: i32) -> (i32, i32, i32) {
    %c0_i32 = arith.constant 0 : i32
    return %arg0, %arg1, %arg2 : i32, i32, i32
  }
  func.func @transform_4(%arg0: i32, %arg1: i32, %arg2: i32) -> (i32, i32) {
    %c0_i32 = arith.constant 0 : i32
    %c0_i32_0 = arith.constant 0 : i32
    %c0_i32_1 = arith.constant 0 : i32
    return %c0_i32, %c0_i32_0 : i32, i32
  }
  func.func @transform_5(%arg0: i32, %arg1: i32, %arg2: i32) -> (i32, i32) {
    %c0_i32 = arith.constant 0 : i32
    %c0_i32_0 = arith.constant 0 : i32
    %c0_i32_1 = arith.constant 0 : i32
    return %c0_i32, %c0_i32_0 : i32, i32
  }
  func.func @transform_6(%arg0: i32, %arg1: i32, %arg2: i32) -> (i32, i32) {
    %c0_i32 = arith.constant 0 : i32
    %c0_i32_0 = arith.constant 0 : i32
    %c0_i32_1 = arith.constant 0 : i32
    return %c0_i32, %c0_i32_0 : i32, i32
  }
  func.func @transform_7(%arg0: i32, %arg1: i32, %arg2: i32) -> (i32, i32, i32) {
    %c0_i32 = arith.constant 0 : i32
    %c0_i32_0 = arith.constant 0 : i32
    return %arg0, %arg1, %c0_i32 : i32, i32, i32
  }
}

module attributes {stable_mosaic.version = 11 : i64} {
  func.func @_mhmq_flash_kernel(%arg0: i32, %arg1: i32, %arg2: i32, %arg3: memref<1x16x32xbf16, #tpu.memory_space<vmem>>, %arg4: memref<1x16x24xbf16, #tpu.memory_space<vmem>>, %arg5: memref<1x16x20xbf16, #tpu.memory_space<vmem>>, %arg6: memref<1x16x16xbf16, #tpu.memory_space<vmem>>, %arg7: memref<32x512xbf16, #tpu.memory_space<vmem>>, %arg8: memref<24x512xbf16, #tpu.memory_space<vmem>>, %arg9: memref<20x512xbf16, #tpu.memory_space<vmem>>, %arg10: memref<1x16x512xf32, #tpu.memory_space<vmem>>, %arg11: memref<16x512xbf16, #tpu.memory_space<vmem>>, %arg12: memref<4x16x1xf32, #tpu.memory_space<vmem>>, %arg13: memref<4x16x1xf32, #tpu.memory_space<vmem>>, %arg14: memref<4x16x128xf32, #tpu.memory_space<vmem>>) attributes {dimension_semantics = [#tpu.dimension_semantics<parallel>, #tpu.dimension_semantics<parallel>, #tpu.dimension_semantics<arbitrary>], iteration_bounds = array<i64: 2, 1, 1>, scalar_prefetch = 0 : i64, scratch_operands = 4 : i64, tpu.core_type = #tpu.core_type<tc>, window_params = [{transform_indices = @transform_0, window_bounds = array<i64: 1, 16, 32>}, {transform_indices = @transform_1, window_bounds = array<i64: 1, 16, 24>}, {transform_indices = @transform_2, window_bounds = array<i64: 1, 16, 20>}, {transform_indices = @transform_3, window_bounds = array<i64: 1, 16, 16>}, {pipeline_mode = #tpu.pipeline_mode<synchronous>, transform_indices = @transform_4, window_bounds = array<i64: 32, 512>}, {pipeline_mode = #tpu.pipeline_mode<synchronous>, transform_indices = @transform_5, window_bounds = array<i64: 24, 512>}, {pipeline_mode = #tpu.pipeline_mode<synchronous>, transform_indices = @transform_6, window_bounds = array<i64: 20, 512>}, {transform_indices = @transform_7, window_bounds = array<i64: 1, 16, 512>}]} {
    %c0_i32 = arith.constant 0 : i32
    %0 = arith.cmpi eq, %arg2, %c0_i32 : i32
    %1 = arith.extui %0 : i1 to i32
    %c0_i32_0 = arith.constant 0 : i32
    %2 = arith.cmpi ne, %1, %c0_i32_0 : i32
    scf.if %2 {
      %c0_106 = arith.constant 0 : index
      %c0_107 = arith.constant 0 : index
      %c0_108 = arith.constant 0 : index
      %167 = vector.load %arg3[%c0_106, %c0_107, %c0_108] : memref<1x16x32xbf16, #tpu.memory_space<vmem>>, vector<1x16x32xbf16>
      %168 = vector.shape_cast %167 : vector<1x16x32xbf16> to vector<16x32xbf16>
      %c0_109 = arith.constant 0 : index
      %c0_110 = arith.constant 0 : index
      %169 = vector.load %arg7[%c0_109, %c0_110] : memref<32x512xbf16, #tpu.memory_space<vmem>>, vector<32x512xbf16>
      %cst_111 = arith.constant dense<0.000000e+00> : vector<16x512xf32>
      %170 = tpu.matmul %168, %169, %cst_111 {dimension_numbers = #tpu.dot_dimension_numbers<[1], [0], [0], [1], [0, 0, 1, 1], [], []>} : vector<16x32xbf16>, vector<32x512xbf16>, vector<16x512xf32> -> vector<16x512xf32>
      %171 = arith.truncf %170 : vector<16x512xf32> to vector<16x512xbf16>
      %c0_112 = arith.constant 0 : index
      %c0_113 = arith.constant 0 : index
      %172 = vector.load %arg11[%c0_112, %c0_113] : memref<16x512xbf16, #tpu.memory_space<vmem>>, vector<16x512xbf16>
      tpu.vector_store %arg11[%c0_112, %c0_113], %171 {strides = array<i32>} : memref<16x512xbf16, #tpu.memory_space<vmem>>, vector<16x512xbf16>,
      %cst_114 = arith.constant 0xFF800000 : f32
      %173 = vector.broadcast %cst_114 : f32 to vector<4x16x1xf32>
      %c0_115 = arith.constant 0 : index
      %c0_116 = arith.constant 0 : index
      %c0_117 = arith.constant 0 : index
      %174 = vector.load %arg12[%c0_115, %c0_116, %c0_117] : memref<4x16x1xf32, #tpu.memory_space<vmem>>, vector<4x16x1xf32>
      tpu.vector_store %arg12[%c0_115, %c0_116, %c0_117], %173 {strides = array<i32>} : memref<4x16x1xf32, #tpu.memory_space<vmem>>, vector<4x16x1xf32>,
      %cst_118 = arith.constant 0.000000e+00 : f32
      %175 = vector.broadcast %cst_118 : f32 to vector<4x16x1xf32>
      %c0_119 = arith.constant 0 : index
      %c0_120 = arith.constant 0 : index
      %c0_121 = arith.constant 0 : index
      %176 = vector.load %arg13[%c0_119, %c0_120, %c0_121] : memref<4x16x1xf32, #tpu.memory_space<vmem>>, vector<4x16x1xf32>
      tpu.vector_store %arg13[%c0_119, %c0_120, %c0_121], %175 {strides = array<i32>} : memref<4x16x1xf32, #tpu.memory_space<vmem>>, vector<4x16x1xf32>,
      %cst_122 = arith.constant 0.000000e+00 : f32
      %177 = vector.broadcast %cst_122 : f32 to vector<4x16x128xf32>
      %c0_123 = arith.constant 0 : index
      %c0_124 = arith.constant 0 : index
      %c0_125 = arith.constant 0 : index
      %178 = vector.load %arg14[%c0_123, %c0_124, %c0_125] : memref<4x16x128xf32, #tpu.memory_space<vmem>>, vector<4x16x128xf32>
      tpu.vector_store %arg14[%c0_123, %c0_124, %c0_125], %177 {strides = array<i32>} : memref<4x16x128xf32, #tpu.memory_space<vmem>>, vector<4x16x128xf32>,
    } else {
    }
    %c0 = arith.constant 0 : index
    %c0_1 = arith.constant 0 : index
    %c0_2 = arith.constant 0 : index
    %3 = vector.load %arg4[%c0, %c0_1, %c0_2] : memref<1x16x24xbf16, #tpu.memory_space<vmem>>, vector<1x16x24xbf16>
    %4 = vector.shape_cast %3 : vector<1x16x24xbf16> to vector<16x24xbf16>
    %c0_3 = arith.constant 0 : index
    %c0_4 = arith.constant 0 : index
    %5 = vector.load %arg8[%c0_3, %c0_4] : memref<24x512xbf16, #tpu.memory_space<vmem>>, vector<24x512xbf16>
    %cst = arith.constant dense<0.000000e+00> : vector<16x512xf32>
    %6 = tpu.matmul %4, %5, %cst {dimension_numbers = #tpu.dot_dimension_numbers<[1], [0], [0], [1], [0, 0, 1, 1], [], []>} : vector<16x24xbf16>, vector<24x512xbf16>, vector<16x512xf32> -> vector<16x512xf32>
    %7 = arith.truncf %6 : vector<16x512xf32> to vector<16x512xbf16>
    %c0_5 = arith.constant 0 : index
    %c0_6 = arith.constant 0 : index
    %c0_7 = arith.constant 0 : index
    %8 = vector.load %arg5[%c0_5, %c0_6, %c0_7] : memref<1x16x20xbf16, #tpu.memory_space<vmem>>, vector<1x16x20xbf16>
    %9 = vector.shape_cast %8 : vector<1x16x20xbf16> to vector<16x20xbf16>
    %c0_8 = arith.constant 0 : index
    %c0_9 = arith.constant 0 : index
    %10 = vector.load %arg9[%c0_8, %c0_9] : memref<20x512xbf16, #tpu.memory_space<vmem>>, vector<20x512xbf16>
    %cst_10 = arith.constant dense<0.000000e+00> : vector<16x512xf32>
    %11 = tpu.matmul %9, %10, %cst_10 {dimension_numbers = #tpu.dot_dimension_numbers<[1], [0], [0], [1], [0, 0, 1, 1], [], []>} : vector<16x20xbf16>, vector<20x512xbf16>, vector<16x512xf32> -> vector<16x512xf32>
    %12 = arith.truncf %11 : vector<16x512xf32> to vector<16x512xbf16>
    %c0_11 = arith.constant 0 : index
    %c0_12 = arith.constant 0 : index
    %c0_13 = arith.constant 0 : index
    %13 = vector.load %arg6[%c0_11, %c0_12, %c0_13] : memref<1x16x16xbf16, #tpu.memory_space<vmem>>, vector<1x16x16xbf16>
    %14 = vector.shape_cast %13 : vector<1x16x16xbf16> to vector<16x16xbf16>
    %15 = arith.extf %14 : vector<16x16xbf16> to vector<16x16xf32>
    %c0_14 = arith.constant 0 : index
    %c0_15 = arith.constant 0 : index
    %16 = vector.load %arg11[%c0_14, %c0_15] : memref<16x512xbf16, #tpu.memory_space<vmem>>, vector<16x128xbf16>
    %17 = vector.extract_strided_slice %7 {offsets = [0, 0], sizes = [16, 128], strides = [1, 1]} : vector<16x512xbf16> to vector<16x128xbf16>
    %18 = vector.extract_strided_slice %12 {offsets = [0, 0], sizes = [16, 128], strides = [1, 1]} : vector<16x512xbf16> to vector<16x128xbf16>
    %cst_16 = arith.constant dense<0.000000e+00> : vector<16x16xf32>
    %19 = tpu.matmul %16, %17, %cst_16 {dimension_numbers = #tpu.dot_dimension_numbers<[1], [1], [0], [0], [0, 0, 1, 0], [], []>} : vector<16x128xbf16>, vector<16x128xbf16>, vector<16x16xf32> -> vector<16x16xf32>
    %20 = arith.addf %19, %15 : vector<16x16xf32>
    %c0_17 = arith.constant 0 : index
    %c0_18 = arith.constant 0 : index
    %c0_19 = arith.constant 0 : index
    %21 = vector.load %arg12[%c0_17, %c0_18, %c0_19] : memref<4x16x1xf32, #tpu.memory_space<vmem>>, vector<1x16x1xf32>
    %22 = vector.shape_cast %21 : vector<1x16x1xf32> to vector<16x1xf32>
    %cst_20 = arith.constant dense<0xFF800000> : vector<16xf32>
    %23 = vector.multi_reduction <maximumf>, %20, %cst_20 [1] : vector<16x16xf32> to vector<16xf32>
    %24 = vector.shape_cast %23 : vector<16xf32> to vector<16x1xf32>
    %25 = arith.maximumf %22, %24 : vector<16x1xf32>
    %26 = arith.subf %22, %25 : vector<16x1xf32>
    %27 = math.exp %26 : vector<16x1xf32>
    %28 = vector.broadcast %25 : vector<16x1xf32> to vector<16x16xf32>
    %29 = arith.subf %20, %28 : vector<16x16xf32>
    %30 = math.exp %29 : vector<16x16xf32>
    %c0_21 = arith.constant 0 : index
    %c0_22 = arith.constant 0 : index
    %c0_23 = arith.constant 0 : index
    %31 = vector.load %arg13[%c0_21, %c0_22, %c0_23] : memref<4x16x1xf32, #tpu.memory_space<vmem>>, vector<1x16x1xf32>
    %32 = vector.shape_cast %31 : vector<1x16x1xf32> to vector<16x1xf32>
    %33 = arith.mulf %27, %32 : vector<16x1xf32>
    %cst_24 = arith.constant dense<0.000000e+00> : vector<16xf32>
    %34 = vector.multi_reduction <add>, %30, %cst_24 [1] : vector<16x16xf32> to vector<16xf32>
    %35 = vector.shape_cast %34 : vector<16xf32> to vector<16x1xf32>
    %36 = arith.addf %33, %35 : vector<16x1xf32>
    %c0_25 = arith.constant 0 : index
    %c0_26 = arith.constant 0 : index
    %c0_27 = arith.constant 0 : index
    %37 = vector.load %arg13[%c0_25, %c0_26, %c0_27] : memref<4x16x1xf32, #tpu.memory_space<vmem>>, vector<1x16x1xf32>
    %38 = vector.shape_cast %37 : vector<1x16x1xf32> to vector<16x1xf32>
    %39 = vector.shape_cast %36 : vector<16x1xf32> to vector<1x16x1xf32>
    tpu.vector_store %arg13[%c0_25, %c0_26, %c0_27], %39 {strides = array<i32>} : memref<4x16x1xf32, #tpu.memory_space<vmem>>, vector<1x16x1xf32>,
    %c0_28 = arith.constant 0 : index
    %c0_29 = arith.constant 0 : index
    %c0_30 = arith.constant 0 : index
    %40 = vector.load %arg14[%c0_28, %c0_29, %c0_30] : memref<4x16x128xf32, #tpu.memory_space<vmem>>, vector<1x16x128xf32>
    %41 = vector.shape_cast %40 : vector<1x16x128xf32> to vector<16x128xf32>
    %42 = vector.broadcast %27 : vector<16x1xf32> to vector<16x128xf32>
    %43 = arith.mulf %42, %41 : vector<16x128xf32>
    %44 = arith.truncf %30 : vector<16x16xf32> to vector<16x16xbf16>
    %cst_31 = arith.constant dense<0.000000e+00> : vector<16x128xf32>
    %45 = tpu.matmul %44, %18, %cst_31 {dimension_numbers = #tpu.dot_dimension_numbers<[1], [0], [0], [1], [0, 0, 1, 1], [], []>} : vector<16x16xbf16>, vector<16x128xbf16>, vector<16x128xf32> -> vector<16x128xf32>
    %46 = arith.addf %43, %45 : vector<16x128xf32>
    %c0_32 = arith.constant 0 : index
    %c0_33 = arith.constant 0 : index
    %c0_34 = arith.constant 0 : index
    %47 = vector.load %arg14[%c0_32, %c0_33, %c0_34] : memref<4x16x128xf32, #tpu.memory_space<vmem>>, vector<1x16x128xf32>
    %48 = vector.shape_cast %47 : vector<1x16x128xf32> to vector<16x128xf32>
    %49 = vector.shape_cast %46 : vector<16x128xf32> to vector<1x16x128xf32>
    tpu.vector_store %arg14[%c0_32, %c0_33, %c0_34], %49 {strides = array<i32>} : memref<4x16x128xf32, #tpu.memory_space<vmem>>, vector<1x16x128xf32>,
    %c0_35 = arith.constant 0 : index
    %c0_36 = arith.constant 0 : index
    %c0_37 = arith.constant 0 : index
    %50 = vector.load %arg12[%c0_35, %c0_36, %c0_37] : memref<4x16x1xf32, #tpu.memory_space<vmem>>, vector<1x16x1xf32>
    %51 = vector.shape_cast %50 : vector<1x16x1xf32> to vector<16x1xf32>
    %52 = vector.shape_cast %25 : vector<16x1xf32> to vector<1x16x1xf32>
    tpu.vector_store %arg12[%c0_35, %c0_36, %c0_37], %52 {strides = array<i32>} : memref<4x16x1xf32, #tpu.memory_space<vmem>>, vector<1x16x1xf32>,
    %c0_38 = arith.constant 0 : index
    %c128 = arith.constant 128 : index
    %53 = vector.load %arg11[%c0_38, %c128] : memref<16x512xbf16, #tpu.memory_space<vmem>>, vector<16x128xbf16>
    %54 = vector.extract_strided_slice %7 {offsets = [0, 128], sizes = [16, 128], strides = [1, 1]} : vector<16x512xbf16> to vector<16x128xbf16>
    %55 = vector.extract_strided_slice %12 {offsets = [0, 128], sizes = [16, 128], strides = [1, 1]} : vector<16x512xbf16> to vector<16x128xbf16>
    %cst_39 = arith.constant dense<0.000000e+00> : vector<16x16xf32>
    %56 = tpu.matmul %53, %54, %cst_39 {dimension_numbers = #tpu.dot_dimension_numbers<[1], [1], [0], [0], [0, 0, 1, 0], [], []>} : vector<16x128xbf16>, vector<16x128xbf16>, vector<16x16xf32> -> vector<16x16xf32>
    %57 = arith.addf %56, %15 : vector<16x16xf32>
    %c1 = arith.constant 1 : index
    %c0_40 = arith.constant 0 : index
    %c0_41 = arith.constant 0 : index
    %58 = vector.load %arg12[%c1, %c0_40, %c0_41] : memref<4x16x1xf32, #tpu.memory_space<vmem>>, vector<1x16x1xf32>
    %59 = vector.shape_cast %58 : vector<1x16x1xf32> to vector<16x1xf32>
    %cst_42 = arith.constant dense<0xFF800000> : vector<16xf32>
    %60 = vector.multi_reduction <maximumf>, %57, %cst_42 [1] : vector<16x16xf32> to vector<16xf32>
    %61 = vector.shape_cast %60 : vector<16xf32> to vector<16x1xf32>
    %62 = arith.maximumf %59, %61 : vector<16x1xf32>
    %63 = arith.subf %59, %62 : vector<16x1xf32>
    %64 = math.exp %63 : vector<16x1xf32>
    %65 = vector.broadcast %62 : vector<16x1xf32> to vector<16x16xf32>
    %66 = arith.subf %57, %65 : vector<16x16xf32>
    %67 = math.exp %66 : vector<16x16xf32>
    %c1_43 = arith.constant 1 : index
    %c0_44 = arith.constant 0 : index
    %c0_45 = arith.constant 0 : index
    %68 = vector.load %arg13[%c1_43, %c0_44, %c0_45] : memref<4x16x1xf32, #tpu.memory_space<vmem>>, vector<1x16x1xf32>
    %69 = vector.shape_cast %68 : vector<1x16x1xf32> to vector<16x1xf32>
    %70 = arith.mulf %64, %69 : vector<16x1xf32>
    %cst_46 = arith.constant dense<0.000000e+00> : vector<16xf32>
    %71 = vector.multi_reduction <add>, %67, %cst_46 [1] : vector<16x16xf32> to vector<16xf32>
    %72 = vector.shape_cast %71 : vector<16xf32> to vector<16x1xf32>
    %73 = arith.addf %70, %72 : vector<16x1xf32>
    %c1_47 = arith.constant 1 : index
    %c0_48 = arith.constant 0 : index
    %c0_49 = arith.constant 0 : index
    %74 = vector.load %arg13[%c1_47, %c0_48, %c0_49] : memref<4x16x1xf32, #tpu.memory_space<vmem>>, vector<1x16x1xf32>
    %75 = vector.shape_cast %74 : vector<1x16x1xf32> to vector<16x1xf32>
    %76 = vector.shape_cast %73 : vector<16x1xf32> to vector<1x16x1xf32>
    tpu.vector_store %arg13[%c1_47, %c0_48, %c0_49], %76 {strides = array<i32>} : memref<4x16x1xf32, #tpu.memory_space<vmem>>, vector<1x16x1xf32>,
    %c1_50 = arith.constant 1 : index
    %c0_51 = arith.constant 0 : index
    %c0_52 = arith.constant 0 : index
    %77 = vector.load %arg14[%c1_50, %c0_51, %c0_52] : memref<4x16x128xf32, #tpu.memory_space<vmem>>, vector<1x16x128xf32>
    %78 = vector.shape_cast %77 : vector<1x16x128xf32> to vector<16x128xf32>
    %79 = vector.broadcast %64 : vector<16x1xf32> to vector<16x128xf32>
    %80 = arith.mulf %79, %78 : vector<16x128xf32>
    %81 = arith.truncf %67 : vector<16x16xf32> to vector<16x16xbf16>
    %cst_53 = arith.constant dense<0.000000e+00> : vector<16x128xf32>
    %82 = tpu.matmul %81, %55, %cst_53 {dimension_numbers = #tpu.dot_dimension_numbers<[1], [0], [0], [1], [0, 0, 1, 1], [], []>} : vector<16x16xbf16>, vector<16x128xbf16>, vector<16x128xf32> -> vector<16x128xf32>
    %83 = arith.addf %80, %82 : vector<16x128xf32>
    %c1_54 = arith.constant 1 : index
    %c0_55 = arith.constant 0 : index
    %c0_56 = arith.constant 0 : index
    %84 = vector.load %arg14[%c1_54, %c0_55, %c0_56] : memref<4x16x128xf32, #tpu.memory_space<vmem>>, vector<1x16x128xf32>
    %85 = vector.shape_cast %84 : vector<1x16x128xf32> to vector<16x128xf32>
    %86 = vector.shape_cast %83 : vector<16x128xf32> to vector<1x16x128xf32>
    tpu.vector_store %arg14[%c1_54, %c0_55, %c0_56], %86 {strides = array<i32>} : memref<4x16x128xf32, #tpu.memory_space<vmem>>, vector<1x16x128xf32>,
    %c1_57 = arith.constant 1 : index
    %c0_58 = arith.constant 0 : index
    %c0_59 = arith.constant 0 : index
    %87 = vector.load %arg12[%c1_57, %c0_58, %c0_59] : memref<4x16x1xf32, #tpu.memory_space<vmem>>, vector<1x16x1xf32>
    %88 = vector.shape_cast %87 : vector<1x16x1xf32> to vector<16x1xf32>
    %89 = vector.shape_cast %62 : vector<16x1xf32> to vector<1x16x1xf32>
    tpu.vector_store %arg12[%c1_57, %c0_58, %c0_59], %89 {strides = array<i32>} : memref<4x16x1xf32, #tpu.memory_space<vmem>>, vector<1x16x1xf32>,
    %c0_60 = arith.constant 0 : index
    %c256 = arith.constant 256 : index
    %90 = vector.load %arg11[%c0_60, %c256] : memref<16x512xbf16, #tpu.memory_space<vmem>>, vector<16x128xbf16>
    %91 = vector.extract_strided_slice %7 {offsets = [0, 256], sizes = [16, 128], strides = [1, 1]} : vector<16x512xbf16> to vector<16x128xbf16>
    %92 = vector.extract_strided_slice %12 {offsets = [0, 256], sizes = [16, 128], strides = [1, 1]} : vector<16x512xbf16> to vector<16x128xbf16>
    %cst_61 = arith.constant dense<0.000000e+00> : vector<16x16xf32>
    %93 = tpu.matmul %90, %91, %cst_61 {dimension_numbers = #tpu.dot_dimension_numbers<[1], [1], [0], [0], [0, 0, 1, 0], [], []>} : vector<16x128xbf16>, vector<16x128xbf16>, vector<16x16xf32> -> vector<16x16xf32>
    %94 = arith.addf %93, %15 : vector<16x16xf32>
    %c2 = arith.constant 2 : index
    %c0_62 = arith.constant 0 : index
    %c0_63 = arith.constant 0 : index
    %95 = vector.load %arg12[%c2, %c0_62, %c0_63] : memref<4x16x1xf32, #tpu.memory_space<vmem>>, vector<1x16x1xf32>
    %96 = vector.shape_cast %95 : vector<1x16x1xf32> to vector<16x1xf32>
    %cst_64 = arith.constant dense<0xFF800000> : vector<16xf32>
    %97 = vector.multi_reduction <maximumf>, %94, %cst_64 [1] : vector<16x16xf32> to vector<16xf32>
    %98 = vector.shape_cast %97 : vector<16xf32> to vector<16x1xf32>
    %99 = arith.maximumf %96, %98 : vector<16x1xf32>
    %100 = arith.subf %96, %99 : vector<16x1xf32>
    %101 = math.exp %100 : vector<16x1xf32>
    %102 = vector.broadcast %99 : vector<16x1xf32> to vector<16x16xf32>
    %103 = arith.subf %94, %102 : vector<16x16xf32>
    %104 = math.exp %103 : vector<16x16xf32>
    %c2_65 = arith.constant 2 : index
    %c0_66 = arith.constant 0 : index
    %c0_67 = arith.constant 0 : index
    %105 = vector.load %arg13[%c2_65, %c0_66, %c0_67] : memref<4x16x1xf32, #tpu.memory_space<vmem>>, vector<1x16x1xf32>
    %106 = vector.shape_cast %105 : vector<1x16x1xf32> to vector<16x1xf32>
    %107 = arith.mulf %101, %106 : vector<16x1xf32>
    %cst_68 = arith.constant dense<0.000000e+00> : vector<16xf32>
    %108 = vector.multi_reduction <add>, %104, %cst_68 [1] : vector<16x16xf32> to vector<16xf32>
    %109 = vector.shape_cast %108 : vector<16xf32> to vector<16x1xf32>
    %110 = arith.addf %107, %109 : vector<16x1xf32>
    %c2_69 = arith.constant 2 : index
    %c0_70 = arith.constant 0 : index
    %c0_71 = arith.constant 0 : index
    %111 = vector.load %arg13[%c2_69, %c0_70, %c0_71] : memref<4x16x1xf32, #tpu.memory_space<vmem>>, vector<1x16x1xf32>
    %112 = vector.shape_cast %111 : vector<1x16x1xf32> to vector<16x1xf32>
    %113 = vector.shape_cast %110 : vector<16x1xf32> to vector<1x16x1xf32>
    tpu.vector_store %arg13[%c2_69, %c0_70, %c0_71], %113 {strides = array<i32>} : memref<4x16x1xf32, #tpu.memory_space<vmem>>, vector<1x16x1xf32>,
    %c2_72 = arith.constant 2 : index
    %c0_73 = arith.constant 0 : index
    %c0_74 = arith.constant 0 : index
    %114 = vector.load %arg14[%c2_72, %c0_73, %c0_74] : memref<4x16x128xf32, #tpu.memory_space<vmem>>, vector<1x16x128xf32>
    %115 = vector.shape_cast %114 : vector<1x16x128xf32> to vector<16x128xf32>
    %116 = vector.broadcast %101 : vector<16x1xf32> to vector<16x128xf32>
    %117 = arith.mulf %116, %115 : vector<16x128xf32>
    %118 = arith.truncf %104 : vector<16x16xf32> to vector<16x16xbf16>
    %cst_75 = arith.constant dense<0.000000e+00> : vector<16x128xf32>
    %119 = tpu.matmul %118, %92, %cst_75 {dimension_numbers = #tpu.dot_dimension_numbers<[1], [0], [0], [1], [0, 0, 1, 1], [], []>} : vector<16x16xbf16>, vector<16x128xbf16>, vector<16x128xf32> -> vector<16x128xf32>
    %120 = arith.addf %117, %119 : vector<16x128xf32>
    %c2_76 = arith.constant 2 : index
    %c0_77 = arith.constant 0 : index
    %c0_78 = arith.constant 0 : index
    %121 = vector.load %arg14[%c2_76, %c0_77, %c0_78] : memref<4x16x128xf32, #tpu.memory_space<vmem>>, vector<1x16x128xf32>
    %122 = vector.shape_cast %121 : vector<1x16x128xf32> to vector<16x128xf32>
    %123 = vector.shape_cast %120 : vector<16x128xf32> to vector<1x16x128xf32>
    tpu.vector_store %arg14[%c2_76, %c0_77, %c0_78], %123 {strides = array<i32>} : memref<4x16x128xf32, #tpu.memory_space<vmem>>, vector<1x16x128xf32>,
    %c2_79 = arith.constant 2 : index
    %c0_80 = arith.constant 0 : index
    %c0_81 = arith.constant 0 : index
    %124 = vector.load %arg12[%c2_79, %c0_80, %c0_81] : memref<4x16x1xf32, #tpu.memory_space<vmem>>, vector<1x16x1xf32>
    %125 = vector.shape_cast %124 : vector<1x16x1xf32> to vector<16x1xf32>
    %126 = vector.shape_cast %99 : vector<16x1xf32> to vector<1x16x1xf32>
    tpu.vector_store %arg12[%c2_79, %c0_80, %c0_81], %126 {strides = array<i32>} : memref<4x16x1xf32, #tpu.memory_space<vmem>>, vector<1x16x1xf32>,
    %c0_82 = arith.constant 0 : index
    %c384 = arith.constant 384 : index
    %127 = vector.load %arg11[%c0_82, %c384] : memref<16x512xbf16, #tpu.memory_space<vmem>>, vector<16x128xbf16>
    %128 = vector.extract_strided_slice %7 {offsets = [0, 384], sizes = [16, 128], strides = [1, 1]} : vector<16x512xbf16> to vector<16x128xbf16>
    %129 = vector.extract_strided_slice %12 {offsets = [0, 384], sizes = [16, 128], strides = [1, 1]} : vector<16x512xbf16> to vector<16x128xbf16>
    %cst_83 = arith.constant dense<0.000000e+00> : vector<16x16xf32>
    %130 = tpu.matmul %127, %128, %cst_83 {dimension_numbers = #tpu.dot_dimension_numbers<[1], [1], [0], [0], [0, 0, 1, 0], [], []>} : vector<16x128xbf16>, vector<16x128xbf16>, vector<16x16xf32> -> vector<16x16xf32>
    %131 = arith.addf %130, %15 : vector<16x16xf32>
    %c3 = arith.constant 3 : index
    %c0_84 = arith.constant 0 : index
    %c0_85 = arith.constant 0 : index
    %132 = vector.load %arg12[%c3, %c0_84, %c0_85] : memref<4x16x1xf32, #tpu.memory_space<vmem>>, vector<1x16x1xf32>
    %133 = vector.shape_cast %132 : vector<1x16x1xf32> to vector<16x1xf32>
    %cst_86 = arith.constant dense<0xFF800000> : vector<16xf32>
    %134 = vector.multi_reduction <maximumf>, %131, %cst_86 [1] : vector<16x16xf32> to vector<16xf32>
    %135 = vector.shape_cast %134 : vector<16xf32> to vector<16x1xf32>
    %136 = arith.maximumf %133, %135 : vector<16x1xf32>
    %137 = arith.subf %133, %136 : vector<16x1xf32>
    %138 = math.exp %137 : vector<16x1xf32>
    %139 = vector.broadcast %136 : vector<16x1xf32> to vector<16x16xf32>
    %140 = arith.subf %131, %139 : vector<16x16xf32>
    %141 = math.exp %140 : vector<16x16xf32>
    %c3_87 = arith.constant 3 : index
    %c0_88 = arith.constant 0 : index
    %c0_89 = arith.constant 0 : index
    %142 = vector.load %arg13[%c3_87, %c0_88, %c0_89] : memref<4x16x1xf32, #tpu.memory_space<vmem>>, vector<1x16x1xf32>
    %143 = vector.shape_cast %142 : vector<1x16x1xf32> to vector<16x1xf32>
    %144 = arith.mulf %138, %143 : vector<16x1xf32>
    %cst_90 = arith.constant dense<0.000000e+00> : vector<16xf32>
    %145 = vector.multi_reduction <add>, %141, %cst_90 [1] : vector<16x16xf32> to vector<16xf32>
    %146 = vector.shape_cast %145 : vector<16xf32> to vector<16x1xf32>
    %147 = arith.addf %144, %146 : vector<16x1xf32>
    %c3_91 = arith.constant 3 : index
    %c0_92 = arith.constant 0 : index
    %c0_93 = arith.constant 0 : index
    %148 = vector.load %arg13[%c3_91, %c0_92, %c0_93] : memref<4x16x1xf32, #tpu.memory_space<vmem>>, vector<1x16x1xf32>
    %149 = vector.shape_cast %148 : vector<1x16x1xf32> to vector<16x1xf32>
    %150 = vector.shape_cast %147 : vector<16x1xf32> to vector<1x16x1xf32>
    tpu.vector_store %arg13[%c3_91, %c0_92, %c0_93], %150 {strides = array<i32>} : memref<4x16x1xf32, #tpu.memory_space<vmem>>, vector<1x16x1xf32>,
    %c3_94 = arith.constant 3 : index
    %c0_95 = arith.constant 0 : index
    %c0_96 = arith.constant 0 : index
    %151 = vector.load %arg14[%c3_94, %c0_95, %c0_96] : memref<4x16x128xf32, #tpu.memory_space<vmem>>, vector<1x16x128xf32>
    %152 = vector.shape_cast %151 : vector<1x16x128xf32> to vector<16x128xf32>
    %153 = vector.broadcast %138 : vector<16x1xf32> to vector<16x128xf32>
    %154 = arith.mulf %153, %152 : vector<16x128xf32>
    %155 = arith.truncf %141 : vector<16x16xf32> to vector<16x16xbf16>
    %cst_97 = arith.constant dense<0.000000e+00> : vector<16x128xf32>
    %156 = tpu.matmul %155, %129, %cst_97 {dimension_numbers = #tpu.dot_dimension_numbers<[1], [0], [0], [1], [0, 0, 1, 1], [], []>} : vector<16x16xbf16>, vector<16x128xbf16>, vector<16x128xf32> -> vector<16x128xf32>
    %157 = arith.addf %154, %156 : vector<16x128xf32>
    %c3_98 = arith.constant 3 : index
    %c0_99 = arith.constant 0 : index
    %c0_100 = arith.constant 0 : index
    %158 = vector.load %arg14[%c3_98, %c0_99, %c0_100] : memref<4x16x128xf32, #tpu.memory_space<vmem>>, vector<1x16x128xf32>
    %159 = vector.shape_cast %158 : vector<1x16x128xf32> to vector<16x128xf32>
    %160 = vector.shape_cast %157 : vector<16x128xf32> to vector<1x16x128xf32>
    tpu.vector_store %arg14[%c3_98, %c0_99, %c0_100], %160 {strides = array<i32>} : memref<4x16x128xf32, #tpu.memory_space<vmem>>, vector<1x16x128xf32>,
    %c3_101 = arith.constant 3 : index
    %c0_102 = arith.constant 0 : index
    %c0_103 = arith.constant 0 : index
    %161 = vector.load %arg12[%c3_101, %c0_102, %c0_103] : memref<4x16x1xf32, #tpu.memory_space<vmem>>, vector<1x16x1xf32>
    %162 = vector.shape_cast %161 : vector<1x16x1xf32> to vector<16x1xf32>
    %163 = vector.shape_cast %136 : vector<16x1xf32> to vector<1x16x1xf32>
    tpu.vector_store %arg12[%c3_101, %c0_102, %c0_103], %163 {strides = array<i32>} : memref<4x16x1xf32, #tpu.memory_space<vmem>>, vector<1x16x1xf32>,
    %c0_i32_104 = arith.constant 0 : i32
    %164 = arith.cmpi eq, %arg2, %c0_i32_104 : i32
    %165 = arith.extui %164 : i1 to i32
    %c0_i32_105 = arith.constant 0 : i32
    %166 = arith.cmpi ne, %165, %c0_i32_105 : i32
    scf.if %166 {
      %c0_106 = arith.constant 0 : index
      %c0_107 = arith.constant 0 : index
      %c0_108 = arith.constant 0 : index
      %167 = vector.load %arg13[%c0_106, %c0_107, %c0_108] : memref<4x16x1xf32, #tpu.memory_space<vmem>>, vector<1x16x1xf32>
      %168 = vector.shape_cast %167 : vector<1x16x1xf32> to vector<16x1xf32>
      %169 = tpu.reciprocal %168 {approx = true} : vector<16x1xf32> -> vector<16x1xf32>
      %c0_109 = arith.constant 0 : index
      %c0_110 = arith.constant 0 : index
      %c0_111 = arith.constant 0 : index
      %170 = vector.load %arg14[%c0_109, %c0_110, %c0_111] : memref<4x16x128xf32, #tpu.memory_space<vmem>>, vector<1x16x128xf32>
      %171 = vector.shape_cast %170 : vector<1x16x128xf32> to vector<16x128xf32>
      %172 = vector.broadcast %169 : vector<16x1xf32> to vector<16x128xf32>
      %173 = arith.mulf %171, %172 : vector<16x128xf32>
      %c0_112 = arith.constant 0 : index
      %c0_113 = arith.constant 0 : index
      %c0_114 = arith.constant 0 : index
      %174 = vector.load %arg12[%c0_112, %c0_113, %c0_114] : memref<4x16x1xf32, #tpu.memory_space<vmem>>, vector<1x16x1xf32>
      %175 = vector.shape_cast %174 : vector<1x16x1xf32> to vector<16x1xf32>
      %cst_115 = arith.constant -1.000000e+29 : f32
      %176 = vector.broadcast %cst_115 : f32 to vector<16x1xf32>
      %177 = arith.cmpf ogt, %175, %176 : vector<16x1xf32>
      %cst_116 = arith.constant 0.000000e+00 : f32
      %178 = vector.shape_cast %177 : vector<16x1xi1> to vector<16x1xi1>
      %179 = vector.broadcast %178 : vector<16x1xi1> to vector<16x128xi1>
      %180 = vector.broadcast %cst_116 : f32 to vector<16x128xf32>
      %181 = arith.select %179, %173, %180 : vector<16x128xi1>, vector<16x128xf32>
      %c0_117 = arith.constant 0 : index
      %c0_118 = arith.constant 0 : index
      %c0_119 = arith.constant 0 : index
      %182 = vector.load %arg10[%c0_117, %c0_118, %c0_119] : memref<1x16x512xf32, #tpu.memory_space<vmem>>, vector<1x16x128xf32>
      %183 = vector.shape_cast %182 : vector<1x16x128xf32> to vector<16x128xf32>
      %184 = vector.shape_cast %181 : vector<16x128xf32> to vector<1x16x128xf32>
      tpu.vector_store %arg10[%c0_117, %c0_118, %c0_119], %184 {strides = array<i32>} : memref<1x16x512xf32, #tpu.memory_space<vmem>>, vector<1x16x128xf32>,
      %c1_120 = arith.constant 1 : index
      %c0_121 = arith.constant 0 : index
      %c0_122 = arith.constant 0 : index
      %185 = vector.load %arg13[%c1_120, %c0_121, %c0_122] : memref<4x16x1xf32, #tpu.memory_space<vmem>>, vector<1x16x1xf32>
      %186 = vector.shape_cast %185 : vector<1x16x1xf32> to vector<16x1xf32>
      %187 = tpu.reciprocal %186 {approx = true} : vector<16x1xf32> -> vector<16x1xf32>
      %c1_123 = arith.constant 1 : index
      %c0_124 = arith.constant 0 : index
      %c0_125 = arith.constant 0 : index
      %188 = vector.load %arg14[%c1_123, %c0_124, %c0_125] : memref<4x16x128xf32, #tpu.memory_space<vmem>>, vector<1x16x128xf32>
      %189 = vector.shape_cast %188 : vector<1x16x128xf32> to vector<16x128xf32>
      %190 = vector.broadcast %187 : vector<16x1xf32> to vector<16x128xf32>
      %191 = arith.mulf %189, %190 : vector<16x128xf32>
      %c1_126 = arith.constant 1 : index
      %c0_127 = arith.constant 0 : index
      %c0_128 = arith.constant 0 : index
      %192 = vector.load %arg12[%c1_126, %c0_127, %c0_128] : memref<4x16x1xf32, #tpu.memory_space<vmem>>, vector<1x16x1xf32>
      %193 = vector.shape_cast %192 : vector<1x16x1xf32> to vector<16x1xf32>
      %cst_129 = arith.constant -1.000000e+29 : f32
      %194 = vector.broadcast %cst_129 : f32 to vector<16x1xf32>
      %195 = arith.cmpf ogt, %193, %194 : vector<16x1xf32>
      %cst_130 = arith.constant 0.000000e+00 : f32
      %196 = vector.shape_cast %195 : vector<16x1xi1> to vector<16x1xi1>
      %197 = vector.broadcast %196 : vector<16x1xi1> to vector<16x128xi1>
      %198 = vector.broadcast %cst_130 : f32 to vector<16x128xf32>
      %199 = arith.select %197, %191, %198 : vector<16x128xi1>, vector<16x128xf32>
      %c0_131 = arith.constant 0 : index
      %c0_132 = arith.constant 0 : index
      %c128_133 = arith.constant 128 : index
      %200 = vector.load %arg10[%c0_131, %c0_132, %c128_133] : memref<1x16x512xf32, #tpu.memory_space<vmem>>, vector<1x16x128xf32>
      %201 = vector.shape_cast %200 : vector<1x16x128xf32> to vector<16x128xf32>
      %202 = vector.shape_cast %199 : vector<16x128xf32> to vector<1x16x128xf32>
      tpu.vector_store %arg10[%c0_131, %c0_132, %c128_133], %202 {strides = array<i32>} : memref<1x16x512xf32, #tpu.memory_space<vmem>>, vector<1x16x128xf32>,
      %c2_134 = arith.constant 2 : index
      %c0_135 = arith.constant 0 : index
      %c0_136 = arith.constant 0 : index
      %203 = vector.load %arg13[%c2_134, %c0_135, %c0_136] : memref<4x16x1xf32, #tpu.memory_space<vmem>>, vector<1x16x1xf32>
      %204 = vector.shape_cast %203 : vector<1x16x1xf32> to vector<16x1xf32>
      %205 = tpu.reciprocal %204 {approx = true} : vector<16x1xf32> -> vector<16x1xf32>
      %c2_137 = arith.constant 2 : index
      %c0_138 = arith.constant 0 : index
      %c0_139 = arith.constant 0 : index
      %206 = vector.load %arg14[%c2_137, %c0_138, %c0_139] : memref<4x16x128xf32, #tpu.memory_space<vmem>>, vector<1x16x128xf32>
      %207 = vector.shape_cast %206 : vector<1x16x128xf32> to vector<16x128xf32>
      %208 = vector.broadcast %205 : vector<16x1xf32> to vector<16x128xf32>
      %209 = arith.mulf %207, %208 : vector<16x128xf32>
      %c2_140 = arith.constant 2 : index
      %c0_141 = arith.constant 0 : index
      %c0_142 = arith.constant 0 : index
      %210 = vector.load %arg12[%c2_140, %c0_141, %c0_142] : memref<4x16x1xf32, #tpu.memory_space<vmem>>, vector<1x16x1xf32>
      %211 = vector.shape_cast %210 : vector<1x16x1xf32> to vector<16x1xf32>
      %cst_143 = arith.constant -1.000000e+29 : f32
      %212 = vector.broadcast %cst_143 : f32 to vector<16x1xf32>
      %213 = arith.cmpf ogt, %211, %212 : vector<16x1xf32>
      %cst_144 = arith.constant 0.000000e+00 : f32
      %214 = vector.shape_cast %213 : vector<16x1xi1> to vector<16x1xi1>
      %215 = vector.broadcast %214 : vector<16x1xi1> to vector<16x128xi1>
      %216 = vector.broadcast %cst_144 : f32 to vector<16x128xf32>
      %217 = arith.select %215, %209, %216 : vector<16x128xi1>, vector<16x128xf32>
      %c0_145 = arith.constant 0 : index
      %c0_146 = arith.constant 0 : index
      %c256_147 = arith.constant 256 : index
      %218 = vector.load %arg10[%c0_145, %c0_146, %c256_147] : memref<1x16x512xf32, #tpu.memory_space<vmem>>, vector<1x16x128xf32>
      %219 = vector.shape_cast %218 : vector<1x16x128xf32> to vector<16x128xf32>
      %220 = vector.shape_cast %217 : vector<16x128xf32> to vector<1x16x128xf32>
      tpu.vector_store %arg10[%c0_145, %c0_146, %c256_147], %220 {strides = array<i32>} : memref<1x16x512xf32, #tpu.memory_space<vmem>>, vector<1x16x128xf32>,
      %c3_148 = arith.constant 3 : index
      %c0_149 = arith.constant 0 : index
      %c0_150 = arith.constant 0 : index
      %221 = vector.load %arg13[%c3_148, %c0_149, %c0_150] : memref<4x16x1xf32, #tpu.memory_space<vmem>>, vector<1x16x1xf32>
      %222 = vector.shape_cast %221 : vector<1x16x1xf32> to vector<16x1xf32>
      %223 = tpu.reciprocal %222 {approx = true} : vector<16x1xf32> -> vector<16x1xf32>
      %c3_151 = arith.constant 3 : index
      %c0_152 = arith.constant 0 : index
      %c0_153 = arith.constant 0 : index
      %224 = vector.load %arg14[%c3_151, %c0_152, %c0_153] : memref<4x16x128xf32, #tpu.memory_space<vmem>>, vector<1x16x128xf32>
      %225 = vector.shape_cast %224 : vector<1x16x128xf32> to vector<16x128xf32>
      %226 = vector.broadcast %223 : vector<16x1xf32> to vector<16x128xf32>
      %227 = arith.mulf %225, %226 : vector<16x128xf32>
      %c3_154 = arith.constant 3 : index
      %c0_155 = arith.constant 0 : index
      %c0_156 = arith.constant 0 : index
      %228 = vector.load %arg12[%c3_154, %c0_155, %c0_156] : memref<4x16x1xf32, #tpu.memory_space<vmem>>, vector<1x16x1xf32>
      %229 = vector.shape_cast %228 : vector<1x16x1xf32> to vector<16x1xf32>
      %cst_157 = arith.constant -1.000000e+29 : f32
      %230 = vector.broadcast %cst_157 : f32 to vector<16x1xf32>
      %231 = arith.cmpf ogt, %229, %230 : vector<16x1xf32>
      %cst_158 = arith.constant 0.000000e+00 : f32
      %232 = vector.shape_cast %231 : vector<16x1xi1> to vector<16x1xi1>
      %233 = vector.broadcast %232 : vector<16x1xi1> to vector<16x128xi1>
      %234 = vector.broadcast %cst_158 : f32 to vector<16x128xf32>
      %235 = arith.select %233, %227, %234 : vector<16x128xi1>, vector<16x128xf32>
      %c0_159 = arith.constant 0 : index
      %c0_160 = arith.constant 0 : index
      %c384_161 = arith.constant 384 : index
      %236 = vector.load %arg10[%c0_159, %c0_160, %c384_161] : memref<1x16x512xf32, #tpu.memory_space<vmem>>, vector<1x16x128xf32>
      %237 = vector.shape_cast %236 : vector<1x16x128xf32> to vector<16x128xf32>
      %238 = vector.shape_cast %235 : vector<16x128xf32> to vector<1x16x128xf32>
      tpu.vector_store %arg10[%c0_159, %c0_160, %c384_161], %238 {strides = array<i32>} : memref<1x16x512xf32, #tpu.memory_space<vmem>>, vector<1x16x128xf32>,
    } else {
    }
    return
  }
  func.func @transform_0(%arg0: i32, %arg1: i32, %arg2: i32) -> (i32, i32, i32) {
    %c0_i32 = arith.constant 0 : i32
    %c0_i32_0 = arith.constant 0 : i32
    return %arg0, %arg1, %c0_i32 : i32, i32, i32
  }
  func.func @transform_1(%arg0: i32, %arg1: i32, %arg2: i32) -> (i32, i32, i32) {
    %c0_i32 = arith.constant 0 : i32
    %c0_i32_0 = arith.constant 0 : i32
    return %arg0, %arg2, %c0_i32 : i32, i32, i32
  }
  func.func @transform_2(%arg0: i32, %arg1: i32, %arg2: i32) -> (i32, i32, i32) {
    %c0_i32 = arith.constant 0 : i32
    %c0_i32_0 = arith.constant 0 : i32
    return %arg0, %arg2, %c0_i32 : i32, i32, i32
  }
  func.func @transform_3(%arg0: i32, %arg1: i32, %arg2: i32) -> (i32, i32, i32) {
    %c0_i32 = arith.constant 0 : i32
    return %arg0, %arg1, %arg2 : i32, i32, i32
  }
  func.func @transform_4(%arg0: i32, %arg1: i32, %arg2: i32) -> (i32, i32) {
    %c0_i32 = arith.constant 0 : i32
    %c0_i32_0 = arith.constant 0 : i32
    %c0_i32_1 = arith.constant 0 : i32
    return %c0_i32, %c0_i32_0 : i32, i32
  }
  func.func @transform_5(%arg0: i32, %arg1: i32, %arg2: i32) -> (i32, i32) {
    %c0_i32 = arith.constant 0 : i32
    %c0_i32_0 = arith.constant 0 : i32
    %c0_i32_1 = arith.constant 0 : i32
    return %c0_i32, %c0_i32_0 : i32, i32
  }
  func.func @transform_6(%arg0: i32, %arg1: i32, %arg2: i32) -> (i32, i32) {
    %c0_i32 = arith.constant 0 : i32
    %c0_i32_0 = arith.constant 0 : i32
    %c0_i32_1 = arith.constant 0 : i32
    return %c0_i32, %c0_i32_0 : i32, i32
  }
  func.func @transform_7(%arg0: i32, %arg1: i32, %arg2: i32) -> (i32, i32, i32) {
    %c0_i32 = arith.constant 0 : i32
    %c0_i32_0 = arith.constant 0 : i32
    return %arg0, %arg1, %c0_i32 : i32, i32, i32
  }
}

</mosaic_0001>

<bundles_post_ra>
// kernel: tpu_custom_call.1
= control target key start
LH: loop header
LB: loop body
LE: loop exit
PB: predicated region body
PF: predicated region fallthrough
CT: control target
= control target key end

     0   :  { %s3404_s0 = inlined_call_operand.hbm [shape: bf16[2,16,32], index: 0, kind: input, shape index: {}]   ;;  %s3405_s1 = inlined_call_operand.hbm [shape: bf16[2,16,24], index: 1, kind: input, shape index: {}]   ;;  %s3406_s2 = inlined_call_operand.hbm [shape: bf16[2,16,20], index: 2, kind: input, shape index: {}]   ;;  %s3407_s3 = inlined_call_operand.hbm [shape: bf16[2,16,16], index: 3, kind: input, shape index: {}]   ;;  %s3408_s4 = inlined_call_operand.hbm [shape: bf16[32,512], index: 4, kind: input, shape index: {}]   ;;  %s3409_s5 = inlined_call_operand.hbm [shape: bf16[24,512], index: 5, kind: input, shape index: {}]   ;;  %s3410_s6 = inlined_call_operand.hbm [shape: bf16[20,512], index: 6, kind: input, shape index: {}]   ;;  %s3411_s7 = inlined_call_operand.hbm [shape: f32[2,16,512], index: 7, kind: output, shape index: {}]  }
   0x1   :  { %3432 = sst [smem:[#allocation32_spill]] %s3405_s1 }
   0x2   :  { %3433 = sst [smem:[#allocation33_spill]] %s3408_s4 }
   0x3   :  { %3434 = sst [smem:[#allocation34_spill]] %s3409_s5 }
   0x4   :  { %3435 = sst [smem:[#allocation35_spill]] %s3411_s7 }
   0x5   :  { %12 = vsyncpa [#allocation7], 0 }
   0x6   :  { %14 = vsyncpa [#allocation7 + $0x1], 0 }
   0x7   :  { %15 = vsyncpa [#allocation10], 0 }
   0x8   :  { %17 = vsyncpa [#allocation10 + $0x1], 0 }
   0x9   :  { %18 = vsyncpa [#allocation13], 0 }
   0xa   :  { %20 = vsyncpa [#allocation13 + $0x1], 0 }
   0xb   :  { %21 = vsyncpa [#allocation16], 0 }
   0xc   :  { %22 = vsyncpa [#allocation8], 0 }
   0xd   :  { %24 = vsyncpa [#allocation8 + $0x1], 0  ;;  %s2682_s24 = smov 0   ;;  %s2684_s25 = smov 0  }
   0xe   :  { %s2686_s26 = smov 0   ;;  %s2688_s27 = smov 0  }
   0xf   :  { %s2690_s28 = smov 0   ;;  %s2692_s29 = smov 0  }
  0x10 LB: > { %3436 = sst [smem:[#allocation25_spill]] %s2602_s24  ;;  %s2713_s30 = sadd.s32 4294967295, %s2622_s29   ;;  %s2622_s29 = sphi %s2692_s29, %s30_s29   ;;  %s2618_s28 = sphi %s2690_s28, %s3481_s28   ;;  %s2614_s27 = sphi %s2688_s27, %s3480_s27   ;;  %s2610_s26 = sphi %s2686_s26, %s3484_s26   ;;  %s2606_s25 = sphi %s2684_s25, %s3483_s25   ;;  %s2602_s24 = sphi %s2682_s24, %s3482_s24  }
  0x11   : > { %3437 = sst [smem:[#allocation26_spill]] %s2614_s27  ;;  %s1971_s8 = sadd.s32 4294967294, %s2622_s29  }
  0x12   : > { %3438 = sst [smem:[#allocation27_spill]] %s2618_s28  ;;  %p65_p0 = scmp.ne.s32.totalorder %s2610_s26, %s2606_s25 }
  0x13   : > { %p66_p1 = scmp.eq.s32.totalorder %s2622_s29, 0  ;;  %p71_p2 = scmp.ne.s32.totalorder %s2606_s25, %s2602_s24 }
  0x14   : > { %p3413_p3 = scmp.eq.s32.totalorder %s2713_s30, 0  ;;  %p246_p4 = scmp.eq.s32.totalorder %s2713_s30, 1 }
  0x15   : > { %p2724_p5 = por %p66_p1, %p65_p0  ;;  %p252_p6 = scmp.eq.s32.totalorder %s1971_s8, 1 }
  0x16   : > { %p2730_p7 = por %p3413_p3, %p71_p2  ;;  %p2734_p8 = por %p246_p4, %p65_p0 }
  0x17   : > { %p2738_p9 = por %p252_p6, %p71_p2  ;;  %p1972_p10 = scmp.ge.s32.totalorder %s2622_s29, 1 }
  0x18   : > { %s3440_s11 = scalar_select %p2730_p7, 1, 0 }
  0x19   : > { %s3441_s12 = scalar_select %p2734_p8, 1, 0 }
  0x1a   : > { %s3443_s13 = scalar_select %p2738_p9, 1, 0 }
  0x1b   : > { %3442 = sst [smem:[#allocation28_spill]] %s3441_s12  ;;  %p259_p11 = scmp.lt.s32.totalorder %s2622_s29, 3 }
  0x1c   : > { %3444 = sst [smem:[#allocation29_spill]] %s3443_s13  ;;  %s2624_s15 = smov [#allocation14]  }
  0x1d   : > { %p2744_p12 = pnand %p1972_p10, %p259_p11  ;;  %s271_s16 = sshll.u32 %s2624_s15, 4  ;;  %s2748_s16 = int_to_ptr.vmem [resolvable:$true] %s271_s16 }
  0x1e   : > { %s2625_s18 = smov [#allocation15]   ;;  %s3447_s4 = sld [smem:[#allocation33_spill]] }
  0x1f   : > { %s3445_s14 = scalar_select %p2744_p12, 1, 0 }
  0x20   : > { %p2139_p13 = pneg %p2744_p12  ;;  %s284_s19 = sshll.u32 %s2625_s18, 4  ;;  %s2759_s19 = int_to_ptr.vmem [resolvable:$true] %s284_s19 }
  0x22   : > { %p2755_p1 = pnand %p2139_p13, %p3413_p3 }
  0x24   : > { %s3446_s17 = scalar_select %p2755_p1, 1, 0 }
  0x25   : > { %s2320_s23 = scalar_lea.hbm %s3447_s4, 1024  ;;  %p2770_p4 = pneg %p2755_p1 }
  0x26   : > { %p2321_p2 = scmp.ne.s32.totalorder %s3447_s4, %s2320_s23  ;;  %p2327_p11 = scmp.lt.u32.totalorder %s2320_s23, %s3447_s4 }
  0x27   : > { %s3448_s9 = scalar_select %p2770_p4, 1, 0 }
  0x28   : > { %p2323_p6 = pnand %p2770_p4, %p2321_p2 }
  0x2a   : > { %p2324_p10 = pneg %p2323_p6 }
  0x2c   : > { %p2329_p13 = pnand %p2327_p11, %p2324_p10 }
  0x2e   : > { %2332 = shalt.err (!%p2329_p13)
}
  0x2f   : > { %s2333_s21 = scalar_lea.vmem %s2748_s16, 1024  ;;  %p2341_p8 = scmp.lt.s32.totalorder %s2748_s16, %s2748_s16 }
  0x30   : > { %p2334_p0 = scmp.ne.s32.totalorder %s2748_s16, %s2333_s21  ;;  %p2342_p7 = scmp.lt.s32.totalorder %s2333_s21, %s2333_s21 }
  0x32   : > { %p2336_p3 = pnand %p2334_p0, %p2770_p4  ;;  %p2343_p2 = por %p2342_p7, %p2341_p8 }
  0x34   : > { %p2337_p9 = pneg %p2336_p3 }
  0x36   : > { %p2344_p6 = pnand %p2343_p2, %p2337_p9 }
  0x38   : > { %2347 = shalt.err (!%p2344_p6)
}
  0x39   : > { %s3420_s22 = smov 256   ;;  %s3422_s13 = smov 16  }
  0x3a   : > { %2142 = dma.hbm_to_vmem [thread:$0]  (!%p2755_p1), %s3447_s4, 1024, %s2748_s16, [#allocation13], %s3420_s22, %s3420_s22, %s3422_s13  }
  0x3b   : > { %s3449_s5 = sld [smem:[#allocation34_spill]] }
  0x41   : > { %s2348_s21 = scalar_lea.hbm %s3449_s5, 768 }
  0x42   : > { %p2349_p3 = scmp.ne.s32.totalorder %s3449_s5, %s2348_s21  ;;  %p2355_p9 = scmp.lt.u32.totalorder %s2348_s21, %s3449_s5 }
  0x44   : > { %p2351_p7 = pnand %p2349_p3, %p2770_p4 }
  0x46   : > { %p2352_p8 = pneg %p2351_p7 }
  0x48   : > { %p2357_p0 = pnand %p2355_p9, %p2352_p8 }
  0x4a   : > { %2360 = shalt.err (!%p2357_p0)
}
  0x4b   : > { %s2361_s16 = scalar_lea.vmem %s2759_s19, 768  ;;  %p2369_p2 = scmp.lt.s32.totalorder %s2759_s19, %s2759_s19 }
  0x4c   : > { %p2362_p10 = scmp.ne.s32.totalorder %s2759_s19, %s2361_s16  ;;  %p2370_p6 = scmp.lt.s32.totalorder %s2361_s16, %s2361_s16 }
  0x4e   : > { %p2364_p11 = pnand %p2362_p10, %p2770_p4  ;;  %p2371_p3 = por %p2370_p6, %p2369_p2 }
  0x50   : > { %p2365_p13 = pneg %p2364_p11 }
  0x52   : > { %p2372_p7 = pnand %p2371_p3, %p2365_p13 }
  0x54   : > { %2375 = shalt.err (!%p2372_p7)
}
  0x55   : > { %2145 = dma.hbm_to_vmem [thread:$0]  (!%p2755_p1), %s3449_s5, 768, %s2759_s19, [#allocation16], %s3420_s22, %s3420_s22, %s3422_s13  }
  0x56   : > { %s3450_s12 = sadd.s32 1, %s2618_s28  ;;  %p2169_p9 = scmp.lt.s32.totalorder %s2622_s29, 2 }
  0x57   : > { %p51_p8 = scmp.ge.s32.totalorder %s3450_s12, 2  ;;  %s3421_s20 = sand.u32 1, %s2610_s26  }
  0x58   : > { %s2825_s23 = sshll.u32 %s2618_s28, 7  ;;  %s3451_s8 = smov %s3450_s12 }
  0x59   : > { %s3486_s8 = smov (%p51_p8, %s3451_s8), 0  ;;  %s2833_s15 = sshll.u32 %s3421_s20, 3 }
  0x5a   : > { %3452 = sst [smem:[#allocation30_spill]] %s3486_s8  ;;  %p2837_p0 = pnand %p2169_p9, %p2724_p5 }
  0x5b   : > { %s53_s19 = ssub.s32 %s2618_s28, %s3486_s8  ;;  %s3423_s21 = sand.u32 1, %s2622_s29  }
  0x5c   : > { %s3453_s18 = scalar_select %p2837_p0, 1, 0 }
  0x5d   : > { %p56_p10 = scmp.eq.s32.totalorder %s53_s19, 0  ;;  %s3454_s16 = sadd.s32 1, %s2610_s26 }
  0x5e   : > { %s3456_s1 = sld [smem:[#allocation32_spill]]  ;;  %s338_s10 = scalar_lea.vmem [#allocation9], %s2833_s15 }
  0x5f   : > { %s2847_s7 = scalar_select %p56_p10, %s2610_s26, %s3454_s16  }
  0x60   : > { %s347_s20 = sshll.u32 %s338_s10, 4  ;;  %s2860_s13 = scalar_lea.sflag [#allocation10], %s3423_s21  ;;  %s2856_s20 = int_to_ptr.vmem [resolvable:$true] %s347_s20 }
  0x61   : > { %3455 = sst [smem:[#allocation31_spill]] %s2847_s7  ;;  %p2866_p11 = pneg %p2837_p0 }
  0x64   : > { %s2853_s22 = scalar_lea.hbm %s3456_s1, %s2825_s23  ;;  %s2381_s10 = scalar_lea.hbm %s3456_s1, 256 }
  0x65   : > { %s2376_s19 = scalar_lea.hbm %s2853_s22, 128  ;;  %p2382_p6 = scmp.lt.u32.totalorder %s2853_s22, %s3456_s1 }
  0x66   : > { %p2377_p5 = scmp.ne.s32.totalorder %s2853_s22, %s2376_s19  ;;  %p2383_p3 = scmp.lt.u32.totalorder %s2381_s10, %s2376_s19 }
  0x67   : > { %p2385_p8 = scmp.lt.u32.totalorder %s2376_s19, %s2853_s22 }
  0x68   : > { %p2379_p13 = pnand %p2866_p11, %p2377_p5  ;;  %p2384_p7 = por %p2383_p3, %p2382_p6 }
  0x6a   : > { %p2380_p2 = pneg %p2379_p13  ;;  %p2386_p9 = por %p2385_p8, %p2384_p7 }
  0x6c   : > { %p2387_p10 = pnand %p2386_p9, %p2380_p2 }
  0x6e   : > { %2390 = shalt.err (!%p2387_p10)
}
  0x6f   : > { %s2391_s21 = scalar_lea.vmem %s2856_s20, 128  ;;  %s2628_s24 = smov [#allocation9]  }
  0x70   : > { %p2392_p5 = scmp.ne.s32.totalorder %s2856_s20, %s2391_s21  ;;  %s2396_s12 = sshll.u32 %s2628_s24, 4  ;;  %s2397_s12 = int_to_ptr.vmem [resolvable:$false] %s2396_s12 }
  0x71   : > { %s2398_s4 = scalar_lea.vmem %s2397_s12, 256  ;;  %p2399_p1 = scmp.lt.s32.totalorder %s2856_s20, %s2397_s12 }
  0x72   : > { %p2394_p13 = pnand %p2392_p5, %p2866_p11  ;;  %p2400_p4 = scmp.lt.s32.totalorder %s2398_s4, %s2391_s21 }
  0x74   : > { %p2395_p12 = pneg %p2394_p13  ;;  %p2401_p6 = por %p2400_p4, %p2399_p1 }
  0x76   : > { %p2402_p3 = pnand %p2401_p6, %p2395_p12 }
  0x78   : > { %2405 = shalt.err (!%p2402_p3)
}
  0x79   : > { %s2629_s5 = smov 64   ;;  %s2630_s19 = smov 4  }
  0x7a   : > { %2155 = dma.hbm_to_vmem [thread:$0]  (!%p2837_p0), %s2853_s22, 128, %s2856_s20, %s2860_s13, %s2629_s5, %s2629_s5, %s2630_s19  }
  0x7b   : > { %s2631_s10 = smov [#allocation17]   ;;  %s2897_s4 = scalar_lea.hbm %s3404_s0, %s2825_s23 }
  0x7c   : > { %s297_s24 = sshll.u32 %s2631_s10, 4  ;;  %s2406_s28 = scalar_lea.hbm %s3410_s6, 768  ;;  %s298_s24 = int_to_ptr.vmem [resolvable:$true] %s297_s24 }
  0x7d   : > { %p2407_p12 = scmp.ne.s32.totalorder %s3410_s6, %s2406_s28  ;;  %p3458_p1 = scmp.ne.s32.totalorder %s3448_s9, 0 }
  0x7e   : > { %p2413_p7 = scmp.lt.u32.totalorder %s2406_s28, %s3410_s6 }
  0x7f   : > { %p2409_p4 = pnand %p2407_p12, %p3458_p1 }
  0x81   : > { %p2410_p2 = pneg %p2409_p4 }
  0x83   : > { %p2415_p8 = pnand %p2413_p7, %p2410_p2 }
  0x85   : > { %2418 = shalt.err (!%p2415_p8)
}
  0x86   : > { %s2419_s10 = scalar_lea.vmem %s298_s24, 768  ;;  %p2427_p13 = scmp.lt.s32.totalorder %s298_s24, %s298_s24 }
  0x87   : > { %p2420_p9 = scmp.ne.s32.totalorder %s298_s24, %s2419_s10  ;;  %p2428_p6 = scmp.lt.s32.totalorder %s2419_s10, %s2419_s10 }
  0x89   : > { %p2422_p10 = pnand %p2420_p9, %p3458_p1  ;;  %p2429_p3 = por %p2428_p6, %p2427_p13 }
  0x8b   : > { %p2423_p5 = pneg %p2422_p10 }
  0x8d   : > { %p2430_p0 = pnand %p2429_p3, %p2423_p5 }
  0x8f   : > { %2433 = shalt.err (!%p2430_p0)
}
  0x90   : > { %p3459_p12 = scmp.ne.s32.totalorder %s3446_s17, 0  ;;  %s3460_s1 = smov 16  }
  0x91   : > { %s3461_s27 = smov 256   ;;  %s315_s9 = scalar_lea.vmem [#allocation6], %s2833_s15 }
  0x92   : > { %2148 = dma.hbm_to_vmem [thread:$0]  (!%p3459_p12), %s3410_s6, 768, %s298_s24, [#allocation16], %s3461_s27, %s3461_s27, %s3460_s1  }
  0x93   : > { %s324_s7 = sshll.u32 %s315_s9, 4  ;;  %s2927_s12 = scalar_lea.hbm %s3406_s2, %s2825_s23  ;;  %s2921_s7 = int_to_ptr.vmem [resolvable:$true] %s324_s7 }
  0x94   : > { %s3462_s22 = sand.u32 1, %s2610_s26   ;;  %s2434_s10 = scalar_lea.hbm %s2897_s4, 128 }
  0x95   : > { %s2931_s20 = scalar_lea.sflag [#allocation7], %s3462_s22  ;;  %p2435_p0 = scmp.ne.s32.totalorder %s2897_s4, %s2434_s10 }
  0x96   : > { %s2439_s24 = scalar_lea.hbm %s3404_s0, 256  ;;  %p2440_p2 = scmp.lt.u32.totalorder %s2897_s4, %s3404_s0 }
  0x97   : > { %p2437_p1 = pnand %p2435_p0, %p2866_p11  ;;  %p2441_p7 = scmp.lt.u32.totalorder %s2439_s24, %s2434_s10 }
  0x98   : > { %p2443_p9 = scmp.lt.u32.totalorder %s2434_s10, %s2897_s4 }
  0x99   : > { %p2438_p4 = pneg %p2437_p1  ;;  %p2442_p8 = por %p2441_p7, %p2440_p2 }
  0x9b   : > { %p2444_p10 = por %p2443_p9, %p2442_p8 }
  0x9d   : > { %p2445_p5 = pnand %p2444_p10, %p2438_p4 }
  0x9f   : > { %2448 = shalt.err (!%p2445_p5)
}
  0xa0   : > { %s2449_s9 = scalar_lea.vmem %s2921_s7, 128  ;;  %s2632_s17 = smov [#allocation6]  }
  0xa1   : > { %p2450_p13 = scmp.ne.s32.totalorder %s2921_s7, %s2449_s9  ;;  %s2454_s21 = sshll.u32 %s2632_s17, 4  ;;  %s2455_s21 = int_to_ptr.vmem [resolvable:$false] %s2454_s21 }
  0xa2   : > { %s2456_s22 = scalar_lea.vmem %s2455_s21, 256  ;;  %p2457_p12 = scmp.lt.s32.totalorder %s2921_s7, %s2455_s21 }
  0xa3   : > { %p2452_p6 = pnand %p2450_p13, %p2866_p11  ;;  %p2458_p0 = scmp.lt.s32.totalorder %s2456_s22, %s2449_s9 }
  0xa5   : > { %p2453_p3 = pneg %p2452_p6  ;;  %p2459_p1 = por %p2458_p0, %p2457_p12 }
  0xa7   : > { %p2460_p2 = pnand %p2459_p1, %p2453_p3 }
  0xa9   : > { %2463 = shalt.err (!%p2460_p2)
}
  0xaa   : > { %p3463_p4 = scmp.ne.s32.totalorder %s3453_s18, 0  ;;  %s361_s10 = scalar_lea.vmem [#allocation11], %s2833_s15 }
  0xab   : > { %s370_s8 = sshll.u32 %s361_s10, 4  ;;  %s2965_s1 = scalar_lea.hbm %s3407_s3, %s2825_s23  ;;  %s2959_s8 = int_to_ptr.vmem [resolvable:$true] %s370_s8 }
  0xac   : > { %2152 = dma.hbm_to_vmem [thread:$0]  (!%p3463_p4), %s2897_s4, 128, %s2921_s7, %s2931_s20, %s2629_s5, %s2629_s5, %s2630_s19  }
  0xad   : > { %s2464_s27 = scalar_lea.hbm %s2927_s12, 128  ;;  %s2469_s21 = scalar_lea.hbm %s3406_s2, 256 }
  0xae   : > { %p2465_p7 = scmp.ne.s32.totalorder %s2927_s12, %s2464_s27  ;;  %p2470_p10 = scmp.lt.u32.totalorder %s2927_s12, %s3406_s2 }
  0xaf   : > { %p2471_p5 = scmp.lt.u32.totalorder %s2469_s21, %s2464_s27  ;;  %p2473_p6 = scmp.lt.u32.totalorder %s2464_s27, %s2927_s12 }
  0xb0   : > { %p2467_p8 = pnand %p2465_p7, %p2866_p11 }
  0xb1   : > { %p2472_p13 = por %p2471_p5, %p2470_p10 }
  0xb2   : > { %p2468_p9 = pneg %p2467_p8 }
  0xb3   : > { %p2474_p3 = por %p2473_p6, %p2472_p13 }
  0xb5   : > { %p2475_p12 = pnand %p2474_p3, %p2468_p9 }
  0xb7   : > { %2478 = shalt.err (!%p2475_p12)
}
  0xb8   : > { %s2479_s23 = scalar_lea.vmem %s2959_s8, 128  ;;  %s2633_s7 = smov [#allocation11]  }
  0xb9   : > { %p2480_p0 = scmp.ne.s32.totalorder %s2959_s8, %s2479_s23  ;;  %s2484_s20 = sshll.u32 %s2633_s7, 4  ;;  %s2485_s20 = int_to_ptr.vmem [resolvable:$false] %s2484_s20 }
  0xba   : > { %s2486_s10 = scalar_lea.vmem %s2485_s20, 256  ;;  %p2487_p7 = scmp.lt.s32.totalorder %s2959_s8, %s2485_s20 }
  0xbb   : > { %p2482_p1 = pnand %p2480_p0, %p2866_p11  ;;  %p2488_p8 = scmp.lt.s32.totalorder %s2486_s10, %s2479_s23 }
  0xbd   : > { %p2483_p2 = pneg %p2482_p1  ;;  %p2489_p10 = por %p2488_p8, %p2487_p7 }
  0xbf   : > { %p2490_p5 = pnand %p2489_p10, %p2483_p2 }
  0xc1   : > { %2493 = shalt.err (!%p2490_p5)
}
  0xc2   : > { %2158 = dma.hbm_to_vmem [thread:$0]  (!%p3463_p4), %s2927_s12, 128, %s2959_s8, %s2860_s13, %s2629_s5, %s2629_s5, %s2630_s19  }
  0xc3   : > { %s384_s28 = scalar_lea.vmem [#allocation12], %s2833_s15  ;;  %s3464_s27 = sand.u32 1, %s2622_s29  }
  0xc4   : > { %s394_s24 = sshll.u32 %s384_s28, 4  ;;  %s2997_s9 = scalar_lea.sflag [#allocation13], %s3464_s27  ;;  %s2993_s24 = int_to_ptr.vmem [resolvable:$true] %s394_s24 }
  0xc5   : > { %s2494_s17 = scalar_lea.hbm %s2965_s1, 128  ;;  %s2499_s4 = scalar_lea.hbm %s3407_s3, 256 }
  0xc6   : > { %p2495_p9 = scmp.ne.s32.totalorder %s2965_s1, %s2494_s17  ;;  %p2500_p3 = scmp.lt.u32.totalorder %s2965_s1, %s3407_s3 }
  0xc7   : > { %p2501_p12 = scmp.lt.u32.totalorder %s2499_s4, %s2494_s17  ;;  %p2503_p1 = scmp.lt.u32.totalorder %s2494_s17, %s2965_s1 }
  0xc8   : > { %p2497_p13 = pnand %p2495_p9, %p2866_p11 }
  0xc9   : > { %p2502_p0 = por %p2501_p12, %p2500_p3 }
  0xca   : > { %p2498_p6 = pneg %p2497_p13 }
  0xcb   : > { %p2504_p2 = por %p2503_p1, %p2502_p0 }
  0xcd   : > { %p2505_p7 = pnand %p2504_p2, %p2498_p6 }
  0xcf   : > { %2508 = shalt.err (!%p2505_p7)
}
  0xd0   : > { %s2509_s13 = scalar_lea.vmem %s2993_s24, 128  ;;  %s2634_s15 = smov [#allocation12]  }
  0xd1   : > { %p2510_p8 = scmp.ne.s32.totalorder %s2993_s24, %s2509_s13  ;;  %s2514_s12 = sshll.u32 %s2634_s15, 4  ;;  %s2515_s12 = int_to_ptr.vmem [resolvable:$false] %s2514_s12 }
  0xd2   : > { %s2516_s8 = scalar_lea.vmem %s2515_s12, 256  ;;  %p2517_p9 = scmp.lt.s32.totalorder %s2993_s24, %s2515_s12 }
  0xd3   : > { %p2512_p10 = pnand %p2510_p8, %p2866_p11  ;;  %p2518_p13 = scmp.lt.s32.totalorder %s2516_s8, %s2509_s13 }
  0xd5   : > { %p2513_p5 = pneg %p2512_p10  ;;  %p2519_p3 = por %p2518_p13, %p2517_p9 }
  0xd7   : > { %p2520_p12 = pnand %p2519_p3, %p2513_p5 }
  0xd9   : > { %2523 = shalt.err (!%p2520_p12)
}
  0xda   : > { %2161 = dma.hbm_to_vmem [thread:$0]  (!%p3463_p4), %s2965_s1, 128, %s2993_s24, %s2997_s9, %s2629_s5, %s2629_s5, %s2630_s19  }
  0xdb   : > { %p3465_p11 = scmp.ne.s32.totalorder %s3445_s14, 0 }
  0xdc   : > { %s3027_s16 = sand.u32 (!%p3465_p11), 1, %s2606_s25   ;;  %p3466_p6 = scmp.ne.s32.totalorder (!%p3465_p11), %s3440_s11, 0 }
  0xdd   : > { %406 = sbr.rel (%p3465_p11) target bundleno = 1327 (0x52f), region = 48  ;;  %s3030_s20 = sshll.u32 (!%p3465_p11), %s3027_s16, 3 }
  0xde   : > { %s409_s18 = scalar_lea.sflag (!%p3465_p11), [#allocation7], %s3027_s16  ;;  %s412_s10 = scalar_lea.vmem (!%p3465_p11), [#allocation6], %s3030_s20 }
  0xe4   : > { %2577 = dma.done.wait (%p3466_p6), %s409_s18, 128  }
  0xe5   : > { %2579 = vsyncadd (%p3466_p6), %s409_s18, 4294967168  ;;  %s417_s14 = sand.u32 1, %s2713_s30   ;;  %s421_s19 = scalar_lea.vmem [#allocation9], %s3030_s20 }
  0xe6   : > { %s418_s5 = scalar_lea.sflag [#allocation10], %s417_s14 }
  0xe7   : > { %2581 = dma.done.wait (%p3466_p6), %s418_s5, 256  }
  0xe8   : > { %2583 = vsyncadd (%p3466_p6), %s418_s5, 4294967040  ;;  %s430_s1 = scalar_lea.vmem [#allocation11], %s3030_s20  ;;  %s436_s28 = scalar_lea.sflag [#allocation13], %s417_s14 }
  0xe9   : > { %s439_s24 = scalar_lea.vmem [#allocation12], %s3030_s20 }
  0xea   : > { %2585 = dma.done.wait (%p3466_p6), %s436_s28, 128  }
  0xeb   : > { %2587 = vsyncadd (%p3466_p6), %s436_s28, 4294967168  ;;  %p3467_p4 = scmp.eq.s32.totalorder %s2713_s30, 0 }
  0xed   : > { %2589 = dma.done.wait (%p3467_p4), [#allocation13], 1024   ;;  %p3468_p0 = pmov %p3467_p4 }
  0xef   : > { %2591 = vsyncadd (%p3468_p0), [#allocation13], 4294966272  ;;  %p3469_p1 = pmov %p3468_p0 }
  0xf0   : > { %p3470_p2 = pmov %p3468_p0 }
  0xf1   : > { %2593 = dma.done.wait (%p3469_p1), [#allocation16], 1536  }
  0xf2   : > { %2595 = vsyncadd (%p3470_p2), [#allocation16], 4294965760  ;;  %v2635_v0 = vmov 0   ;;  %v2237_v1 = vld [vmem:[#allocation14 + $0x4] ss:$16 sps:$4 sm:$0xff]   ;;  %vm562_vm0 = vcmask 261120  }
  0xf3   : > { %598 = vmatprep.mubr.bf16.mxu0 %v2635_v0  ;;  %641 = vmatprep.mubr.bf16.mxu1 %v2635_v0  ;;  %v2239_v2 = vld [vmem:[#allocation14] ss:$16 sps:$4 sm:$0xff]   ;;  %v2240_v3 = vld [vmem:[#allocation14 + $0x24] ss:$16 sps:$4 sm:$0xff]   ;;  %v2248_v8 = vld [vmem:[#allocation14 + $0xc] ss:$16 sps:$4 sm:$0xff]  }
  0xf4   : > { %2235 = vset.pattern.permute.xlu1 %v2635_v0  ;;  %2236 = vset.pattern.permute.xlu0 %v2635_v0  ;;  %v2242_v4 = vld [vmem:[#allocation14 + $0x20] ss:$16 sps:$4 sm:$0xff]   ;;  %v2246_v6 = vld [vmem:[#allocation15 + $0x4] ss:$16 sps:$4 sm:$0xff]   ;;  %v2251_v9 = vld [vmem:[#allocation14 + $0x8] ss:$16 sps:$4 sm:$0xff]  }
  0xf5   : > { %566 = vmatprep.subr.bf16.mxu0 %v2237_v1  ;;  %v2243_v5 = vld [vmem:[%s412_s10] sm:$0xff]   ;;  %609 = vmatprep.subr.bf16.mxu1 %v2248_v8  ;;  %vm732_vm1 = vcmask 1043456   ;;  %v2252_v20 = vld [vmem:[%s421_s19] sm:$0xff]   ;;  %vm728_vm2 = vcmask 195584   ;;  %vm882_vm3 = vcmask 1041408   ;;  %vm878_vm4 = vcmask 162816  }
  0xf6   : > { %567 = vmatpush1.bf16.msra.mxu0 %v2239_v2  ;;  %v691_v7 = vld [vmem:[#allocation15 + $0x20] sm:$0xff]  ;;  %v2253_v13 = vld [vmem:[#allocation14 + $0x2c] ss:$16 sps:$4 sm:$0xff]   ;;  %610 = vmatpush1.bf16.msra.mxu1 %v2251_v9  ;;  %v2255_v14 = vld [vmem:[#allocation14 + $0x28] ss:$16 sps:$4 sm:$0xff]   ;;  %v2636_v30 = vmov 0.0  }
  0xf7   : > { %568 = vmatprep.subr.bf16.mxu0 %v2240_v3  ;;  %v2244_v10 = vld [vmem:[#allocation15] ss:$16 sps:$4 sm:$0xff]   ;;  %v2015_v11 = vcombine.high %v691_v7, %v691_v7  ;;  %v2014_v12 = vcombine.low %v691_v7, %v691_v7  ;;  %611 = vmatprep.subr.bf16.mxu1 %v2253_v13  ;;  %v2258_v15 = vld [vmem:[#allocation15 + $0xc] ss:$16 sps:$4 sm:$0xff]   ;;  %v2263_v17 = vld [vmem:[#allocation17 + $0x4] ss:$16 sps:$4 sm:$0xff]  }
  0xf8   : > { %v692_v16 = vld [vmem:[#allocation15 + $0x28] sm:$0xff]  ;;  %v2261_v23 = vld [vmem:[#allocation17] ss:$16 sps:$4 sm:$0xff]   ;;  %vm2637_vm5 = vmmov 0   ;;  %v842_v33 = vld [vmem:[#allocation17 + $0x28] sm:$0x33] }
  0xf9   : > { %v734_v18 = vsel %vm732_vm1, %v2014_v12, 0  ;;  %v2256_v19 = vld [vmem:[#allocation15 + $0x8] ss:$16 sps:$4 sm:$0xff]   ;;  %v2017_v21 = vcombine.high %v692_v16, %v692_v16  ;;  %v2016_v22 = vcombine.low %v692_v16, %v692_v16  ;;  %v841_v25 = vld [vmem:[#allocation17 + $0x20] sm:$0x33]  ;;  %v2030_v34 = vcombine.high %v842_v33, %v842_v33  ;;  %s1997_s30 = sshll.u32 %s3027_s16, 6 }
  0xfa   : > { %569 = vmatpush1.bf16.msra.mxu0 %v2242_v4  ;;  %612 = vmatpush1.bf16.msra.mxu1 %v2255_v14  ;;  %v2028_v26 = vcombine.high %v841_v25, %v841_v25  ;;  %v2027_v27 = vcombine.low %v841_v25, %v841_v25  ;;  %v2266_v29 = vld [vmem:[%s430_s1] sm:$0xff]   ;;  %v2029_v35 = vcombine.low %v842_v33, %v842_v33  ;;  %vm660_vm6 = vcmask 7168   ;;  %s3337_s11 = scalar_lea.vmem [#allocation18], %s1997_s30  ;;  %s3471_s27 = sld [smem:[#allocation26_spill]] }
  0xfb   : > { %745 = vmatprep.subr.bf16.mxu0 %v2246_v6  ;;  %788 = vmatprep.subr.bf16.mxu1 %v2258_v15  ;;  %v740_v24 = vsel %vm732_vm1, %v2016_v22, 0  ;;  %v2267_v31 = vld [vmem:[#allocation17 + $0x8] ss:$16 sps:$4 sm:$0xff]   ;;  %v2269_v32 = vld [vmem:[#allocation17 + $0xc] ss:$16 sps:$4 sm:$0xff]   ;;  %v2638_v4 = vmov -inf  }
  0xfc   : > { %v884_v28 = vsel %vm882_vm3, %v2027_v27, 0  ;;  %v890_v36 = vsel %vm882_vm3, %v2029_v35, 0  ;;  %661 = vst.msk [vmem:[#allocation3] sm:$0xff] %vm660_vm6, %v2638_v4  ;;  %662 = vst.msk [vmem:[#allocation3 + $0x8] sm:$0xff] %vm660_vm6, %v2638_v4  ;;  %vm1033_vm7 = vcmask 130048   ;;  %s1776_s9 = sshll.u32 %s3337_s11, 4  ;;  %s3348_s9 = int_to_ptr.vmem [resolvable:$true] %s1776_s9 }
  0xfd   : > { %2007 = vmatmul.mubr.msk.bf16.vlgmr.msra.gmra.mrb[0].mxu0 %vm562_vm0, %v2243_v5  ;;  %2008 = vmatmul.mubr.msk.bf16.vlgmr.msra.gmra.mrb[0].mxu1 %vm562_vm0, %v2243_v5  ;;  %663 = vst.msk [vmem:[#allocation3 + $0x10] sm:$0xff] %vm660_vm6, %v2638_v4  ;;  %664 = vst.msk [vmem:[#allocation3 + $0x18] sm:$0xff] %vm660_vm6, %v2638_v4  ;;  %v2050_v5 = vld [vmem:[%s439_s24] sm:$0xff]   ;;  %s3472_s17 = sld [smem:[#allocation28_spill]]  ;;  %s3473_s23 = sld [smem:[#allocation35_spill]] }
  0xfe   : > { %746 = vmatpush1.bf16.msra.mxu0 %v2244_v10  ;;  %777 = vmatprep.mubr.bf16.mxu0 %v2635_v0  ;;  %665 = vst.msk [vmem:[#allocation3 + $0x20] sm:$0xff] %vm660_vm6, %v2638_v4  ;;  %666 = vst.msk [vmem:[#allocation3 + $0x28] sm:$0xff] %vm660_vm6, %v2638_v4  ;;  %v2051_v6 = vunpack.c.l.bf16 %v2050_v5  ;;  %v2052_v7 = vunpack.c.h.bf16 %v2050_v5  ;;  %s1760_s13 = scalar_lea.sflag [#allocation8], %s3027_s16  ;;  %s2524_s15 = scalar_lea.vmem %s3348_s9, 1024 }
  0xff   : > { %2018 = vmatprep.subr.msk.bf16.mxu0 %vm732_vm1, %v2015_v11  ;;  %789 = vmatpush1.bf16.msra.mxu1 %v2256_v19  ;;  %667 = vst.msk [vmem:[#allocation3 + $0x30] sm:$0xff] %vm660_vm6, %v2638_v4  ;;  %668 = vst.msk [vmem:[#allocation3 + $0x38] sm:$0xff] %vm660_vm6, %v2638_v4  ;;  %p2525_p7 = scmp.ne.s32.totalorder %s3348_s9, %s2524_s15  ;;  %s2639_s12 = smov [#allocation18]  }
 0x100   : > { %820 = vmatprep.mubr.bf16.mxu1 %v2635_v0  ;;  %2020 = vmatprep.subr.msk.bf16.mxu1 %vm732_vm1, %v2017_v21  ;;  %669 = vst.msk [vmem:[#allocation4] sm:$0xff] %vm660_vm6, %v2636_v30  ;;  %670 = vst.msk [vmem:[#allocation4 + $0x8] sm:$0xff] %vm660_vm6, %v2636_v30  ;;  %s2048_s21 = sshll.u32 %s3471_s27, 10  ;;  %s2528_s8 = sshll.u32 %s2639_s12, 4  ;;  %s2529_s8 = int_to_ptr.vmem [resolvable:$false] %s2528_s8 }
 0x101   : > { %671 = vst.msk [vmem:[#allocation4 + $0x10] sm:$0xff] %vm660_vm6, %v2636_v30  ;;  %672 = vst.msk [vmem:[#allocation4 + $0x18] sm:$0xff] %vm660_vm6, %v2636_v30  ;;  %s2530_s20 = scalar_lea.vmem %s2529_s8, 2048  ;;  %p2531_p9 = scmp.lt.s32.totalorder %s3348_s9, %s2529_s8 }
 0x102   : > { %748 = vmatpush1.bf16.msra.mxu0 %v734_v18  ;;  %673 = vst.msk [vmem:[#allocation4 + $0x20] sm:$0xff] %vm660_vm6, %v2636_v30  ;;  %674 = vst.msk [vmem:[#allocation4 + $0x28] sm:$0xff] %vm660_vm6, %v2636_v30  ;;  %p2532_p13 = scmp.lt.s32.totalorder %s2530_s20, %s2524_s15 }
 0x103   : > { %895 = vmatprep.subr.bf16.mxu0 %v2263_v17  ;;  %791 = vmatpush1.bf16.msra.mxu1 %v740_v24  ;;  %675 = vst.msk [vmem:[#allocation4 + $0x30] sm:$0xff] %vm660_vm6, %v2636_v30  ;;  %676 = vst.msk [vmem:[#allocation4 + $0x38] sm:$0xff] %vm660_vm6, %v2636_v30  ;;  %s3354_s7 = scalar_lea.hbm %s3473_s23, %s2048_s21  ;;  %p3474_p8 = scmp.ne.s32.totalorder %s3472_s17, 0 }
 0x104   : > { %938 = vmatprep.subr.bf16.mxu1 %v2269_v32  ;;  %p2533_p3 = por %p2532_p13, %p2531_p9 }
 0x105   : > { %2019 = vmatmul.mubr.msk.bf16.vlgmr.msra.gmra.mrb[4].mxu0 %vm728_vm2, %v2252_v20  ;;  %p2526_p10 = pnand %p2525_p7, %p3474_p8 }
 0x106   : > { %896 = vmatpush1.bf16.msra.mxu0 %v2261_v23  ;;  %927 = vmatprep.mubr.bf16.mxu0 %v2635_v0  ;;  %v3217_v4 = vld [vmem:[#allocation3 + $0x30] sm:$0xff] }
 0x107   : > { %2021 = vmatmul.mubr.msk.bf16.vlgmr.msra.gmra.mrb[4].mxu1 %vm728_vm2, %v2252_v20  ;;  %2031 = vmatprep.subr.msk.bf16.mxu0 %vm882_vm3, %v2028_v26  ;;  %p2527_p5 = pneg %p2526_p10 }
 0x108   : > { %970 = vmatprep.mubr.bf16.mxu1 %v2635_v0  ;;  %939 = vmatpush1.bf16.msra.mxu1 %v2267_v31 }
 0x109   : > { %2033 = vmatprep.subr.msk.bf16.mxu1 %vm882_vm3, %v2030_v34  ;;  %p2534_p12 = pnand %p2533_p3, %p2527_p5 }
 0x10a   : > { %898 = vmatpush1.bf16.msra.mxu0 %v884_v28 }
 0x10b   : > { %2069 = vmatprep.subr.bf16.mxu0 %v2636_v30 }
 0x10c   : > { %941 = vmatpush1.bf16.msra.mxu1 %v890_v36 }
 0x10d   : > { %2032 = vmatmul.mubr.msk.bf16.vlgmr.msra.gmra.mrb[8].mxu0 %vm878_vm4, %v2266_v29  ;;  %2075 = vmatprep.subr.bf16.mxu1 %v2636_v30 }
 0x10e   : > { %2071 = vmatprep.mubr.msk.bf16.mxu0 %vm2637_vm5, %v2636_v30 }
 0x10f   : > { %2034 = vmatmul.mubr.msk.bf16.vlgmr.msra.gmra.mrb[8].mxu1 %vm878_vm4, %v2266_v29 }
 0x110   : > { %2077 = vmatprep.mubr.msk.bf16.mxu1 %vm2637_vm5, %v2636_v30 }
 0x1d0   : > { %v600_v37 = vpop.f32.mrb[0].mxu0  ;;  %v643_v43 = vpop.f32.mrb[0].mxu1 }
 0x1d1   : > { %v602_v38 = vpop.f32.mrb[1].mxu0  ;;  %v645_v44 = vpop.f32.mrb[1].mxu1 }
 0x1d2   : > { %v604_v39 = vpop.f32.mrb[2].mxu0  ;;  %v647_v46 = vpop.f32.mrb[2].mxu1 }
 0x1d3   : > { %v652_v40 = vpack.c.bf16 %v604_v39, %v600_v37  ;;  %v606_v41 = vpop.f32.mrb[3].mxu0  ;;  %v654_v48 = vpack.c.bf16 %v647_v46, %v643_v43  ;;  %v649_v49 = vpop.f32.mrb[3].mxu1 }
 0x1d4   : > { %v653_v42 = vpack.c.bf16 %v606_v41, %v602_v38  ;;  %v655_v51 = vpack.c.bf16 %v649_v49, %v645_v44  ;;  %v3162_v41 = vld [vmem:[#allocation3] sm:$0xff]  ;;  %v3167_v44 = vld [vmem:[#allocation3 + $0x8] sm:$0xff] }
 0x1d8   : > { %v779_v45 = vpop.f32.mrb[4].mxu0 }
 0x1d9   : > { %v781_v47 = vpop.f32.mrb[5].mxu0 }
 0x1da   : > { %v783_v50 = vpop.f32.mrb[6].mxu0  ;;  %v822_v55 = vpop.f32.mrb[4].mxu1 }
 0x1db   : > { %v831_v52 = vpack.c.bf16 %v783_v50, %v779_v45  ;;  %v785_v53 = vpop.f32.mrb[7].mxu0  ;;  %v824_v56 = vpop.f32.mrb[5].mxu1 }
 0x1dc   : > { %v832_v54 = vpack.c.bf16 %v785_v53, %v781_v47  ;;  %v826_v57 = vpop.f32.mrb[6].mxu1 }
 0x1dd   : > { %2070 = vmatpush3.bf16.xpose.msra.mxu0 %v831_v52  ;;  %v833_v58 = vpack.c.bf16 %v826_v57, %v822_v55  ;;  %v828_v59 = vpop.f32.mrb[7].mxu1  ;;  %v3201_v57 = vld [vmem:[#allocation3 + $0x20] sm:$0xff] }
 0x1de   : > { %2081 = vmatprep.subr.bf16.mxu0 %v2636_v30  ;;  %v834_v60 = vpack.c.bf16 %v828_v59, %v824_v56 }
 0x1e0   : > { %v929_v61 = vpop.f32.mrb[8].mxu0 }
 0x1e1   : > { %v3097_v62 = vpop.f32.mrb[9].mxu0 }
 0x1e2   : > { %v933_v63 = vpop.f32.mrb[10].mxu0 }
 0x1e3   : > { %v981_v1 = vpack.c.bf16 %v933_v63, %v929_v61  ;;  %v3099_v2 = vpop.f32.mrb[11].mxu0 }
 0x1e4   : > { %2072 = vmatmul.mubr.bf16.vlgmr.msra.gmra.mrb[12].mxu0 %v652_v40  ;;  %v982_v3 = vpack.c.bf16 %v3099_v2, %v3097_v62 }
 0x1e5   : > { %2082 = vmatpush3.bf16.xpose.msra.mxu0 %v832_v54  ;;  %2083 = vmatprep.mubr.msk.bf16.mxu0 %vm2637_vm5, %v2636_v30 }
 0x1e6   : > { %2093 = vmatprep.subr.bf16.mxu0 %v2636_v30  ;;  %2076 = vmatpush3.bf16.msra.mxu1 %v981_v1 }
 0x1e7   : > { %2087 = vmatprep.subr.bf16.mxu1 %v2636_v30 }
 0x1ec   : > { %2084 = vmatmul.mubr.bf16.vlgmr.msra.gmra.mrb[16].mxu0 %v653_v42 }
 0x1ed   : > { %2094 = vmatpush3.bf16.xpose.msra.mxu0 %v833_v58  ;;  %2095 = vmatprep.mubr.msk.bf16.mxu0 %vm2637_vm5, %v2636_v30 }
 0x1ee   : > { %2105 = vmatprep.subr.bf16.mxu0 %v2636_v30 }
 0x1f4   : > { %2096 = vmatmul.mubr.bf16.vlgmr.msra.gmra.mrb[20].mxu0 %v654_v48  ;;  %v3177_v48 = vld [vmem:[#allocation3 + $0x10] sm:$0xff] }
 0x1f5   : > { %2106 = vmatpush3.bf16.xpose.msra.mxu0 %v834_v60  ;;  %2107 = vmatprep.mubr.msk.bf16.mxu0 %vm2637_vm5, %v2636_v30  ;;  %v3207_v60 = vld [vmem:[#allocation3 + $0x28] sm:$0xff] }
 0x1fc   : > { %2108 = vmatmul.mubr.bf16.vlgmr.msra.gmra.mrb[24].mxu0 %v655_v51  ;;  %v3184_v51 = vld [vmem:[#allocation3 + $0x18] sm:$0xff] }
 0x2b7   : > { %v1024_v8 = vpop.f32.mrb[12].mxu0 }
 0x2b8   : > { %v3130_v9 = vadd.f32 %v2051_v6, %v1024_v8  ;;  %v2073_v10 = vpop.f32.mrb[13].mxu0  ;;  %v3227_v8 = vld [vmem:[#allocation3 + $0x38] sm:$0xff] }
 0x2b9   : > { %v1027_v11 = vpop.f32.mrb[14].mxu0 }
 0x2ba   : > { %v3132_v12 = vadd.f32 %v2052_v7, %v1027_v11  ;;  %v2074_v13 = vpop.f32.mrb[15].mxu0  ;;  %v1034_v14 = vsel %vm1033_vm7, %v3130_v9, -inf }
 0x2bb   : > { %1035 = vmax.xlane.f32.xlu0 %v1034_v14 }
 0x2bc   : > { %v1037_v15 = vsel %vm1033_vm7, %v3132_v12, -inf }
 0x2bf   : > { %1038 = vmax.xlane.f32.xlu0 %v1037_v15  ;;  %v1179_v16 = vpop.f32.mrb[16].mxu0  ;;  %v972_v15 = vpop.f32.mrb[8].mxu1 }
 0x2c0   : > { %v3138_v17 = vadd.f32 %v2051_v6, %v1179_v16  ;;  %v2085_v18 = vpop.f32.mrb[17].mxu0  ;;  %v3242_v16 = vpop.f32.mrb[9].mxu1 }
 0x2c1   : > { %v1182_v19 = vpop.f32.mrb[18].mxu0  ;;  %v976_v18 = vpop.f32.mrb[10].mxu1 }
 0x2c2   : > { %v3140_v20 = vadd.f32 %v2052_v7, %v1182_v19  ;;  %v2086_v21 = vpop.f32.mrb[19].mxu0  ;;  %v1189_v22 = vsel %vm1033_vm7, %v3138_v17, -inf  ;;  %v983_v19 = vpack.c.bf16 %v976_v18, %v972_v15 }
 0x2c3   : > { %1190 = vmax.xlane.f32.xlu1 %v1189_v22  ;;  %v3244_v21 = vpop.f32.mrb[11].mxu1 }
 0x2c4   : > { %v1192_v23 = vsel %vm1033_vm7, %v3140_v20, -inf  ;;  %v984_v22 = vpack.c.bf16 %v3244_v21, %v3242_v16 }
 0x2c5   : > { %1193 = vmax.xlane.f32.xlu0 %v1192_v23 }
 0x2c7   : > { %v1335_v24 = vpop.f32.mrb[20].mxu0 }
 0x2c8   : > { %v3146_v25 = vadd.f32 %v2051_v6, %v1335_v24  ;;  %v2097_v26 = vpop.f32.mrb[21].mxu0 }
 0x2c9   : > { %v1338_v27 = vpop.f32.mrb[22].mxu0 }
 0x2ca   : > { %v3148_v28 = vadd.f32 %v2052_v7, %v1338_v27  ;;  %v2098_v29 = vpop.f32.mrb[23].mxu0  ;;  %v1345_v31 = vsel %vm1033_vm7, %v3146_v25, -inf }
 0x2cb   : > { %1346 = vmax.xlane.f32.xlu0 %v1345_v31 }
 0x2cc   : > { %v1348_v32 = vsel %vm1033_vm7, %v3148_v28, -inf }
 0x2cf   : > { %1349 = vmax.xlane.f32.xlu0 %v1348_v32  ;;  %v1491_v33 = vpop.f32.mrb[24].mxu0 }
 0x2d0   : > { %v3154_v34 = vadd.f32 %v2051_v6, %v1491_v33  ;;  %v2109_v35 = vpop.f32.mrb[25].mxu0 }
 0x2d1   : > { %v1494_v36 = vpop.f32.mrb[26].mxu0 }
 0x2d2   : > { %v3156_v37 = vadd.f32 %v2052_v7, %v1494_v36  ;;  %v2110_v38 = vpop.f32.mrb[27].mxu0  ;;  %v1501_v39 = vsel %vm1033_vm7, %v3154_v34, -inf }
 0x2d3   : > { %1502 = vmax.xlane.f32.xlu0 %v1501_v39 }
 0x2d4   : > { %v1504_v40 = vsel %vm1033_vm7, %v3156_v37, -inf }
 0x2d7   : > { %1505 = vmax.xlane.f32.xlu0 %v1504_v40 }
 0x348   : > { %v1036_v42 = vpop.xlane.xlu0 %1035 }
 0x349   : > { %v3165_v43 = vmax.f32 %v3162_v41, %v1036_v42 }
 0x34b   : > { %v1042_v45 = vsub.f32 %v3162_v41, %v3165_v43  ;;  %1142 = vst.msk [vmem:[#allocation3] sm:$0xff] %vm660_vm6, %v3165_v43  ;;  %1050 = vperm.xlu1 %2235, %v3165_v43  }
 0x34c   : > { %v1039_v46 = vpop.xlane.xlu0 %1038 }
 0x34d   : > { %v3175_v47 = vmax.f32 %v3167_v44, %v1039_v46 }
 0x34f   : > { %v1043_v49 = vsub.f32 %v3167_v44, %v3175_v47  ;;  %1143 = vst.msk [vmem:[#allocation3 + $0x8] sm:$0xff] %vm660_vm6, %v3175_v47  ;;  %1055 = vperm.xlu0 %2236, %v3175_v47  }
 0x350   : > { %v1191_v50 = vpop.xlane.xlu1 %1190 }
 0x351   : > { %v3187_v52 = vmax.f32 %v3177_v48, %v1191_v50 }
 0x352   : > { %v1194_v53 = vpop.xlane.xlu0 %1193 }
 0x353   : > { %v1197_v54 = vsub.f32 %v3177_v48, %v3187_v52  ;;  %1298 = vst.msk [vmem:[#allocation3 + $0x10] sm:$0xff] %vm660_vm6, %v3187_v52  ;;  %v3194_v55 = vmax.f32 %v3184_v51, %v1194_v53  ;;  %1205 = vperm.xlu1 %2235, %v3187_v52   ;;  %v1046_v52 = vmul.f32 1.442695, %v1043_v49 }
 0x355   : > { %v1198_v56 = vsub.f32 %v3184_v51, %v3194_v55  ;;  %1299 = vst.msk [vmem:[#allocation3 + $0x18] sm:$0xff] %vm660_vm6, %v3194_v55 }
 0x356   : > { %v1634_v49 = vld [vmem:[#allocation3 + $0x8] sm:$0xff] }
 0x357   : > { %1210 = vperm.xlu1 %2235, %v3194_v55   ;;  %v1201_v41 = vmul.f32 1.442695, %v1198_v56  ;;  %vm1636_vm8 = vcmp.gt.f32.partialorder %v1634_v49, -1e+29 }
 0x358   : > { %v1347_v58 = vpop.xlane.xlu0 %1346 }
 0x359   : > { %v3205_v59 = vmax.f32 %v3201_v57, %v1347_v58 }
 0x35b   : > { %v1353_v61 = vsub.f32 %v3201_v57, %v3205_v59  ;;  %1454 = vst.msk [vmem:[#allocation3 + $0x20] sm:$0xff] %vm660_vm6, %v3205_v59  ;;  %1361 = vperm.xlu1 %2235, %v3205_v59  }
 0x35c   : > { %v1350_v63 = vpop.xlane.xlu0 %1349  ;;  %v1670_v56 = vld [vmem:[#allocation3 + $0x18] sm:$0xff] }
 0x35d   : > { %v3215_v1 = vmax.f32 %v3207_v60, %v1350_v63  ;;  %vm1672_vm9 = vcmp.gt.f32.partialorder %v1670_v56, -1e+29 }
 0x35f   : > { %v1354_v5 = vsub.f32 %v3207_v60, %v3215_v1  ;;  %1455 = vst.msk [vmem:[#allocation3 + $0x28] sm:$0xff] %vm660_vm6, %v3215_v1  ;;  %1366 = vperm.xlu1 %2235, %v3215_v1   ;;  %v1638_v60 = vsel %vm1636_vm8, 1, %v2635_v0 }
 0x360   : > { %v1503_v6 = vpop.xlane.xlu0 %1502 }
 0x361   : > { %v3225_v7 = vmax.f32 %v3217_v4, %v1503_v6  ;;  %v1357_v44 = vmul.f32 1.442695, %v1354_v5  ;;  %v1674_v5 = vsel %vm1672_vm9, 1, %v2635_v0 }
 0x363   : > { %v1509_v10 = vsub.f32 %v3217_v4, %v3225_v7  ;;  %1610 = vst.msk [vmem:[#allocation3 + $0x30] sm:$0xff] %vm660_vm6, %v3225_v7  ;;  %1517 = vperm.xlu0 %2236, %v3225_v7   ;;  %v1669_v7 = vld [vmem:[#allocation3 + $0x10] sm:$0xff] }
 0x364   : > { %v1506_v11 = vpop.xlane.xlu0 %1505  ;;  %vm1671_vm12 = vcmp.gt.f32.partialorder %v1669_v7, -1e+29 }
 0x365   : > { %v3235_v13 = vmax.f32 %v3227_v8, %v1506_v11  ;;  %v1511_v48 = vmul.f32 1.442695, %v1509_v10 }
 0x366   : > { %v1706_v1 = vld [vmem:[#allocation3 + $0x28] sm:$0xff] }
 0x367   : > { %v1510_v14 = vsub.f32 %v3227_v8, %v3235_v13  ;;  %1611 = vst.msk [vmem:[#allocation3 + $0x38] sm:$0xff] %vm660_vm6, %v3235_v13  ;;  %1522 = vperm.xlu1 %2235, %v3235_v13   ;;  %vm1708_vm11 = vcmp.gt.f32.partialorder %v1706_v1, -1e+29  ;;  %v1705_v13 = vld [vmem:[#allocation3 + $0x20] sm:$0xff] }
 0x368   : > { %v1710_v10 = vsel %vm1708_vm11, 1, %v2635_v0  ;;  %vm1707_vm13 = vcmp.gt.f32.partialorder %v1705_v13, -1e+29 }
 0x369   : > { %v1709_v21 = vsel %vm1707_vm13, 1, %v2635_v0 }
 0x3ca   : > { %v1051_v23 = vpop.permute.xlu1 %1050 }
 0x3cb   : > { %v1058_v24 = vsub.f32 %v3130_v9, %v1051_v23 }
 0x3cd   : > { %v1060_v26 = vmul.f32 1.442695, %v1058_v24 }
 0x3ce   : > { %v1056_v27 = vpop.permute.xlu0 %1055 }
 0x3cf   : > { %2272 = vpow2.f32 %v1060_v26  ;;  %v1059_v29 = vsub.f32 %v3132_v12, %v1056_v27 }
 0x3d1   : > { %v1062_v31 = vmul.f32 1.442695, %v1059_v29 }
 0x3d2   : > { %v1206_v32 = vpop.permute.xlu1 %1205 }
 0x3d3   : > { %2274 = vpow2.f32 %v1062_v31  ;;  %v1213_v33 = vsub.f32 %v3138_v17, %v1206_v32 }
 0x3d5   : > { %v1215_v35 = vmul.f32 1.442695, %v1213_v33 }
 0x3d6   : > { %v1211_v36 = vpop.permute.xlu1 %1210 }
 0x3d7   : > { %2276 = vpow2.f32 %v1215_v35  ;;  %v1214_v38 = vsub.f32 %v3140_v20, %v1211_v36  ;;  %v1355_v35 = vmul.f32 1.442695, %v1353_v61  ;;  %v1633_v61 = vld [vmem:[#allocation3] sm:$0xff] }
 0x3d8   : > { %vm1635_vm10 = vcmp.gt.f32.partialorder %v1633_v61, -1e+29 }
 0x3d9   : > { %v2273_v39 = vpop.eup %2272  ;;  %v1217_v40 = vmul.f32 1.442695, %v1214_v38  ;;  %v1637_v8 = vsel %vm1635_vm10, 1, %v2635_v0 }
 0x3da   : > { %v1362_v42 = vpop.permute.xlu1 %1361  ;;  %v1068_v9 = vsel %vm1033_vm7, %v2273_v39, 0.0 }
 0x3db   : > { %2278 = vpow2.f32 %v1217_v40  ;;  %v1369_v46 = vsub.f32 %v3146_v25, %v1362_v42  ;;  %1069 = vadd.xlane.f32.xlu1 %v1068_v9  ;;  %v1065_v40 = vld [vmem:[#allocation4 + $0x8] sm:$0xff] }
 0x3dd   : > { %v2275_v12 = vpop.eup %2274  ;;  %v1371_v50 = vmul.f32 1.442695, %v1369_v46 }
 0x3de   : > { %v1367_v53 = vpop.permute.xlu1 %1366  ;;  %v1071_v58 = vsel %vm1033_vm7, %v2275_v12, 0.0  ;;  %v1093_v17 = vpack.c.bf16 %v2275_v12, %v2273_v39  ;;  %v1220_v12 = vld [vmem:[#allocation4 + $0x10] sm:$0xff] }
 0x3df   : > { %2280 = vpow2.f32 %v1371_v50  ;;  %v1370_v63 = vsub.f32 %v3148_v28, %v1367_v53  ;;  %1072 = vadd.xlane.f32.xlu0 %v1071_v58 }
 0x3e0   : > { %2078 = vmatmul.mubr.msk.bf16.vlgmr.msra.gmra.mrb[12].mxu1 %vm1033_vm7, %v1093_v17  ;;  %v1221_v17 = vld [vmem:[#allocation4 + $0x18] sm:$0xff] }
 0x3e1   : > { %v2277_v20 = vpop.eup %2276  ;;  %v1373_v6 = vmul.f32 1.442695, %v1370_v63  ;;  %2088 = vmatpush3.bf16.msra.mxu1 %v982_v3  ;;  %2089 = vmatprep.mubr.msk.bf16.mxu1 %vm2637_vm5, %v2636_v30 }
 0x3e2   : > { %v1518_v25 = vpop.permute.xlu0 %1517  ;;  %v1224_v11 = vsel %vm1033_vm7, %v2277_v20, 0.0  ;;  %2099 = vmatprep.subr.bf16.mxu1 %v2636_v30 }
 0x3e3   : > { %2282 = vpow2.f32 %v1373_v6  ;;  %v1525_v28 = vsub.f32 %v3154_v34, %v1518_v25  ;;  %1225 = vadd.xlane.f32.xlu1 %v1224_v11  ;;  %v1376_v11 = vld [vmem:[#allocation4 + $0x20] sm:$0xff] }
 0x3e5   : > { %v2279_v15 = vpop.eup %2278  ;;  %v1527_v18 = vmul.f32 1.442695, %v1525_v28 }
 0x3e6   : > { %v1523_v23 = vpop.permute.xlu1 %1522  ;;  %v1227_v24 = vsel %vm1033_vm7, %v2279_v15, 0.0  ;;  %v1249_v26 = vpack.c.bf16 %v2279_v15, %v2277_v20 }
 0x3e7   : > { %2284 = vpow2.f32 %v1527_v18  ;;  %v1526_v62 = vsub.f32 %v3156_v37, %v1523_v23  ;;  %1228 = vadd.xlane.f32.xlu0 %v1227_v24  ;;  %v1377_v24 = vld [vmem:[#allocation4 + $0x28] sm:$0xff] }
 0x3e8   : > { %2090 = vmatmul.mubr.msk.bf16.vlgmr.msra.gmra.mrb[16].mxu1 %vm1033_vm7, %v1249_v26 }
 0x3e9   : > { %v2281_v2 = vpop.eup %2280  ;;  %v1529_v3 = vmul.f32 1.442695, %v1526_v62  ;;  %2100 = vmatpush3.bf16.msra.mxu1 %v983_v19  ;;  %2101 = vmatprep.mubr.msk.bf16.mxu1 %vm2637_vm5, %v2636_v30  ;;  %v1199_v19 = vmul.f32 1.442695, %v1197_v54  ;;  %v1513_v54 = vmul.f32 1.442695, %v1510_v14 }
 0x3ea   : > { %v1380_v34 = vsel %vm1033_vm7, %v2281_v2, 0.0  ;;  %2111 = vmatprep.subr.bf16.mxu1 %v2636_v30  ;;  %v1673_v14 = vsel %vm1671_vm12, 1, %v2635_v0 }
 0x3eb   : > { %2286 = vpow2.f32 %v1529_v3  ;;  %1381 = vadd.xlane.f32.xlu0 %v1380_v34  ;;  %v1532_v34 = vld [vmem:[#allocation4 + $0x30] sm:$0xff] }
 0x3ec   : > { %2288 = vpow2.f32 %v1199_v19 }
 0x3ed   : > { %v2283_v27 = vpop.eup %2282  ;;  %2290 = vpow2.f32 %v1355_v35 }
 0x3ee   : > { %v1383_v29 = vsel %vm1033_vm7, %v2283_v27, 0.0  ;;  %v1405_v31 = vpack.c.bf16 %v2283_v27, %v2281_v2 }
 0x3ef   : > { %1384 = vadd.xlane.f32.xlu1 %v1383_v29 }
 0x3f0   : > { %2102 = vmatmul.mubr.msk.bf16.vlgmr.msra.gmra.mrb[20].mxu1 %vm1033_vm7, %v1405_v31 }
 0x3f1   : > { %v2285_v37 = vpop.eup %2284  ;;  %2112 = vmatpush3.bf16.msra.mxu1 %v984_v22  ;;  %2113 = vmatprep.mubr.msk.bf16.mxu1 %vm2637_vm5, %v2636_v30  ;;  %v1044_v30 = vmul.f32 1.442695, %v1042_v45  ;;  %v1064_v22 = vld [vmem:[#allocation4] sm:$0xff] }
 0x3f2   : > { %v1536_v32 = vsel %vm1033_vm7, %v2285_v37, 0.0 }
 0x3f3   : > { %1537 = vadd.xlane.f32.xlu1 %v1536_v32  ;;  %2292 = vpow2.f32 %v1044_v30  ;;  %v1533_v32 = vld [vmem:[#allocation4 + $0x38] sm:$0xff] }
 0x3f4   : > { %2294 = vpow2.f32 %v1511_v48 }
 0x3f5   : > { %v2287_v33 = vpop.eup %2286  ;;  %2296 = vpow2.f32 %v1046_v52 }
 0x3f6   : > { %v1539_v36 = vsel %vm1033_vm7, %v2287_v33, 0.0  ;;  %v1561_v16 = vpack.c.bf16 %v2287_v33, %v2285_v37  ;;  %v2289_v57 = vpop.eup %2288  ;;  %2298 = vpow2.f32 %v1513_v54 }
 0x3f7   : > { %1540 = vadd.xlane.f32.xlu1 %v1539_v36  ;;  %v3303_v43 = vpop.eup %2290  ;;  %2300 = vpow2.f32 %v1201_v41  ;;  %v1222_v53 = vmul.f32 %v2289_v57, %v1220_v12 }
 0x3f8   : > { %2114 = vmatmul.mubr.msk.bf16.vlgmr.msra.gmra.mrb[24].mxu1 %vm1033_vm7, %v1561_v16  ;;  %2302 = vpow2.f32 %v1357_v44  ;;  %v1378_v18 = vmul.f32 %v3303_v43, %v1376_v11 }
 0x3fd   : > { %v2293_v45 = vpop.eup %2292 }
 0x3fe   : > { %v3309_v47 = vpop.eup %2294  ;;  %v1066_v38 = vmul.f32 %v2293_v45, %v1064_v22 }
 0x3ff   : > { %v2297_v51 = vpop.eup %2296  ;;  %v1534_v37 = vmul.f32 %v3309_v47, %v1532_v34 }
 0x400   : > { %v3312_v55 = vpop.eup %2298  ;;  %v1067_v9 = vmul.f32 %v2297_v51, %v1065_v40 }
 0x401   : > { %1239 = vperm.xlu0 %2236, %v2289_v57   ;;  %v2301_v59 = vpop.eup %2300  ;;  %v1535_v16 = vmul.f32 %v3312_v55, %v1533_v32 }
 0x402   : > { %v2303_v4 = vpop.eup %2302  ;;  %v1223_v6 = vmul.f32 %v2301_v59, %v1221_v17 }
 0x403   : > { %v1379_v2 = vmul.f32 %v2303_v4, %v1377_v24 }
 0x405   : > { %1395 = vperm.xlu0 %2236, %v3303_v43  }
 0x408   : > { %1083 = vperm.xlu1 %2235, %v2293_v45  }
 0x409   : > { %1551 = vperm.xlu0 %2236, %v3309_v47   ;;  %v1742_v47 = vld [vmem:[#allocation3 + $0x38] sm:$0xff] }
 0x40a   : > { %vm1744_vm14 = vcmp.gt.f32.partialorder %v1742_v47, -1e+29 }
 0x40b   : > { %v1746_v56 = vsel %vm1744_vm14, 1, %v2635_v0 }
 0x40c   : > { %1088 = vperm.xlu1 %2235, %v2297_v51   ;;  %v1741_v51 = vld [vmem:[#allocation3 + $0x30] sm:$0xff] }
 0x40d   : > { %1556 = vperm.xlu0 %2236, %v3312_v55   ;;  %vm1743_vm15 = vcmp.gt.f32.partialorder %v1741_v51, -1e+29 }
 0x410   : > { %1244 = vperm.xlu1 %2235, %v2301_v59   ;;  %v1745_v59 = vsel %vm1743_vm15, 1, %v2635_v0 }
 0x411   : > { %1643 = vperm.xlu0 %2236, %v1638_v60  }
 0x414   : > { %1400 = vperm.xlu1 %2235, %v2303_v4  }
 0x415   : > { %1679 = vperm.xlu0 %2236, %v1674_v5  }
 0x418   : > { %1640 = vperm.xlu1 %2235, %v1637_v8  }
 0x419   : > { %1715 = vperm.xlu0 %2236, %v1710_v10  }
 0x41c   : > { %1676 = vperm.xlu1 %2235, %v1673_v14  }
 0x420   : > { %1712 = vperm.xlu1 %2235, %v1709_v21  }
 0x468   : > { %v1070_v39 = vpop.xlane.xlu1 %1069 }
 0x469   : > { %v1074_v42 = vadd.f32 %v1070_v39, %v1066_v38 }
 0x46b   : > { %1077 = vst.msk [vmem:[#allocation4] sm:$0xff] %vm660_vm6, %v1074_v42 }
 0x46c   : > { %v1073_v46 = vpop.xlane.xlu0 %1072 }
 0x46d   : > { %v1075_v50 = vadd.f32 %v1073_v46, %v1067_v9 }
 0x46f   : > { %1078 = vst.msk [vmem:[#allocation4 + $0x8] sm:$0xff] %vm660_vm6, %v1075_v50 }
 0x470   : > { %v1226_v58 = vpop.xlane.xlu1 %1225 }
 0x471   : > { %v1230_v63 = vadd.f32 %v1226_v58, %v1222_v53 }
 0x472   : > { %v1615_v20 = vld [vmem:[#allocation4] sm:$0xff] }
 0x473   : > { %1232 = vst.msk [vmem:[#allocation4 + $0x10] sm:$0xff] %vm660_vm6, %v1230_v63  ;;  %2304 = vrcp.f32 %v1615_v20 }
 0x474   : > { %v1229_v25 = vpop.xlane.xlu0 %1228 }
 0x475   : > { %v1231_v28 = vadd.f32 %v1229_v25, %v1223_v6 }
 0x476   : > { %v1616_v15 = vld [vmem:[#allocation4 + $0x8] sm:$0xff] }
 0x477   : > { %1233 = vst.msk [vmem:[#allocation4 + $0x18] sm:$0xff] %vm660_vm6, %v1231_v28  ;;  %2306 = vrcp.f32 %v1616_v15 }
 0x478   : > { %v1382_v23 = vpop.xlane.xlu0 %1381 }
 0x479   : > { %v1386_v26 = vadd.f32 %v1382_v23, %v1378_v18 }
 0x47a   : > { %v1651_v62 = vld [vmem:[#allocation4 + $0x10] sm:$0xff] }
 0x47b   : > { %1388 = vst.msk [vmem:[#allocation4 + $0x20] sm:$0xff] %vm660_vm6, %v1386_v26  ;;  %2308 = vrcp.f32 %v1651_v62 }
 0x47c   : > { %v1385_v3 = vpop.xlane.xlu1 %1384 }
 0x47d   : > { %v2305_v27 = vpop.eup %2304  ;;  %v1387_v29 = vadd.f32 %v1385_v3, %v1379_v2 }
 0x47e   : > { %1623 = vperm.xlu0 %2236, %v2305_v27   ;;  %v1652_v31 = vld [vmem:[#allocation4 + $0x18] sm:$0xff] }
 0x47f   : > { %1389 = vst.msk [vmem:[#allocation4 + $0x28] sm:$0xff] %vm660_vm6, %v1387_v29  ;;  %2310 = vrcp.f32 %v1652_v31 }
 0x480   : > { %v1538_v19 = vpop.xlane.xlu1 %1537  ;;  %v1240_v0 = vpop.permute.xlu0 %1239 }
 0x481   : > { %v2307_v33 = vpop.eup %2306  ;;  %v1542_v35 = vadd.f32 %v1538_v19, %v1534_v37  ;;  %v1247_v34 = vmul.f32 0.0, %v1240_v0 }
 0x482   : > { %1628 = vperm.xlu0 %2236, %v2307_v33   ;;  %v1687_v36 = vld [vmem:[#allocation4 + $0x20] sm:$0xff] }
 0x483   : > { %1544 = vst.msk [vmem:[#allocation4 + $0x30] sm:$0xff] %vm660_vm6, %v1542_v35  ;;  %2312 = vrcp.f32 %v1687_v36 }
 0x484   : > { %v1541_v30 = vpop.xlane.xlu1 %1540  ;;  %v1396_v9 = vpop.permute.xlu0 %1395 }
 0x485   : > { %v2309_v48 = vpop.eup %2308  ;;  %v1543_v52 = vadd.f32 %v1541_v30, %v1535_v16  ;;  %v1403_v16 = vmul.f32 0.0, %v1396_v9 }
 0x486   : > { %1659 = vperm.xlu1 %2235, %v2309_v48   ;;  %v1688_v54 = vld [vmem:[#allocation4 + $0x28] sm:$0xff] }
 0x487   : > { %1545 = vst.msk [vmem:[#allocation4 + $0x38] sm:$0xff] %vm660_vm6, %v1543_v52  ;;  %2314 = vrcp.f32 %v1688_v54 }
 0x488   : > { %v1084_v46 = vpop.permute.xlu1 %1083  ;;  %v1552_v12 = vpop.permute.xlu0 %1551 }
 0x489   : > { %v2311_v57 = vpop.eup %2310  ;;  %v1091_v11 = vmul.f32 0.0, %v1084_v46 }
 0x48a   : > { %1664 = vperm.xlu0 %2236, %v2311_v57   ;;  %v1723_v41 = vld [vmem:[#allocation4 + $0x30] sm:$0xff] }
 0x48b   : > { %2316 = vrcp.f32 %v1723_v41 }
 0x48c   : > { %v1089_v50 = vpop.permute.xlu1 %1088  ;;  %v1557_v53 = vpop.permute.xlu0 %1556 }
 0x48d   : > { %v2313_v43 = vpop.eup %2312  ;;  %v1092_v23 = vmul.f32 0.0, %v1089_v50 }
 0x48e   : > { %1695 = vperm.xlu0 %2236, %v2313_v43   ;;  %v1724_v44 = vld [vmem:[#allocation4 + $0x38] sm:$0xff] }
 0x48f   : > { %2318 = vrcp.f32 %v1724_v44 }
 0x490   : > { %v1245_v58 = vpop.permute.xlu1 %1244  ;;  %v1644_v17 = vpop.permute.xlu0 %1643 }
 0x491   : > { %v2315_v45 = vpop.eup %2314  ;;  %vm1646_vm1 = vcmp.eq.s32.totalorder %v1644_v17, 1  ;;  %v1248_v19 = vmul.f32 0.0, %v1245_v58 }
 0x492   : > { %1700 = vperm.xlu1 %2235, %v2315_v45  }
 0x494   : > { %v1401_v63 = vpop.permute.xlu1 %1400  ;;  %v1680_v20 = vpop.permute.xlu0 %1679 }
 0x495   : > { %v2317_v49 = vpop.eup %2316  ;;  %vm1682_vm3 = vcmp.eq.s32.totalorder %v1680_v20, 1  ;;  %v1404_v57 = vmul.f32 0.0, %v1401_v63 }
 0x496   : > { %1731 = vperm.xlu0 %2236, %v2317_v49  }
 0x498   : > { %v1641_v6 = vpop.permute.xlu1 %1640  ;;  %v1716_v25 = vpop.permute.xlu0 %1715 }
 0x499   : > { %v2319_v55 = vpop.eup %2318  ;;  %vm1645_vm0 = vcmp.eq.s32.totalorder %v1641_v6, 1  ;;  %vm1718_vm5 = vcmp.eq.s32.totalorder %v1716_v25, 1 }
 0x49a   : > { %1736 = vperm.xlu1 %2235, %v2319_v55   ;;  %1751 = vperm.xlu0 %2236, %v1746_v56   ;;  %v1560_v55 = vmul.f32 0.0, %v1557_v53 }
 0x49c   : > { %v1677_v28 = vpop.permute.xlu1 %1676 }
 0x49d   : > { %vm1681_vm2 = vcmp.eq.s32.totalorder %v1677_v28, 1 }
 0x49e   : > { %1748 = vperm.xlu1 %2235, %v1745_v59   ;;  %v1559_v59 = vmul.f32 0.0, %v1552_v12 }
 0x4a0   : > { %v1713_v2 = vpop.permute.xlu1 %1712 }
 0x4a1   : > { %vm1717_vm4 = vcmp.eq.s32.totalorder %v1713_v2, 1 }
 0x4b3   : > { %v1131_v60 = vpop.f32.mrb[12].mxu1 }
 0x4b4   : > { %v2079_v61 = vpop.f32.mrb[13].mxu1  ;;  %v1138_v15 = vadd.f32 %v1131_v60, %v1091_v11 }
 0x4b5   : > { %v1134_v1 = vpop.f32.mrb[14].mxu1 }
 0x4b6   : > { %v2080_v4 = vpop.f32.mrb[15].mxu1  ;;  %v1139_v26 = vadd.f32 %v1134_v1, %v1092_v23 }
 0x4bb   : > { %v1287_v5 = vpop.f32.mrb[16].mxu1 }
 0x4bc   : > { %v2091_v7 = vpop.f32.mrb[17].mxu1  ;;  %v1294_v29 = vadd.f32 %v1287_v5, %v1247_v34 }
 0x4bd   : > { %v1290_v8 = vpop.f32.mrb[18].mxu1 }
 0x4be   : > { %v2092_v10 = vpop.f32.mrb[19].mxu1  ;;  %v1295_v33 = vadd.f32 %v1290_v8, %v1248_v19 }
 0x4c3   : > { %v1443_v13 = vpop.f32.mrb[20].mxu1 }
 0x4c4   : > { %v2103_v14 = vpop.f32.mrb[21].mxu1  ;;  %v1450_v48 = vadd.f32 %v1443_v13, %v1403_v16 }
 0x4c5   : > { %v1446_v21 = vpop.f32.mrb[22].mxu1 }
 0x4c6   : > { %v2104_v22 = vpop.f32.mrb[23].mxu1  ;;  %v1451_v43 = vadd.f32 %v1446_v21, %v1404_v57 }
 0x4cb   : > { %v3334_v38 = vpop.f32.mrb[24].mxu1 }
 0x4cc   : > { %v2115_v39 = vpop.f32.mrb[25].mxu1  ;;  %v1606_v4 = vadd.f32 %v3334_v38, %v1559_v59 }
 0x4cd   : > { %v1602_v40 = vpop.f32.mrb[26].mxu1 }
 0x4ce   : > { %v2116_v42 = vpop.f32.mrb[27].mxu1  ;;  %v1607_v56 = vadd.f32 %v1602_v40, %v1560_v55 }
 0x4fd   : > { %v1624_v18 = vpop.permute.xlu0 %1623 }
 0x4fe   : > { %v1631_v24 = vmul.f32 %v1624_v18, %v1138_v15 }
 0x500   : > { %v1647_v62 = vsel %vm1645_vm0, %v1631_v24, 0.0 }
 0x501   : > { %1649 = vst [vmem:[%s3337_s11] sm:$0xff] %v1647_v62  ;;  %v1629_v3 = vpop.permute.xlu0 %1628 }
 0x502   : > { %v1632_v27 = vmul.f32 %v1629_v3, %v1139_v26 }
 0x504   : > { %v1648_v31 = vsel %vm1646_vm1, %v1632_v27, 0.0 }
 0x505   : > { %1650 = vst [vmem:[%s3337_s11 + $0x20] sm:$0xff] %v1648_v31  ;;  %v1660_v37 = vpop.permute.xlu1 %1659 }
 0x506   : > { %v1667_v32 = vmul.f32 %v1660_v37, %v1294_v29 }
 0x508   : > { %v1683_v35 = vsel %vm1681_vm2, %v1667_v32, 0.0 }
 0x509   : > { %1685 = vst [vmem:[%s3337_s11 + $0x8] sm:$0xff] %v1683_v35  ;;  %v1665_v36 = vpop.permute.xlu0 %1664 }
 0x50a   : > { %v1668_v30 = vmul.f32 %v1665_v36, %v1295_v33 }
 0x50c   : > { %v1684_v52 = vsel %vm1682_vm3, %v1668_v30, 0.0 }
 0x50d   : > { %1686 = vst [vmem:[%s3337_s11 + $0x28] sm:$0xff] %v1684_v52  ;;  %v1696_v54 = vpop.permute.xlu0 %1695 }
 0x50e   : > { %v1703_v41 = vmul.f32 %v1696_v54, %v1450_v48 }
 0x510   : > { %v1719_v44 = vsel %vm1717_vm4, %v1703_v41, 0.0 }
 0x511   : > { %1721 = vst [vmem:[%s3337_s11 + $0x10] sm:$0xff] %v1719_v44  ;;  %v1701_v45 = vpop.permute.xlu1 %1700 }
 0x512   : > { %v1704_v47 = vmul.f32 %v1701_v45, %v1451_v43 }
 0x514   : > { %v1720_v49 = vsel %vm1718_vm5, %v1704_v47, 0.0 }
 0x515   : > { %1722 = vst [vmem:[%s3337_s11 + $0x30] sm:$0xff] %v1720_v49  ;;  %v1732_v51 = vpop.permute.xlu0 %1731 }
 0x516   : > { %v1739_v7 = vmul.f32 %v1732_v51, %v1606_v4 }
 0x519   : > { %v1737_v60 = vpop.permute.xlu1 %1736  ;;  %v1752_v61 = vpop.permute.xlu0 %1751 }
 0x51a   : > { %v1740_v1 = vmul.f32 %v1737_v60, %v1607_v56  ;;  %vm1754_vm6 = vcmp.eq.s32.totalorder %v1752_v61, 1 }
 0x51c   : > { %v1756_v5 = vsel %vm1754_vm6, %v1740_v1, 0.0 }
 0x51d   : > { %1758 = vst [vmem:[%s3337_s11 + $0x38] sm:$0xff] %v1756_v5  ;;  %v1749_v8 = vpop.permute.xlu1 %1748 }
 0x51e   : > { %vm1753_vm7 = vcmp.eq.s32.totalorder %v1749_v8, 1 }
 0x51f   : > { %v1755_v10 = vsel %vm1753_vm7, %v1739_v7, 0.0 }
 0x520   : > { %1757 = vst [vmem:[%s3337_s11 + $0x18] sm:$0xff] %v1755_v10 }
 0x521   : > { %2537 = shalt.err (!%p2534_p12)
}
 0x522   : > { %s2538_s18 = scalar_lea.hbm %s3354_s7, 1024  ;;  %s2542_s5 = scalar_lea.hbm %s3473_s23, 2048 }
 0x523   : > { %p2539_p11 = scmp.ne.s32.totalorder %s3354_s7, %s2538_s18  ;;  %p2543_p0 = scmp.lt.u32.totalorder %s3354_s7, %s3473_s23 }
 0x524   : > { %p2544_p1 = scmp.lt.u32.totalorder %s2542_s5, %s2538_s18  ;;  %p2546_p7 = scmp.lt.u32.totalorder %s2538_s18, %s3354_s7 }
 0x525   : > { %p2540_p6 = pnand %p2539_p11, %p3474_p8 }
 0x526   : > { %p2545_p2 = por %p2544_p1, %p2543_p0 }
 0x527   : > { %p2541_p4 = pneg %p2540_p6 }
 0x528   : > { %p2547_p10 = por %p2546_p7, %p2545_p2 }
 0x52a   : > { %p2548_p5 = pnand %p2547_p10, %p2541_p4 }
 0x52c   : > { %2551 = shalt.err (!%p2548_p5)
}
 0x52d   : > { %s2640_s28 = smov 512   ;;  %s2641_s24 = smov 32  }
 0x52e   : > { %2137 = dma.vmem_to_hbm [thread:$0]  (%p3474_p8), %s3348_s9, 1024, %s3354_s7, %s1760_s13, %s2640_s28, %s2640_s28, %s2641_s24  }
 0x52f PF: > { %s3475_s30 = sld [smem:[#allocation25_spill]]  ;;  %s3476_s11 = sld [smem:[#allocation29_spill]] }
 0x530   : > { %p3478_p13 = scmp.ge.s32.totalorder %s2622_s29, 2 }
 0x535   : > { %s1791_s27 = sand.u32 1, %s3475_s30   ;;  %p3477_p9 = scmp.ne.s32.totalorder %s3476_s11, 0 }
 0x536   : > { %s1792_s21 = scalar_lea.sflag [#allocation8], %s1791_s27 }
 0x537   : > { %p2163_p3 = pnand %p3478_p13, %p3477_p9 }
 0x539   : > { %2597 = dma.done.wait (!%p2163_p3), %s1792_s21, 1024  }
 0x53a   : > { %2599 = vsyncadd (!%p2163_p3), %s1792_s21, 4294966272  ;;  %s30_s29 = sadd.s32 1, %s2622_s29   ;;  %s3479_s22 = sld [smem:[#allocation31_spill]] }
 0x53b   : > { %p27_p12 = scmp.ge.s32.totalorder %s30_s29, 4   ;;  %s3480_s27 = sld [smem:[#allocation27_spill]] }
 0x53c   : > { %s3481_s28 = sld [smem:[#allocation30_spill]]  ;;  %s3482_s24 = smov %s2606_s25 }
 0x53d   : > { %s3483_s25 = smov %s2610_s26  ;;  %29 = sbr.rel (!%p27_p12) target bundleno = 16 (0x10), region = 159 }
 0x540   : > { %s3484_s26 = smov %s3479_s22 }
 0x544   :  { %1797 = vsyncpa [#allocation7], 1 }
 0x545   :  { %1799 = vsyncpa [#allocation7 + $0x1], 1 }
 0x546   :  { %1800 = vsyncpa [#allocation10], 1 }
 0x547   :  { %1802 = vsyncpa [#allocation10 + $0x1], 1 }
 0x548   :  { %1803 = vsyncpa [#allocation13], 1 }
 0x549   :  { %1805 = vsyncpa [#allocation13 + $0x1], 1 }
 0x54a   :  { %1806 = vsyncpa [#allocation16], 1 }
 0x54b   :  { %1807 = vsyncpa [#allocation8], 1 }
 0x54c   :  { %1809 = vsyncpa [#allocation8 + $0x1], 1 }

// kernel: tpu_custom_call.1
= control target key start
LH: loop header
LB: loop body
LE: loop exit
PB: predicated region body
PF: predicated region fallthrough
CT: control target
= control target key end

     0   :  { %s3404_s0 = inlined_call_operand.hbm [shape: bf16[2,16,32], index: 0, kind: input, shape index: {}]   ;;  %s3405_s1 = inlined_call_operand.hbm [shape: bf16[2,16,24], index: 1, kind: input, shape index: {}]   ;;  %s3406_s2 = inlined_call_operand.hbm [shape: bf16[2,16,20], index: 2, kind: input, shape index: {}]   ;;  %s3407_s3 = inlined_call_operand.hbm [shape: bf16[2,16,16], index: 3, kind: input, shape index: {}]   ;;  %s3408_s4 = inlined_call_operand.hbm [shape: bf16[32,512], index: 4, kind: input, shape index: {}]   ;;  %s3409_s5 = inlined_call_operand.hbm [shape: bf16[24,512], index: 5, kind: input, shape index: {}]   ;;  %s3410_s6 = inlined_call_operand.hbm [shape: bf16[20,512], index: 6, kind: input, shape index: {}]   ;;  %s3411_s7 = inlined_call_operand.hbm [shape: f32[2,16,512], index: 7, kind: output, shape index: {}]  }
   0x1   :  { %3432 = sst [smem:[#allocation32_spill]] %s3405_s1 }
   0x2   :  { %3433 = sst [smem:[#allocation33_spill]] %s3408_s4 }
   0x3   :  { %3434 = sst [smem:[#allocation34_spill]] %s3409_s5 }
   0x4   :  { %3435 = sst [smem:[#allocation35_spill]] %s3411_s7 }
   0x5   :  { %12 = vsyncpa [#allocation7], 0 }
   0x6   :  { %14 = vsyncpa [#allocation7 + $0x1], 0 }
   0x7   :  { %15 = vsyncpa [#allocation10], 0 }
   0x8   :  { %17 = vsyncpa [#allocation10 + $0x1], 0 }
   0x9   :  { %18 = vsyncpa [#allocation13], 0 }
   0xa   :  { %20 = vsyncpa [#allocation13 + $0x1], 0 }
   0xb   :  { %21 = vsyncpa [#allocation16], 0 }
   0xc   :  { %22 = vsyncpa [#allocation8], 0 }
   0xd   :  { %24 = vsyncpa [#allocation8 + $0x1], 0  ;;  %s2682_s24 = smov 0   ;;  %s2684_s25 = smov 0  }
   0xe   :  { %s2686_s26 = smov 0   ;;  %s2688_s27 = smov 0  }
   0xf   :  { %s2690_s28 = smov 0   ;;  %s2692_s29 = smov 0  }
  0x10 LB: > { %3436 = sst [smem:[#allocation25_spill]] %s2602_s24  ;;  %s2713_s30 = sadd.s32 4294967295, %s2622_s29   ;;  %s2622_s29 = sphi %s2692_s29, %s30_s29   ;;  %s2618_s28 = sphi %s2690_s28, %s3481_s28   ;;  %s2614_s27 = sphi %s2688_s27, %s3480_s27   ;;  %s2610_s26 = sphi %s2686_s26, %s3484_s26   ;;  %s2606_s25 = sphi %s2684_s25, %s3483_s25   ;;  %s2602_s24 = sphi %s2682_s24, %s3482_s24  }
  0x11   : > { %3437 = sst [smem:[#allocation26_spill]] %s2614_s27  ;;  %s1971_s8 = sadd.s32 4294967294, %s2622_s29  }
  0x12   : > { %3438 = sst [smem:[#allocation27_spill]] %s2618_s28  ;;  %p65_p0 = scmp.ne.s32.totalorder %s2610_s26, %s2606_s25 }
  0x13   : > { %p66_p1 = scmp.eq.s32.totalorder %s2622_s29, 0  ;;  %p71_p2 = scmp.ne.s32.totalorder %s2606_s25, %s2602_s24 }
  0x14   : > { %p3413_p3 = scmp.eq.s32.totalorder %s2713_s30, 0  ;;  %p246_p4 = scmp.eq.s32.totalorder %s2713_s30, 1 }
  0x15   : > { %p2724_p5 = por %p66_p1, %p65_p0  ;;  %p252_p6 = scmp.eq.s32.totalorder %s1971_s8, 1 }
  0x16   : > { %p2730_p7 = por %p3413_p3, %p71_p2  ;;  %p2734_p8 = por %p246_p4, %p65_p0 }
  0x17   : > { %p2738_p9 = por %p252_p6, %p71_p2  ;;  %p1972_p10 = scmp.ge.s32.totalorder %s2622_s29, 1 }
  0x18   : > { %s3440_s11 = scalar_select %p2730_p7, 1, 0 }
  0x19   : > { %s3441_s12 = scalar_select %p2734_p8, 1, 0 }
  0x1a   : > { %s3443_s13 = scalar_select %p2738_p9, 1, 0 }
  0x1b   : > { %3442 = sst [smem:[#allocation28_spill]] %s3441_s12  ;;  %p259_p11 = scmp.lt.s32.totalorder %s2622_s29, 3 }
  0x1c   : > { %3444 = sst [smem:[#allocation29_spill]] %s3443_s13  ;;  %s2624_s15 = smov [#allocation14]  }
  0x1d   : > { %p2744_p12 = pnand %p1972_p10, %p259_p11  ;;  %s271_s16 = sshll.u32 %s2624_s15, 4  ;;  %s2748_s16 = int_to_ptr.vmem [resolvable:$true] %s271_s16 }
  0x1e   : > { %s2625_s18 = smov [#allocation15]   ;;  %s3447_s4 = sld [smem:[#allocation33_spill]] }
  0x1f   : > { %s3445_s14 = scalar_select %p2744_p12, 1, 0 }
  0x20   : > { %p2139_p13 = pneg %p2744_p12  ;;  %s284_s19 = sshll.u32 %s2625_s18, 4  ;;  %s2759_s19 = int_to_ptr.vmem [resolvable:$true] %s284_s19 }
  0x22   : > { %p2755_p1 = pnand %p2139_p13, %p3413_p3 }
  0x24   : > { %s3446_s17 = scalar_select %p2755_p1, 1, 0 }
  0x25   : > { %s2320_s23 = scalar_lea.hbm %s3447_s4, 1024  ;;  %p2770_p4 = pneg %p2755_p1 }
  0x26   : > { %p2321_p2 = scmp.ne.s32.totalorder %s3447_s4, %s2320_s23  ;;  %p2327_p11 = scmp.lt.u32.totalorder %s2320_s23, %s3447_s4 }
  0x27   : > { %s3448_s9 = scalar_select %p2770_p4, 1, 0 }
  0x28   : > { %p2323_p6 = pnand %p2770_p4, %p2321_p2 }
  0x2a   : > { %p2324_p10 = pneg %p2323_p6 }
  0x2c   : > { %p2329_p13 = pnand %p2327_p11, %p2324_p10 }
  0x2e   : > { %2332 = shalt.err (!%p2329_p13)
}
  0x2f   : > { %s2333_s21 = scalar_lea.vmem %s2748_s16, 1024  ;;  %p2341_p8 = scmp.lt.s32.totalorder %s2748_s16, %s2748_s16 }
  0x30   : > { %p2334_p0 = scmp.ne.s32.totalorder %s2748_s16, %s2333_s21  ;;  %p2342_p7 = scmp.lt.s32.totalorder %s2333_s21, %s2333_s21 }
  0x32   : > { %p2336_p3 = pnand %p2334_p0, %p2770_p4  ;;  %p2343_p2 = por %p2342_p7, %p2341_p8 }
  0x34   : > { %p2337_p9 = pneg %p2336_p3 }
  0x36   : > { %p2344_p6 = pnand %p2343_p2, %p2337_p9 }
  0x38   : > { %2347 = shalt.err (!%p2344_p6)
}
  0x39   : > { %s3420_s22 = smov 256   ;;  %s3422_s13 = smov 16  }
  0x3a   : > { %2142 = dma.hbm_to_vmem [thread:$0]  (!%p2755_p1), %s3447_s4, 1024, %s2748_s16, [#allocation13], %s3420_s22, %s3420_s22, %s3422_s13  }
  0x3b   : > { %s3449_s5 = sld [smem:[#allocation34_spill]] }
  0x41   : > { %s2348_s21 = scalar_lea.hbm %s3449_s5, 768 }
  0x42   : > { %p2349_p3 = scmp.ne.s32.totalorder %s3449_s5, %s2348_s21  ;;  %p2355_p9 = scmp.lt.u32.totalorder %s2348_s21, %s3449_s5 }
  0x44   : > { %p2351_p7 = pnand %p2349_p3, %p2770_p4 }
  0x46   : > { %p2352_p8 = pneg %p2351_p7 }
  0x48   : > { %p2357_p0 = pnand %p2355_p9, %p2352_p8 }
  0x4a   : > { %2360 = shalt.err (!%p2357_p0)
}
  0x4b   : > { %s2361_s16 = scalar_lea.vmem %s2759_s19, 768  ;;  %p2369_p2 = scmp.lt.s32.totalorder %s2759_s19, %s2759_s19 }
  0x4c   : > { %p2362_p10 = scmp.ne.s32.totalorder %s2759_s19, %s2361_s16  ;;  %p2370_p6 = scmp.lt.s32.totalorder %s2361_s16, %s2361_s16 }
  0x4e   : > { %p2364_p11 = pnand %p2362_p10, %p2770_p4  ;;  %p2371_p3 = por %p2370_p6, %p2369_p2 }
  0x50   : > { %p2365_p13 = pneg %p2364_p11 }
  0x52   : > { %p2372_p7 = pnand %p2371_p3, %p2365_p13 }
  0x54   : > { %2375 = shalt.err (!%p2372_p7)
}
  0x55   : > { %2145 = dma.hbm_to_vmem [thread:$0]  (!%p2755_p1), %s3449_s5, 768, %s2759_s19, [#allocation16], %s3420_s22, %s3420_s22, %s3422_s13  }
  0x56   : > { %s3450_s12 = sadd.s32 1, %s2618_s28  ;;  %p2169_p9 = scmp.lt.s32.totalorder %s2622_s29, 2 }
  0x57   : > { %p51_p8 = scmp.ge.s32.totalorder %s3450_s12, 2  ;;  %s3421_s20 = sand.u32 1, %s2610_s26  }
  0x58   : > { %s2825_s23 = sshll.u32 %s2618_s28, 7  ;;  %s3451_s8 = smov %s3450_s12 }
  0x59   : > { %s3486_s8 = smov (%p51_p8, %s3451_s8), 0  ;;  %s2833_s15 = sshll.u32 %s3421_s20, 3 }
  0x5a   : > { %3452 = sst [smem:[#allocation30_spill]] %s3486_s8  ;;  %p2837_p0 = pnand %p2169_p9, %p2724_p5 }
  0x5b   : > { %s53_s19 = ssub.s32 %s2618_s28, %s3486_s8  ;;  %s3423_s21 = sand.u32 1, %s2622_s29  }
  0x5c   : > { %s3453_s18 = scalar_select %p2837_p0, 1, 0 }
  0x5d   : > { %p56_p10 = scmp.eq.s32.totalorder %s53_s19, 0  ;;  %s3454_s16 = sadd.s32 1, %s2610_s26 }
  0x5e   : > { %s3456_s1 = sld [smem:[#allocation32_spill]]  ;;  %s338_s10 = scalar_lea.vmem [#allocation9], %s2833_s15 }
  0x5f   : > { %s2847_s7 = scalar_select %p56_p10, %s2610_s26, %s3454_s16  }
  0x60   : > { %s347_s20 = sshll.u32 %s338_s10, 4  ;;  %s2860_s13 = scalar_lea.sflag [#allocation10], %s3423_s21  ;;  %s2856_s20 = int_to_ptr.vmem [resolvable:$true] %s347_s20 }
  0x61   : > { %3455 = sst [smem:[#allocation31_spill]] %s2847_s7  ;;  %p2866_p11 = pneg %p2837_p0 }
  0x64   : > { %s2853_s22 = scalar_lea.hbm %s3456_s1, %s2825_s23  ;;  %s2381_s10 = scalar_lea.hbm %s3456_s1, 256 }
  0x65   : > { %s2376_s19 = scalar_lea.hbm %s2853_s22, 128  ;;  %p2382_p6 = scmp.lt.u32.totalorder %s2853_s22, %s3456_s1 }
  0x66   : > { %p2377_p5 = scmp.ne.s32.totalorder %s2853_s22, %s2376_s19  ;;  %p2383_p3 = scmp.lt.u32.totalorder %s2381_s10, %s2376_s19 }
  0x67   : > { %p2385_p8 = scmp.lt.u32.totalorder %s2376_s19, %s2853_s22 }
  0x68   : > { %p2379_p13 = pnand %p2866_p11, %p2377_p5  ;;  %p2384_p7 = por %p2383_p3, %p2382_p6 }
  0x6a   : > { %p2380_p2 = pneg %p2379_p13  ;;  %p2386_p9 = por %p2385_p8, %p2384_p7 }
  0x6c   : > { %p2387_p10 = pnand %p2386_p9, %p2380_p2 }
  0x6e   : > { %2390 = shalt.err (!%p2387_p10)
}
  0x6f   : > { %s2391_s21 = scalar_lea.vmem %s2856_s20, 128  ;;  %s2628_s24 = smov [#allocation9]  }
  0x70   : > { %p2392_p5 = scmp.ne.s32.totalorder %s2856_s20, %s2391_s21  ;;  %s2396_s12 = sshll.u32 %s2628_s24, 4  ;;  %s2397_s12 = int_to_ptr.vmem [resolvable:$false] %s2396_s12 }
  0x71   : > { %s2398_s4 = scalar_lea.vmem %s2397_s12, 256  ;;  %p2399_p1 = scmp.lt.s32.totalorder %s2856_s20, %s2397_s12 }
  0x72   : > { %p2394_p13 = pnand %p2392_p5, %p2866_p11  ;;  %p2400_p4 = scmp.lt.s32.totalorder %s2398_s4, %s2391_s21 }
  0x74   : > { %p2395_p12 = pneg %p2394_p13  ;;  %p2401_p6 = por %p2400_p4, %p2399_p1 }
  0x76   : > { %p2402_p3 = pnand %p2401_p6, %p2395_p12 }
  0x78   : > { %2405 = shalt.err (!%p2402_p3)
}
  0x79   : > { %s2629_s5 = smov 64   ;;  %s2630_s19 = smov 4  }
  0x7a   : > { %2155 = dma.hbm_to_vmem [thread:$0]  (!%p2837_p0), %s2853_s22, 128, %s2856_s20, %s2860_s13, %s2629_s5, %s2629_s5, %s2630_s19  }
  0x7b   : > { %s2631_s10 = smov [#allocation17]   ;;  %s2897_s4 = scalar_lea.hbm %s3404_s0, %s2825_s23 }
  0x7c   : > { %s297_s24 = sshll.u32 %s2631_s10, 4  ;;  %s2406_s28 = scalar_lea.hbm %s3410_s6, 768  ;;  %s298_s24 = int_to_ptr.vmem [resolvable:$true] %s297_s24 }
  0x7d   : > { %p2407_p12 = scmp.ne.s32.totalorder %s3410_s6, %s2406_s28  ;;  %p3458_p1 = scmp.ne.s32.totalorder %s3448_s9, 0 }
  0x7e   : > { %p2413_p7 = scmp.lt.u32.totalorder %s2406_s28, %s3410_s6 }
  0x7f   : > { %p2409_p4 = pnand %p2407_p12, %p3458_p1 }
  0x81   : > { %p2410_p2 = pneg %p2409_p4 }
  0x83   : > { %p2415_p8 = pnand %p2413_p7, %p2410_p2 }
  0x85   : > { %2418 = shalt.err (!%p2415_p8)
}
  0x86   : > { %s2419_s10 = scalar_lea.vmem %s298_s24, 768  ;;  %p2427_p13 = scmp.lt.s32.totalorder %s298_s24, %s298_s24 }
  0x87   : > { %p2420_p9 = scmp.ne.s32.totalorder %s298_s24, %s2419_s10  ;;  %p2428_p6 = scmp.lt.s32.totalorder %s2419_s10, %s2419_s10 }
  0x89   : > { %p2422_p10 = pnand %p2420_p9, %p3458_p1  ;;  %p2429_p3 = por %p2428_p6, %p2427_p13 }
  0x8b   : > { %p2423_p5 = pneg %p2422_p10 }
  0x8d   : > { %p2430_p0 = pnand %p2429_p3, %p2423_p5 }
  0x8f   : > { %2433 = shalt.err (!%p2430_p0)
}
  0x90   : > { %p3459_p12 = scmp.ne.s32.totalorder %s3446_s17, 0  ;;  %s3460_s1 = smov 16  }
  0x91   : > { %s3461_s27 = smov 256   ;;  %s315_s9 = scalar_lea.vmem [#allocation6], %s2833_s15 }
  0x92   : > { %2148 = dma.hbm_to_vmem [thread:$0]  (!%p3459_p12), %s3410_s6, 768, %s298_s24, [#allocation16], %s3461_s27, %s3461_s27, %s3460_s1  }
  0x93   : > { %s324_s7 = sshll.u32 %s315_s9, 4  ;;  %s2927_s12 = scalar_lea.hbm %s3406_s2, %s2825_s23  ;;  %s2921_s7 = int_to_ptr.vmem [resolvable:$true] %s324_s7 }
  0x94   : > { %s3462_s22 = sand.u32 1, %s2610_s26   ;;  %s2434_s10 = scalar_lea.hbm %s2897_s4, 128 }
  0x95   : > { %s2931_s20 = scalar_lea.sflag [#allocation7], %s3462_s22  ;;  %p2435_p0 = scmp.ne.s32.totalorder %s2897_s4, %s2434_s10 }
  0x96   : > { %s2439_s24 = scalar_lea.hbm %s3404_s0, 256  ;;  %p2440_p2 = scmp.lt.u32.totalorder %s2897_s4, %s3404_s0 }
  0x97   : > { %p2437_p1 = pnand %p2435_p0, %p2866_p11  ;;  %p2441_p7 = scmp.lt.u32.totalorder %s2439_s24, %s2434_s10 }
  0x98   : > { %p2443_p9 = scmp.lt.u32.totalorder %s2434_s10, %s2897_s4 }
  0x99   : > { %p2438_p4 = pneg %p2437_p1  ;;  %p2442_p8 = por %p2441_p7, %p2440_p2 }
  0x9b   : > { %p2444_p10 = por %p2443_p9, %p2442_p8 }
  0x9d   : > { %p2445_p5 = pnand %p2444_p10, %p2438_p4 }
  0x9f   : > { %2448 = shalt.err (!%p2445_p5)
}
  0xa0   : > { %s2449_s9 = scalar_lea.vmem %s2921_s7, 128  ;;  %s2632_s17 = smov [#allocation6]  }
  0xa1   : > { %p2450_p13 = scmp.ne.s32.totalorder %s2921_s7, %s2449_s9  ;;  %s2454_s21 = sshll.u32 %s2632_s17, 4  ;;  %s2455_s21 = int_to_ptr.vmem [resolvable:$false] %s2454_s21 }
  0xa2   : > { %s2456_s22 = scalar_lea.vmem %s2455_s21, 256  ;;  %p2457_p12 = scmp.lt.s32.totalorder %s2921_s7, %s2455_s21 }
  0xa3   : > { %p2452_p6 = pnand %p2450_p13, %p2866_p11  ;;  %p2458_p0 = scmp.lt.s32.totalorder %s2456_s22, %s2449_s9 }
  0xa5   : > { %p2453_p3 = pneg %p2452_p6  ;;  %p2459_p1 = por %p2458_p0, %p2457_p12 }
  0xa7   : > { %p2460_p2 = pnand %p2459_p1, %p2453_p3 }
  0xa9   : > { %2463 = shalt.err (!%p2460_p2)
}
  0xaa   : > { %p3463_p4 = scmp.ne.s32.totalorder %s3453_s18, 0  ;;  %s361_s10 = scalar_lea.vmem [#allocation11], %s2833_s15 }
  0xab   : > { %s370_s8 = sshll.u32 %s361_s10, 4  ;;  %s2965_s1 = scalar_lea.hbm %s3407_s3, %s2825_s23  ;;  %s2959_s8 = int_to_ptr.vmem [resolvable:$true] %s370_s8 }
  0xac   : > { %2152 = dma.hbm_to_vmem [thread:$0]  (!%p3463_p4), %s2897_s4, 128, %s2921_s7, %s2931_s20, %s2629_s5, %s2629_s5, %s2630_s19  }
  0xad   : > { %s2464_s27 = scalar_lea.hbm %s2927_s12, 128  ;;  %s2469_s21 = scalar_lea.hbm %s3406_s2, 256 }
  0xae   : > { %p2465_p7 = scmp.ne.s32.totalorder %s2927_s12, %s2464_s27  ;;  %p2470_p10 = scmp.lt.u32.totalorder %s2927_s12, %s3406_s2 }
  0xaf   : > { %p2471_p5 = scmp.lt.u32.totalorder %s2469_s21, %s2464_s27  ;;  %p2473_p6 = scmp.lt.u32.totalorder %s2464_s27, %s2927_s12 }
  0xb0   : > { %p2467_p8 = pnand %p2465_p7, %p2866_p11 }
  0xb1   : > { %p2472_p13 = por %p2471_p5, %p2470_p10 }
  0xb2   : > { %p2468_p9 = pneg %p2467_p8 }
  0xb3   : > { %p2474_p3 = por %p2473_p6, %p2472_p13 }
  0xb5   : > { %p2475_p12 = pnand %p2474_p3, %p2468_p9 }
  0xb7   : > { %2478 = shalt.err (!%p2475_p12)
}
  0xb8   : > { %s2479_s23 = scalar_lea.vmem %s2959_s8, 128  ;;  %s2633_s7 = smov [#allocation11]  }
  0xb9   : > { %p2480_p0 = scmp.ne.s32.totalorder %s2959_s8, %s2479_s23  ;;  %s2484_s20 = sshll.u32 %s2633_s7, 4  ;;  %s2485_s20 = int_to_ptr.vmem [resolvable:$false] %s2484_s20 }
  0xba   : > { %s2486_s10 = scalar_lea.vmem %s2485_s20, 256  ;;  %p2487_p7 = scmp.lt.s32.totalorder %s2959_s8, %s2485_s20 }
  0xbb   : > { %p2482_p1 = pnand %p2480_p0, %p2866_p11  ;;  %p2488_p8 = scmp.lt.s32.totalorder %s2486_s10, %s2479_s23 }
  0xbd   : > { %p2483_p2 = pneg %p2482_p1  ;;  %p2489_p10 = por %p2488_p8, %p2487_p7 }
  0xbf   : > { %p2490_p5 = pnand %p2489_p10, %p2483_p2 }
  0xc1   : > { %2493 = shalt.err (!%p2490_p5)
}
  0xc2   : > { %2158 = dma.hbm_to_vmem [thread:$0]  (!%p3463_p4), %s2927_s12, 128, %s2959_s8, %s2860_s13, %s2629_s5, %s2629_s5, %s2630_s19  }
  0xc3   : > { %s384_s28 = scalar_lea.vmem [#allocation12], %s2833_s15  ;;  %s3464_s27 = sand.u32 1, %s2622_s29  }
  0xc4   : > { %s394_s24 = sshll.u32 %s384_s28, 4  ;;  %s2997_s9 = scalar_lea.sflag [#allocation13], %s3464_s27  ;;  %s2993_s24 = int_to_ptr.vmem [resolvable:$true] %s394_s24 }
  0xc5   : > { %s2494_s17 = scalar_lea.hbm %s2965_s1, 128  ;;  %s2499_s4 = scalar_lea.hbm %s3407_s3, 256 }
  0xc6   : > { %p2495_p9 = scmp.ne.s32.totalorder %s2965_s1, %s2494_s17  ;;  %p2500_p3 = scmp.lt.u32.totalorder %s2965_s1, %s3407_s3 }
  0xc7   : > { %p2501_p12 = scmp.lt.u32.totalorder %s2499_s4, %s2494_s17  ;;  %p2503_p1 = scmp.lt.u32.totalorder %s2494_s17, %s2965_s1 }
  0xc8   : > { %p2497_p13 = pnand %p2495_p9, %p2866_p11 }
  0xc9   : > { %p2502_p0 = por %p2501_p12, %p2500_p3 }
  0xca   : > { %p2498_p6 = pneg %p2497_p13 }
  0xcb   : > { %p2504_p2 = por %p2503_p1, %p2502_p0 }
  0xcd   : > { %p2505_p7 = pnand %p2504_p2, %p2498_p6 }
  0xcf   : > { %2508 = shalt.err (!%p2505_p7)
}
  0xd0   : > { %s2509_s13 = scalar_lea.vmem %s2993_s24, 128  ;;  %s2634_s15 = smov [#allocation12]  }
  0xd1   : > { %p2510_p8 = scmp.ne.s32.totalorder %s2993_s24, %s2509_s13  ;;  %s2514_s12 = sshll.u32 %s2634_s15, 4  ;;  %s2515_s12 = int_to_ptr.vmem [resolvable:$false] %s2514_s12 }
  0xd2   : > { %s2516_s8 = scalar_lea.vmem %s2515_s12, 256  ;;  %p2517_p9 = scmp.lt.s32.totalorder %s2993_s24, %s2515_s12 }
  0xd3   : > { %p2512_p10 = pnand %p2510_p8, %p2866_p11  ;;  %p2518_p13 = scmp.lt.s32.totalorder %s2516_s8, %s2509_s13 }
  0xd5   : > { %p2513_p5 = pneg %p2512_p10  ;;  %p2519_p3 = por %p2518_p13, %p2517_p9 }
  0xd7   : > { %p2520_p12 = pnand %p2519_p3, %p2513_p5 }
  0xd9   : > { %2523 = shalt.err (!%p2520_p12)
}
  0xda   : > { %2161 = dma.hbm_to_vmem [thread:$0]  (!%p3463_p4), %s2965_s1, 128, %s2993_s24, %s2997_s9, %s2629_s5, %s2629_s5, %s2630_s19  }
  0xdb   : > { %p3465_p11 = scmp.ne.s32.totalorder %s3445_s14, 0 }
  0xdc   : > { %s3027_s16 = sand.u32 (!%p3465_p11), 1, %s2606_s25   ;;  %p3466_p6 = scmp.ne.s32.totalorder (!%p3465_p11), %s3440_s11, 0 }
  0xdd   : > { %406 = sbr.rel (%p3465_p11) target bundleno = 1327 (0x52f), region = 48  ;;  %s3030_s20 = sshll.u32 (!%p3465_p11), %s3027_s16, 3 }
  0xde   : > { %s409_s18 = scalar_lea.sflag (!%p3465_p11), [#allocation7], %s3027_s16  ;;  %s412_s10 = scalar_lea.vmem (!%p3465_p11), [#allocation6], %s3030_s20 }
  0xe4   : > { %2577 = dma.done.wait (%p3466_p6), %s409_s18, 128  }
  0xe5   : > { %2579 = vsyncadd (%p3466_p6), %s409_s18, 4294967168  ;;  %s417_s14 = sand.u32 1, %s2713_s30   ;;  %s421_s19 = scalar_lea.vmem [#allocation9], %s3030_s20 }
  0xe6   : > { %s418_s5 = scalar_lea.sflag [#allocation10], %s417_s14 }
  0xe7   : > { %2581 = dma.done.wait (%p3466_p6), %s418_s5, 256  }
  0xe8   : > { %2583 = vsyncadd (%p3466_p6), %s418_s5, 4294967040  ;;  %s430_s1 = scalar_lea.vmem [#allocation11], %s3030_s20  ;;  %s436_s28 = scalar_lea.sflag [#allocation13], %s417_s14 }
  0xe9   : > { %s439_s24 = scalar_lea.vmem [#allocation12], %s3030_s20 }
  0xea   : > { %2585 = dma.done.wait (%p3466_p6), %s436_s28, 128  }
  0xeb   : > { %2587 = vsyncadd (%p3466_p6), %s436_s28, 4294967168  ;;  %p3467_p4 = scmp.eq.s32.totalorder %s2713_s30, 0 }
  0xed   : > { %2589 = dma.done.wait (%p3467_p4), [#allocation13], 1024   ;;  %p3468_p0 = pmov %p3467_p4 }
  0xef   : > { %2591 = vsyncadd (%p3468_p0), [#allocation13], 4294966272  ;;  %p3469_p1 = pmov %p3468_p0 }
  0xf0   : > { %p3470_p2 = pmov %p3468_p0 }
  0xf1   : > { %2593 = dma.done.wait (%p3469_p1), [#allocation16], 1536  }
  0xf2   : > { %2595 = vsyncadd (%p3470_p2), [#allocation16], 4294965760  ;;  %v2635_v0 = vmov 0   ;;  %v2237_v1 = vld [vmem:[#allocation14 + $0x4] ss:$16 sps:$4 sm:$0xff]   ;;  %vm562_vm0 = vcmask 261120  }
  0xf3   : > { %598 = vmatprep.mubr.bf16.mxu0 %v2635_v0  ;;  %641 = vmatprep.mubr.bf16.mxu1 %v2635_v0  ;;  %v2239_v2 = vld [vmem:[#allocation14] ss:$16 sps:$4 sm:$0xff]   ;;  %v2240_v3 = vld [vmem:[#allocation14 + $0x24] ss:$16 sps:$4 sm:$0xff]   ;;  %v2248_v8 = vld [vmem:[#allocation14 + $0xc] ss:$16 sps:$4 sm:$0xff]  }
  0xf4   : > { %2235 = vset.pattern.permute.xlu1 %v2635_v0  ;;  %2236 = vset.pattern.permute.xlu0 %v2635_v0  ;;  %v2242_v4 = vld [vmem:[#allocation14 + $0x20] ss:$16 sps:$4 sm:$0xff]   ;;  %v2246_v6 = vld [vmem:[#allocation15 + $0x4] ss:$16 sps:$4 sm:$0xff]   ;;  %v2251_v9 = vld [vmem:[#allocation14 + $0x8] ss:$16 sps:$4 sm:$0xff]  }
  0xf5   : > { %566 = vmatprep.subr.bf16.mxu0 %v2237_v1  ;;  %v2243_v5 = vld [vmem:[%s412_s10] sm:$0xff]   ;;  %609 = vmatprep.subr.bf16.mxu1 %v2248_v8  ;;  %vm732_vm1 = vcmask 1043456   ;;  %v2252_v20 = vld [vmem:[%s421_s19] sm:$0xff]   ;;  %vm728_vm2 = vcmask 195584   ;;  %vm882_vm3 = vcmask 1041408   ;;  %vm878_vm4 = vcmask 162816  }
  0xf6   : > { %567 = vmatpush1.bf16.msra.mxu0 %v2239_v2  ;;  %v691_v7 = vld [vmem:[#allocation15 + $0x20] sm:$0xff]  ;;  %v2253_v13 = vld [vmem:[#allocation14 + $0x2c] ss:$16 sps:$4 sm:$0xff]   ;;  %610 = vmatpush1.bf16.msra.mxu1 %v2251_v9  ;;  %v2255_v14 = vld [vmem:[#allocation14 + $0x28] ss:$16 sps:$4 sm:$0xff]   ;;  %v2636_v30 = vmov 0.0  }
  0xf7   : > { %568 = vmatprep.subr.bf16.mxu0 %v2240_v3  ;;  %v2244_v10 = vld [vmem:[#allocation15] ss:$16 sps:$4 sm:$0xff]   ;;  %v2015_v11 = vcombine.high %v691_v7, %v691_v7  ;;  %v2014_v12 = vcombine.low %v691_v7, %v691_v7  ;;  %611 = vmatprep.subr.bf16.mxu1 %v2253_v13  ;;  %v2258_v15 = vld [vmem:[#allocation15 + $0xc] ss:$16 sps:$4 sm:$0xff]   ;;  %v2263_v17 = vld [vmem:[#allocation17 + $0x4] ss:$16 sps:$4 sm:$0xff]  }
  0xf8   : > { %v692_v16 = vld [vmem:[#allocation15 + $0x28] sm:$0xff]  ;;  %v2261_v23 = vld [vmem:[#allocation17] ss:$16 sps:$4 sm:$0xff]   ;;  %vm2637_vm5 = vmmov 0   ;;  %v842_v33 = vld [vmem:[#allocation17 + $0x28] sm:$0x33] }
  0xf9   : > { %v734_v18 = vsel %vm732_vm1, %v2014_v12, 0  ;;  %v2256_v19 = vld [vmem:[#allocation15 + $0x8] ss:$16 sps:$4 sm:$0xff]   ;;  %v2017_v21 = vcombine.high %v692_v16, %v692_v16  ;;  %v2016_v22 = vcombine.low %v692_v16, %v692_v16  ;;  %v841_v25 = vld [vmem:[#allocation17 + $0x20] sm:$0x33]  ;;  %v2030_v34 = vcombine.high %v842_v33, %v842_v33  ;;  %s1997_s30 = sshll.u32 %s3027_s16, 6 }
  0xfa   : > { %569 = vmatpush1.bf16.msra.mxu0 %v2242_v4  ;;  %612 = vmatpush1.bf16.msra.mxu1 %v2255_v14  ;;  %v2028_v26 = vcombine.high %v841_v25, %v841_v25  ;;  %v2027_v27 = vcombine.low %v841_v25, %v841_v25  ;;  %v2266_v29 = vld [vmem:[%s430_s1] sm:$0xff]   ;;  %v2029_v35 = vcombine.low %v842_v33, %v842_v33  ;;  %vm660_vm6 = vcmask 7168   ;;  %s3337_s11 = scalar_lea.vmem [#allocation18], %s1997_s30  ;;  %s3471_s27 = sld [smem:[#allocation26_spill]] }
  0xfb   : > { %745 = vmatprep.subr.bf16.mxu0 %v2246_v6  ;;  %788 = vmatprep.subr.bf16.mxu1 %v2258_v15  ;;  %v740_v24 = vsel %vm732_vm1, %v2016_v22, 0  ;;  %v2267_v31 = vld [vmem:[#allocation17 + $0x8] ss:$16 sps:$4 sm:$0xff]   ;;  %v2269_v32 = vld [vmem:[#allocation17 + $0xc] ss:$16 sps:$4 sm:$0xff]   ;;  %v2638_v4 = vmov -inf  }
  0xfc   : > { %v884_v28 = vsel %vm882_vm3, %v2027_v27, 0  ;;  %v890_v36 = vsel %vm882_vm3, %v2029_v35, 0  ;;  %661 = vst.msk [vmem:[#allocation3] sm:$0xff] %vm660_vm6, %v2638_v4  ;;  %662 = vst.msk [vmem:[#allocation3 + $0x8] sm:$0xff] %vm660_vm6, %v2638_v4  ;;  %vm1033_vm7 = vcmask 130048   ;;  %s1776_s9 = sshll.u32 %s3337_s11, 4  ;;  %s3348_s9 = int_to_ptr.vmem [resolvable:$true] %s1776_s9 }
  0xfd   : > { %2007 = vmatmul.mubr.msk.bf16.vlgmr.msra.gmra.mrb[0].mxu0 %vm562_vm0, %v2243_v5  ;;  %2008 = vmatmul.mubr.msk.bf16.vlgmr.msra.gmra.mrb[0].mxu1 %vm562_vm0, %v2243_v5  ;;  %663 = vst.msk [vmem:[#allocation3 + $0x10] sm:$0xff] %vm660_vm6, %v2638_v4  ;;  %664 = vst.msk [vmem:[#allocation3 + $0x18] sm:$0xff] %vm660_vm6, %v2638_v4  ;;  %v2050_v5 = vld [vmem:[%s439_s24] sm:$0xff]   ;;  %s3472_s17 = sld [smem:[#allocation28_spill]]  ;;  %s3473_s23 = sld [smem:[#allocation35_spill]] }
  0xfe   : > { %746 = vmatpush1.bf16.msra.mxu0 %v2244_v10  ;;  %777 = vmatprep.mubr.bf16.mxu0 %v2635_v0  ;;  %665 = vst.msk [vmem:[#allocation3 + $0x20] sm:$0xff] %vm660_vm6, %v2638_v4  ;;  %666 = vst.msk [vmem:[#allocation3 + $0x28] sm:$0xff] %vm660_vm6, %v2638_v4  ;;  %v2051_v6 = vunpack.c.l.bf16 %v2050_v5  ;;  %v2052_v7 = vunpack.c.h.bf16 %v2050_v5  ;;  %s1760_s13 = scalar_lea.sflag [#allocation8], %s3027_s16  ;;  %s2524_s15 = scalar_lea.vmem %s3348_s9, 1024 }
  0xff   : > { %2018 = vmatprep.subr.msk.bf16.mxu0 %vm732_vm1, %v2015_v11  ;;  %789 = vmatpush1.bf16.msra.mxu1 %v2256_v19  ;;  %667 = vst.msk [vmem:[#allocation3 + $0x30] sm:$0xff] %vm660_vm6, %v2638_v4  ;;  %668 = vst.msk [vmem:[#allocation3 + $0x38] sm:$0xff] %vm660_vm6, %v2638_v4  ;;  %p2525_p7 = scmp.ne.s32.totalorder %s3348_s9, %s2524_s15  ;;  %s2639_s12 = smov [#allocation18]  }
 0x100   : > { %820 = vmatprep.mubr.bf16.mxu1 %v2635_v0  ;;  %2020 = vmatprep.subr.msk.bf16.mxu1 %vm732_vm1, %v2017_v21  ;;  %669 = vst.msk [vmem:[#allocation4] sm:$0xff] %vm660_vm6, %v2636_v30  ;;  %670 = vst.msk [vmem:[#allocation4 + $0x8] sm:$0xff] %vm660_vm6, %v2636_v30  ;;  %s2048_s21 = sshll.u32 %s3471_s27, 10  ;;  %s2528_s8 = sshll.u32 %s2639_s12, 4  ;;  %s2529_s8 = int_to_ptr.vmem [resolvable:$false] %s2528_s8 }
 0x101   : > { %671 = vst.msk [vmem:[#allocation4 + $0x10] sm:$0xff] %vm660_vm6, %v2636_v30  ;;  %672 = vst.msk [vmem:[#allocation4 + $0x18] sm:$0xff] %vm660_vm6, %v2636_v30  ;;  %s2530_s20 = scalar_lea.vmem %s2529_s8, 2048  ;;  %p2531_p9 = scmp.lt.s32.totalorder %s3348_s9, %s2529_s8 }
 0x102   : > { %748 = vmatpush1.bf16.msra.mxu0 %v734_v18  ;;  %673 = vst.msk [vmem:[#allocation4 + $0x20] sm:$0xff] %vm660_vm6, %v2636_v30  ;;  %674 = vst.msk [vmem:[#allocation4 + $0x28] sm:$0xff] %vm660_vm6, %v2636_v30  ;;  %p2532_p13 = scmp.lt.s32.totalorder %s2530_s20, %s2524_s15 }
 0x103   : > { %895 = vmatprep.subr.bf16.mxu0 %v2263_v17  ;;  %791 = vmatpush1.bf16.msra.mxu1 %v740_v24  ;;  %675 = vst.msk [vmem:[#allocation4 + $0x30] sm:$0xff] %vm660_vm6, %v2636_v30  ;;  %676 = vst.msk [vmem:[#allocation4 + $0x38] sm:$0xff] %vm660_vm6, %v2636_v30  ;;  %s3354_s7 = scalar_lea.hbm %s3473_s23, %s2048_s21  ;;  %p3474_p8 = scmp.ne.s32.totalorder %s3472_s17, 0 }
 0x104   : > { %938 = vmatprep.subr.bf16.mxu1 %v2269_v32  ;;  %p2533_p3 = por %p2532_p13, %p2531_p9 }
 0x105   : > { %2019 = vmatmul.mubr.msk.bf16.vlgmr.msra.gmra.mrb[4].mxu0 %vm728_vm2, %v2252_v20  ;;  %p2526_p10 = pnand %p2525_p7, %p3474_p8 }
 0x106   : > { %896 = vmatpush1.bf16.msra.mxu0 %v2261_v23  ;;  %927 = vmatprep.mubr.bf16.mxu0 %v2635_v0  ;;  %v3217_v4 = vld [vmem:[#allocation3 + $0x30] sm:$0xff] }
 0x107   : > { %2021 = vmatmul.mubr.msk.bf16.vlgmr.msra.gmra.mrb[4].mxu1 %vm728_vm2, %v2252_v20  ;;  %2031 = vmatprep.subr.msk.bf16.mxu0 %vm882_vm3, %v2028_v26  ;;  %p2527_p5 = pneg %p2526_p10 }
 0x108   : > { %970 = vmatprep.mubr.bf16.mxu1 %v2635_v0  ;;  %939 = vmatpush1.bf16.msra.mxu1 %v2267_v31 }
 0x109   : > { %2033 = vmatprep.subr.msk.bf16.mxu1 %vm882_vm3, %v2030_v34  ;;  %p2534_p12 = pnand %p2533_p3, %p2527_p5 }
 0x10a   : > { %898 = vmatpush1.bf16.msra.mxu0 %v884_v28 }
 0x10b   : > { %2069 = vmatprep.subr.bf16.mxu0 %v2636_v30 }
 0x10c   : > { %941 = vmatpush1.bf16.msra.mxu1 %v890_v36 }
 0x10d   : > { %2032 = vmatmul.mubr.msk.bf16.vlgmr.msra.gmra.mrb[8].mxu0 %vm878_vm4, %v2266_v29  ;;  %2075 = vmatprep.subr.bf16.mxu1 %v2636_v30 }
 0x10e   : > { %2071 = vmatprep.mubr.msk.bf16.mxu0 %vm2637_vm5, %v2636_v30 }
 0x10f   : > { %2034 = vmatmul.mubr.msk.bf16.vlgmr.msra.gmra.mrb[8].mxu1 %vm878_vm4, %v2266_v29 }
 0x110   : > { %2077 = vmatprep.mubr.msk.bf16.mxu1 %vm2637_vm5, %v2636_v30 }
 0x1d0   : > { %v600_v37 = vpop.f32.mrb[0].mxu0  ;;  %v643_v43 = vpop.f32.mrb[0].mxu1 }
 0x1d1   : > { %v602_v38 = vpop.f32.mrb[1].mxu0  ;;  %v645_v44 = vpop.f32.mrb[1].mxu1 }
 0x1d2   : > { %v604_v39 = vpop.f32.mrb[2].mxu0  ;;  %v647_v46 = vpop.f32.mrb[2].mxu1 }
 0x1d3   : > { %v652_v40 = vpack.c.bf16 %v604_v39, %v600_v37  ;;  %v606_v41 = vpop.f32.mrb[3].mxu0  ;;  %v654_v48 = vpack.c.bf16 %v647_v46, %v643_v43  ;;  %v649_v49 = vpop.f32.mrb[3].mxu1 }
 0x1d4   : > { %v653_v42 = vpack.c.bf16 %v606_v41, %v602_v38  ;;  %v655_v51 = vpack.c.bf16 %v649_v49, %v645_v44  ;;  %v3162_v41 = vld [vmem:[#allocation3] sm:$0xff]  ;;  %v3167_v44 = vld [vmem:[#allocation3 + $0x8] sm:$0xff] }
 0x1d8   : > { %v779_v45 = vpop.f32.mrb[4].mxu0 }
 0x1d9   : > { %v781_v47 = vpop.f32.mrb[5].mxu0 }
 0x1da   : > { %v783_v50 = vpop.f32.mrb[6].mxu0  ;;  %v822_v55 = vpop.f32.mrb[4].mxu1 }
 0x1db   : > { %v831_v52 = vpack.c.bf16 %v783_v50, %v779_v45  ;;  %v785_v53 = vpop.f32.mrb[7].mxu0  ;;  %v824_v56 = vpop.f32.mrb[5].mxu1 }
 0x1dc   : > { %v832_v54 = vpack.c.bf16 %v785_v53, %v781_v47  ;;  %v826_v57 = vpop.f32.mrb[6].mxu1 }
 0x1dd   : > { %2070 = vmatpush3.bf16.xpose.msra.mxu0 %v831_v52  ;;  %v833_v58 = vpack.c.bf16 %v826_v57, %v822_v55  ;;  %v828_v59 = vpop.f32.mrb[7].mxu1  ;;  %v3201_v57 = vld [vmem:[#allocation3 + $0x20] sm:$0xff] }
 0x1de   : > { %2081 = vmatprep.subr.bf16.mxu0 %v2636_v30  ;;  %v834_v60 = vpack.c.bf16 %v828_v59, %v824_v56 }
 0x1e0   : > { %v929_v61 = vpop.f32.mrb[8].mxu0 }
 0x1e1   : > { %v3097_v62 = vpop.f32.mrb[9].mxu0 }
 0x1e2   : > { %v933_v63 = vpop.f32.mrb[10].mxu0 }
 0x1e3   : > { %v981_v1 = vpack.c.bf16 %v933_v63, %v929_v61  ;;  %v3099_v2 = vpop.f32.mrb[11].mxu0 }
 0x1e4   : > { %2072 = vmatmul.mubr.bf16.vlgmr.msra.gmra.mrb[12].mxu0 %v652_v40  ;;  %v982_v3 = vpack.c.bf16 %v3099_v2, %v3097_v62 }
 0x1e5   : > { %2082 = vmatpush3.bf16.xpose.msra.mxu0 %v832_v54  ;;  %2083 = vmatprep.mubr.msk.bf16.mxu0 %vm2637_vm5, %v2636_v30 }
 0x1e6   : > { %2093 = vmatprep.subr.bf16.mxu0 %v2636_v30  ;;  %2076 = vmatpush3.bf16.msra.mxu1 %v981_v1 }
 0x1e7   : > { %2087 = vmatprep.subr.bf16.mxu1 %v2636_v30 }
 0x1ec   : > { %2084 = vmatmul.mubr.bf16.vlgmr.msra.gmra.mrb[16].mxu0 %v653_v42 }
 0x1ed   : > { %2094 = vmatpush3.bf16.xpose.msra.mxu0 %v833_v58  ;;  %2095 = vmatprep.mubr.msk.bf16.mxu0 %vm2637_vm5, %v2636_v30 }
 0x1ee   : > { %2105 = vmatprep.subr.bf16.mxu0 %v2636_v30 }
 0x1f4   : > { %2096 = vmatmul.mubr.bf16.vlgmr.msra.gmra.mrb[20].mxu0 %v654_v48  ;;  %v3177_v48 = vld [vmem:[#allocation3 + $0x10] sm:$0xff] }
 0x1f5   : > { %2106 = vmatpush3.bf16.xpose.msra.mxu0 %v834_v60  ;;  %2107 = vmatprep.mubr.msk.bf16.mxu0 %vm2637_vm5, %v2636_v30  ;;  %v3207_v60 = vld [vmem:[#allocation3 + $0x28] sm:$0xff] }
 0x1fc   : > { %2108 = vmatmul.mubr.bf16.vlgmr.msra.gmra.mrb[24].mxu0 %v655_v51  ;;  %v3184_v51 = vld [vmem:[#allocation3 + $0x18] sm:$0xff] }
 0x2b7   : > { %v1024_v8 = vpop.f32.mrb[12].mxu0 }
 0x2b8   : > { %v3130_v9 = vadd.f32 %v2051_v6, %v1024_v8  ;;  %v2073_v10 = vpop.f32.mrb[13].mxu0  ;;  %v3227_v8 = vld [vmem:[#allocation3 + $0x38] sm:$0xff] }
 0x2b9   : > { %v1027_v11 = vpop.f32.mrb[14].mxu0 }
 0x2ba   : > { %v3132_v12 = vadd.f32 %v2052_v7, %v1027_v11  ;;  %v2074_v13 = vpop.f32.mrb[15].mxu0  ;;  %v1034_v14 = vsel %vm1033_vm7, %v3130_v9, -inf }
 0x2bb   : > { %1035 = vmax.xlane.f32.xlu0 %v1034_v14 }
 0x2bc   : > { %v1037_v15 = vsel %vm1033_vm7, %v3132_v12, -inf }
 0x2bf   : > { %1038 = vmax.xlane.f32.xlu0 %v1037_v15  ;;  %v1179_v16 = vpop.f32.mrb[16].mxu0  ;;  %v972_v15 = vpop.f32.mrb[8].mxu1 }
 0x2c0   : > { %v3138_v17 = vadd.f32 %v2051_v6, %v1179_v16  ;;  %v2085_v18 = vpop.f32.mrb[17].mxu0  ;;  %v3242_v16 = vpop.f32.mrb[9].mxu1 }
 0x2c1   : > { %v1182_v19 = vpop.f32.mrb[18].mxu0  ;;  %v976_v18 = vpop.f32.mrb[10].mxu1 }
 0x2c2   : > { %v3140_v20 = vadd.f32 %v2052_v7, %v1182_v19  ;;  %v2086_v21 = vpop.f32.mrb[19].mxu0  ;;  %v1189_v22 = vsel %vm1033_vm7, %v3138_v17, -inf  ;;  %v983_v19 = vpack.c.bf16 %v976_v18, %v972_v15 }
 0x2c3   : > { %1190 = vmax.xlane.f32.xlu1 %v1189_v22  ;;  %v3244_v21 = vpop.f32.mrb[11].mxu1 }
 0x2c4   : > { %v1192_v23 = vsel %vm1033_vm7, %v3140_v20, -inf  ;;  %v984_v22 = vpack.c.bf16 %v3244_v21, %v3242_v16 }
 0x2c5   : > { %1193 = vmax.xlane.f32.xlu0 %v1192_v23 }
 0x2c7   : > { %v1335_v24 = vpop.f32.mrb[20].mxu0 }
 0x2c8   : > { %v3146_v25 = vadd.f32 %v2051_v6, %v1335_v24  ;;  %v2097_v26 = vpop.f32.mrb[21].mxu0 }
 0x2c9   : > { %v1338_v27 = vpop.f32.mrb[22].mxu0 }
 0x2ca   : > { %v3148_v28 = vadd.f32 %v2052_v7, %v1338_v27  ;;  %v2098_v29 = vpop.f32.mrb[23].mxu0  ;;  %v1345_v31 = vsel %vm1033_vm7, %v3146_v25, -inf }
 0x2cb   : > { %1346 = vmax.xlane.f32.xlu0 %v1345_v31 }
 0x2cc   : > { %v1348_v32 = vsel %vm1033_vm7, %v3148_v28, -inf }
 0x2cf   : > { %1349 = vmax.xlane.f32.xlu0 %v1348_v32  ;;  %v1491_v33 = vpop.f32.mrb[24].mxu0 }
 0x2d0   : > { %v3154_v34 = vadd.f32 %v2051_v6, %v1491_v33  ;;  %v2109_v35 = vpop.f32.mrb[25].mxu0 }
 0x2d1   : > { %v1494_v36 = vpop.f32.mrb[26].mxu0 }
 0x2d2   : > { %v3156_v37 = vadd.f32 %v2052_v7, %v1494_v36  ;;  %v2110_v38 = vpop.f32.mrb[27].mxu0  ;;  %v1501_v39 = vsel %vm1033_vm7, %v3154_v34, -inf }
 0x2d3   : > { %1502 = vmax.xlane.f32.xlu0 %v1501_v39 }
 0x2d4   : > { %v1504_v40 = vsel %vm1033_vm7, %v3156_v37, -inf }
 0x2d7   : > { %1505 = vmax.xlane.f32.xlu0 %v1504_v40 }
 0x348   : > { %v1036_v42 = vpop.xlane.xlu0 %1035 }
 0x349   : > { %v3165_v43 = vmax.f32 %v3162_v41, %v1036_v42 }
 0x34b   : > { %v1042_v45 = vsub.f32 %v3162_v41, %v3165_v43  ;;  %1142 = vst.msk [vmem:[#allocation3] sm:$0xff] %vm660_vm6, %v3165_v43  ;;  %1050 = vperm.xlu1 %2235, %v3165_v43  }
 0x34c   : > { %v1039_v46 = vpop.xlane.xlu0 %1038 }
 0x34d   : > { %v3175_v47 = vmax.f32 %v3167_v44, %v1039_v46 }
 0x34f   : > { %v1043_v49 = vsub.f32 %v3167_v44, %v3175_v47  ;;  %1143 = vst.msk [vmem:[#allocation3 + $0x8] sm:$0xff] %vm660_vm6, %v3175_v47  ;;  %1055 = vperm.xlu0 %2236, %v3175_v47  }
 0x350   : > { %v1191_v50 = vpop.xlane.xlu1 %1190 }
 0x351   : > { %v3187_v52 = vmax.f32 %v3177_v48, %v1191_v50 }
 0x352   : > { %v1194_v53 = vpop.xlane.xlu0 %1193 }
 0x353   : > { %v1197_v54 = vsub.f32 %v3177_v48, %v3187_v52  ;;  %1298 = vst.msk [vmem:[#allocation3 + $0x10] sm:$0xff] %vm660_vm6, %v3187_v52  ;;  %v3194_v55 = vmax.f32 %v3184_v51, %v1194_v53  ;;  %1205 = vperm.xlu1 %2235, %v3187_v52   ;;  %v1046_v52 = vmul.f32 1.442695, %v1043_v49 }
 0x355   : > { %v1198_v56 = vsub.f32 %v3184_v51, %v3194_v55  ;;  %1299 = vst.msk [vmem:[#allocation3 + $0x18] sm:$0xff] %vm660_vm6, %v3194_v55 }
 0x356   : > { %v1634_v49 = vld [vmem:[#allocation3 + $0x8] sm:$0xff] }
 0x357   : > { %1210 = vperm.xlu1 %2235, %v3194_v55   ;;  %v1201_v41 = vmul.f32 1.442695, %v1198_v56  ;;  %vm1636_vm8 = vcmp.gt.f32.partialorder %v1634_v49, -1e+29 }
 0x358   : > { %v1347_v58 = vpop.xlane.xlu0 %1346 }
 0x359   : > { %v3205_v59 = vmax.f32 %v3201_v57, %v1347_v58 }
 0x35b   : > { %v1353_v61 = vsub.f32 %v3201_v57, %v3205_v59  ;;  %1454 = vst.msk [vmem:[#allocation3 + $0x20] sm:$0xff] %vm660_vm6, %v3205_v59  ;;  %1361 = vperm.xlu1 %2235, %v3205_v59  }
 0x35c   : > { %v1350_v63 = vpop.xlane.xlu0 %1349  ;;  %v1670_v56 = vld [vmem:[#allocation3 + $0x18] sm:$0xff] }
 0x35d   : > { %v3215_v1 = vmax.f32 %v3207_v60, %v1350_v63  ;;  %vm1672_vm9 = vcmp.gt.f32.partialorder %v1670_v56, -1e+29 }
 0x35f   : > { %v1354_v5 = vsub.f32 %v3207_v60, %v3215_v1  ;;  %1455 = vst.msk [vmem:[#allocation3 + $0x28] sm:$0xff] %vm660_vm6, %v3215_v1  ;;  %1366 = vperm.xlu1 %2235, %v3215_v1   ;;  %v1638_v60 = vsel %vm1636_vm8, 1, %v2635_v0 }
 0x360   : > { %v1503_v6 = vpop.xlane.xlu0 %1502 }
 0x361   : > { %v3225_v7 = vmax.f32 %v3217_v4, %v1503_v6  ;;  %v1357_v44 = vmul.f32 1.442695, %v1354_v5  ;;  %v1674_v5 = vsel %vm1672_vm9, 1, %v2635_v0 }
 0x363   : > { %v1509_v10 = vsub.f32 %v3217_v4, %v3225_v7  ;;  %1610 = vst.msk [vmem:[#allocation3 + $0x30] sm:$0xff] %vm660_vm6, %v3225_v7  ;;  %1517 = vperm.xlu0 %2236, %v3225_v7   ;;  %v1669_v7 = vld [vmem:[#allocation3 + $0x10] sm:$0xff] }
 0x364   : > { %v1506_v11 = vpop.xlane.xlu0 %1505  ;;  %vm1671_vm12 = vcmp.gt.f32.partialorder %v1669_v7, -1e+29 }
 0x365   : > { %v3235_v13 = vmax.f32 %v3227_v8, %v1506_v11  ;;  %v1511_v48 = vmul.f32 1.442695, %v1509_v10 }
 0x366   : > { %v1706_v1 = vld [vmem:[#allocation3 + $0x28] sm:$0xff] }
 0x367   : > { %v1510_v14 = vsub.f32 %v3227_v8, %v3235_v13  ;;  %1611 = vst.msk [vmem:[#allocation3 + $0x38] sm:$0xff] %vm660_vm6, %v3235_v13  ;;  %1522 = vperm.xlu1 %2235, %v3235_v13   ;;  %vm1708_vm11 = vcmp.gt.f32.partialorder %v1706_v1, -1e+29  ;;  %v1705_v13 = vld [vmem:[#allocation3 + $0x20] sm:$0xff] }
 0x368   : > { %v1710_v10 = vsel %vm1708_vm11, 1, %v2635_v0  ;;  %vm1707_vm13 = vcmp.gt.f32.partialorder %v1705_v13, -1e+29 }
 0x369   : > { %v1709_v21 = vsel %vm1707_vm13, 1, %v2635_v0 }
 0x3ca   : > { %v1051_v23 = vpop.permute.xlu1 %1050 }
 0x3cb   : > { %v1058_v24 = vsub.f32 %v3130_v9, %v1051_v23 }
 0x3cd   : > { %v1060_v26 = vmul.f32 1.442695, %v1058_v24 }
 0x3ce   : > { %v1056_v27 = vpop.permute.xlu0 %1055 }
 0x3cf   : > { %2272 = vpow2.f32 %v1060_v26  ;;  %v1059_v29 = vsub.f32 %v3132_v12, %v1056_v27 }
 0x3d1   : > { %v1062_v31 = vmul.f32 1.442695, %v1059_v29 }
 0x3d2   : > { %v1206_v32 = vpop.permute.xlu1 %1205 }
 0x3d3   : > { %2274 = vpow2.f32 %v1062_v31  ;;  %v1213_v33 = vsub.f32 %v3138_v17, %v1206_v32 }
 0x3d5   : > { %v1215_v35 = vmul.f32 1.442695, %v1213_v33 }
 0x3d6   : > { %v1211_v36 = vpop.permute.xlu1 %1210 }
 0x3d7   : > { %2276 = vpow2.f32 %v1215_v35  ;;  %v1214_v38 = vsub.f32 %v3140_v20, %v1211_v36  ;;  %v1355_v35 = vmul.f32 1.442695, %v1353_v61  ;;  %v1633_v61 = vld [vmem:[#allocation3] sm:$0xff] }
 0x3d8   : > { %vm1635_vm10 = vcmp.gt.f32.partialorder %v1633_v61, -1e+29 }
 0x3d9   : > { %v2273_v39 = vpop.eup %2272  ;;  %v1217_v40 = vmul.f32 1.442695, %v1214_v38  ;;  %v1637_v8 = vsel %vm1635_vm10, 1, %v2635_v0 }
 0x3da   : > { %v1362_v42 = vpop.permute.xlu1 %1361  ;;  %v1068_v9 = vsel %vm1033_vm7, %v2273_v39, 0.0 }
 0x3db   : > { %2278 = vpow2.f32 %v1217_v40  ;;  %v1369_v46 = vsub.f32 %v3146_v25, %v1362_v42  ;;  %1069 = vadd.xlane.f32.xlu1 %v1068_v9  ;;  %v1065_v40 = vld [vmem:[#allocation4 + $0x8] sm:$0xff] }
 0x3dd   : > { %v2275_v12 = vpop.eup %2274  ;;  %v1371_v50 = vmul.f32 1.442695, %v1369_v46 }
 0x3de   : > { %v1367_v53 = vpop.permute.xlu1 %1366  ;;  %v1071_v58 = vsel %vm1033_vm7, %v2275_v12, 0.0  ;;  %v1093_v17 = vpack.c.bf16 %v2275_v12, %v2273_v39  ;;  %v1220_v12 = vld [vmem:[#allocation4 + $0x10] sm:$0xff] }
 0x3df   : > { %2280 = vpow2.f32 %v1371_v50  ;;  %v1370_v63 = vsub.f32 %v3148_v28, %v1367_v53  ;;  %1072 = vadd.xlane.f32.xlu0 %v1071_v58 }
 0x3e0   : > { %2078 = vmatmul.mubr.msk.bf16.vlgmr.msra.gmra.mrb[12].mxu1 %vm1033_vm7, %v1093_v17  ;;  %v1221_v17 = vld [vmem:[#allocation4 + $0x18] sm:$0xff] }
 0x3e1   : > { %v2277_v20 = vpop.eup %2276  ;;  %v1373_v6 = vmul.f32 1.442695, %v1370_v63  ;;  %2088 = vmatpush3.bf16.msra.mxu1 %v982_v3  ;;  %2089 = vmatprep.mubr.msk.bf16.mxu1 %vm2637_vm5, %v2636_v30 }
 0x3e2   : > { %v1518_v25 = vpop.permute.xlu0 %1517  ;;  %v1224_v11 = vsel %vm1033_vm7, %v2277_v20, 0.0  ;;  %2099 = vmatprep.subr.bf16.mxu1 %v2636_v30 }
 0x3e3   : > { %2282 = vpow2.f32 %v1373_v6  ;;  %v1525_v28 = vsub.f32 %v3154_v34, %v1518_v25  ;;  %1225 = vadd.xlane.f32.xlu1 %v1224_v11  ;;  %v1376_v11 = vld [vmem:[#allocation4 + $0x20] sm:$0xff] }
 0x3e5   : > { %v2279_v15 = vpop.eup %2278  ;;  %v1527_v18 = vmul.f32 1.442695, %v1525_v28 }
 0x3e6   : > { %v1523_v23 = vpop.permute.xlu1 %1522  ;;  %v1227_v24 = vsel %vm1033_vm7, %v2279_v15, 0.0  ;;  %v1249_v26 = vpack.c.bf16 %v2279_v15, %v2277_v20 }
 0x3e7   : > { %2284 = vpow2.f32 %v1527_v18  ;;  %v1526_v62 = vsub.f32 %v3156_v37, %v1523_v23  ;;  %1228 = vadd.xlane.f32.xlu0 %v1227_v24  ;;  %v1377_v24 = vld [vmem:[#allocation4 + $0x28] sm:$0xff] }
 0x3e8   : > { %2090 = vmatmul.mubr.msk.bf16.vlgmr.msra.gmra.mrb[16].mxu1 %vm1033_vm7, %v1249_v26 }
 0x3e9   : > { %v2281_v2 = vpop.eup %2280  ;;  %v1529_v3 = vmul.f32 1.442695, %v1526_v62  ;;  %2100 = vmatpush3.bf16.msra.mxu1 %v983_v19  ;;  %2101 = vmatprep.mubr.msk.bf16.mxu1 %vm2637_vm5, %v2636_v30  ;;  %v1199_v19 = vmul.f32 1.442695, %v1197_v54  ;;  %v1513_v54 = vmul.f32 1.442695, %v1510_v14 }
 0x3ea   : > { %v1380_v34 = vsel %vm1033_vm7, %v2281_v2, 0.0  ;;  %2111 = vmatprep.subr.bf16.mxu1 %v2636_v30  ;;  %v1673_v14 = vsel %vm1671_vm12, 1, %v2635_v0 }
 0x3eb   : > { %2286 = vpow2.f32 %v1529_v3  ;;  %1381 = vadd.xlane.f32.xlu0 %v1380_v34  ;;  %v1532_v34 = vld [vmem:[#allocation4 + $0x30] sm:$0xff] }
 0x3ec   : > { %2288 = vpow2.f32 %v1199_v19 }
 0x3ed   : > { %v2283_v27 = vpop.eup %2282  ;;  %2290 = vpow2.f32 %v1355_v35 }
 0x3ee   : > { %v1383_v29 = vsel %vm1033_vm7, %v2283_v27, 0.0  ;;  %v1405_v31 = vpack.c.bf16 %v2283_v27, %v2281_v2 }
 0x3ef   : > { %1384 = vadd.xlane.f32.xlu1 %v1383_v29 }
 0x3f0   : > { %2102 = vmatmul.mubr.msk.bf16.vlgmr.msra.gmra.mrb[20].mxu1 %vm1033_vm7, %v1405_v31 }
 0x3f1   : > { %v2285_v37 = vpop.eup %2284  ;;  %2112 = vmatpush3.bf16.msra.mxu1 %v984_v22  ;;  %2113 = vmatprep.mubr.msk.bf16.mxu1 %vm2637_vm5, %v2636_v30  ;;  %v1044_v30 = vmul.f32 1.442695, %v1042_v45  ;;  %v1064_v22 = vld [vmem:[#allocation4] sm:$0xff] }
 0x3f2   : > { %v1536_v32 = vsel %vm1033_vm7, %v2285_v37, 0.0 }
 0x3f3   : > { %1537 = vadd.xlane.f32.xlu1 %v1536_v32  ;;  %2292 = vpow2.f32 %v1044_v30  ;;  %v1533_v32 = vld [vmem:[#allocation4 + $0x38] sm:$0xff] }
 0x3f4   : > { %2294 = vpow2.f32 %v1511_v48 }
 0x3f5   : > { %v2287_v33 = vpop.eup %2286  ;;  %2296 = vpow2.f32 %v1046_v52 }
 0x3f6   : > { %v1539_v36 = vsel %vm1033_vm7, %v2287_v33, 0.0  ;;  %v1561_v16 = vpack.c.bf16 %v2287_v33, %v2285_v37  ;;  %v2289_v57 = vpop.eup %2288  ;;  %2298 = vpow2.f32 %v1513_v54 }
 0x3f7   : > { %1540 = vadd.xlane.f32.xlu1 %v1539_v36  ;;  %v3303_v43 = vpop.eup %2290  ;;  %2300 = vpow2.f32 %v1201_v41  ;;  %v1222_v53 = vmul.f32 %v2289_v57, %v1220_v12 }
 0x3f8   : > { %2114 = vmatmul.mubr.msk.bf16.vlgmr.msra.gmra.mrb[24].mxu1 %vm1033_vm7, %v1561_v16  ;;  %2302 = vpow2.f32 %v1357_v44  ;;  %v1378_v18 = vmul.f32 %v3303_v43, %v1376_v11 }
 0x3fd   : > { %v2293_v45 = vpop.eup %2292 }
 0x3fe   : > { %v3309_v47 = vpop.eup %2294  ;;  %v1066_v38 = vmul.f32 %v2293_v45, %v1064_v22 }
 0x3ff   : > { %v2297_v51 = vpop.eup %2296  ;;  %v1534_v37 = vmul.f32 %v3309_v47, %v1532_v34 }
 0x400   : > { %v3312_v55 = vpop.eup %2298  ;;  %v1067_v9 = vmul.f32 %v2297_v51, %v1065_v40 }
 0x401   : > { %1239 = vperm.xlu0 %2236, %v2289_v57   ;;  %v2301_v59 = vpop.eup %2300  ;;  %v1535_v16 = vmul.f32 %v3312_v55, %v1533_v32 }
 0x402   : > { %v2303_v4 = vpop.eup %2302  ;;  %v1223_v6 = vmul.f32 %v2301_v59, %v1221_v17 }
 0x403   : > { %v1379_v2 = vmul.f32 %v2303_v4, %v1377_v24 }
 0x405   : > { %1395 = vperm.xlu0 %2236, %v3303_v43  }
 0x408   : > { %1083 = vperm.xlu1 %2235, %v2293_v45  }
 0x409   : > { %1551 = vperm.xlu0 %2236, %v3309_v47   ;;  %v1742_v47 = vld [vmem:[#allocation3 + $0x38] sm:$0xff] }
 0x40a   : > { %vm1744_vm14 = vcmp.gt.f32.partialorder %v1742_v47, -1e+29 }
 0x40b   : > { %v1746_v56 = vsel %vm1744_vm14, 1, %v2635_v0 }
 0x40c   : > { %1088 = vperm.xlu1 %2235, %v2297_v51   ;;  %v1741_v51 = vld [vmem:[#allocation3 + $0x30] sm:$0xff] }
 0x40d   : > { %1556 = vperm.xlu0 %2236, %v3312_v55   ;;  %vm1743_vm15 = vcmp.gt.f32.partialorder %v1741_v51, -1e+29 }
 0x410   : > { %1244 = vperm.xlu1 %2235, %v2301_v59   ;;  %v1745_v59 = vsel %vm1743_vm15, 1, %v2635_v0 }
 0x411   : > { %1643 = vperm.xlu0 %2236, %v1638_v60  }
 0x414   : > { %1400 = vperm.xlu1 %2235, %v2303_v4  }
 0x415   : > { %1679 = vperm.xlu0 %2236, %v1674_v5  }
 0x418   : > { %1640 = vperm.xlu1 %2235, %v1637_v8  }
 0x419   : > { %1715 = vperm.xlu0 %2236, %v1710_v10  }
 0x41c   : > { %1676 = vperm.xlu1 %2235, %v1673_v14  }
 0x420   : > { %1712 = vperm.xlu1 %2235, %v1709_v21  }
 0x468   : > { %v1070_v39 = vpop.xlane.xlu1 %1069 }
 0x469   : > { %v1074_v42 = vadd.f32 %v1070_v39, %v1066_v38 }
 0x46b   : > { %1077 = vst.msk [vmem:[#allocation4] sm:$0xff] %vm660_vm6, %v1074_v42 }
 0x46c   : > { %v1073_v46 = vpop.xlane.xlu0 %1072 }
 0x46d   : > { %v1075_v50 = vadd.f32 %v1073_v46, %v1067_v9 }
 0x46f   : > { %1078 = vst.msk [vmem:[#allocation4 + $0x8] sm:$0xff] %vm660_vm6, %v1075_v50 }
 0x470   : > { %v1226_v58 = vpop.xlane.xlu1 %1225 }
 0x471   : > { %v1230_v63 = vadd.f32 %v1226_v58, %v1222_v53 }
 0x472   : > { %v1615_v20 = vld [vmem:[#allocation4] sm:$0xff] }
 0x473   : > { %1232 = vst.msk [vmem:[#allocation4 + $0x10] sm:$0xff] %vm660_vm6, %v1230_v63  ;;  %2304 = vrcp.f32 %v1615_v20 }
 0x474   : > { %v1229_v25 = vpop.xlane.xlu0 %1228 }
 0x475   : > { %v1231_v28 = vadd.f32 %v1229_v25, %v1223_v6 }
 0x476   : > { %v1616_v15 = vld [vmem:[#allocation4 + $0x8] sm:$0xff] }
 0x477   : > { %1233 = vst.msk [vmem:[#allocation4 + $0x18] sm:$0xff] %vm660_vm6, %v1231_v28  ;;  %2306 = vrcp.f32 %v1616_v15 }
 0x478   : > { %v1382_v23 = vpop.xlane.xlu0 %1381 }
 0x479   : > { %v1386_v26 = vadd.f32 %v1382_v23, %v1378_v18 }
 0x47a   : > { %v1651_v62 = vld [vmem:[#allocation4 + $0x10] sm:$0xff] }
 0x47b   : > { %1388 = vst.msk [vmem:[#allocation4 + $0x20] sm:$0xff] %vm660_vm6, %v1386_v26  ;;  %2308 = vrcp.f32 %v1651_v62 }
 0x47c   : > { %v1385_v3 = vpop.xlane.xlu1 %1384 }
 0x47d   : > { %v2305_v27 = vpop.eup %2304  ;;  %v1387_v29 = vadd.f32 %v1385_v3, %v1379_v2 }
 0x47e   : > { %1623 = vperm.xlu0 %2236, %v2305_v27   ;;  %v1652_v31 = vld [vmem:[#allocation4 + $0x18] sm:$0xff] }
 0x47f   : > { %1389 = vst.msk [vmem:[#allocation4 + $0x28] sm:$0xff] %vm660_vm6, %v1387_v29  ;;  %2310 = vrcp.f32 %v1652_v31 }
 0x480   : > { %v1538_v19 = vpop.xlane.xlu1 %1537  ;;  %v1240_v0 = vpop.permute.xlu0 %1239 }
 0x481   : > { %v2307_v33 = vpop.eup %2306  ;;  %v1542_v35 = vadd.f32 %v1538_v19, %v1534_v37  ;;  %v1247_v34 = vmul.f32 0.0, %v1240_v0 }
 0x482   : > { %1628 = vperm.xlu0 %2236, %v2307_v33   ;;  %v1687_v36 = vld [vmem:[#allocation4 + $0x20] sm:$0xff] }
 0x483   : > { %1544 = vst.msk [vmem:[#allocation4 + $0x30] sm:$0xff] %vm660_vm6, %v1542_v35  ;;  %2312 = vrcp.f32 %v1687_v36 }
 0x484   : > { %v1541_v30 = vpop.xlane.xlu1 %1540  ;;  %v1396_v9 = vpop.permute.xlu0 %1395 }
 0x485   : > { %v2309_v48 = vpop.eup %2308  ;;  %v1543_v52 = vadd.f32 %v1541_v30, %v1535_v16  ;;  %v1403_v16 = vmul.f32 0.0, %v1396_v9 }
 0x486   : > { %1659 = vperm.xlu1 %2235, %v2309_v48   ;;  %v1688_v54 = vld [vmem:[#allocation4 + $0x28] sm:$0xff] }
 0x487   : > { %1545 = vst.msk [vmem:[#allocation4 + $0x38] sm:$0xff] %vm660_vm6, %v1543_v52  ;;  %2314 = vrcp.f32 %v1688_v54 }
 0x488   : > { %v1084_v46 = vpop.permute.xlu1 %1083  ;;  %v1552_v12 = vpop.permute.xlu0 %1551 }
 0x489   : > { %v2311_v57 = vpop.eup %2310  ;;  %v1091_v11 = vmul.f32 0.0, %v1084_v46 }
 0x48a   : > { %1664 = vperm.xlu0 %2236, %v2311_v57   ;;  %v1723_v41 = vld [vmem:[#allocation4 + $0x30] sm:$0xff] }
 0x48b   : > { %2316 = vrcp.f32 %v1723_v41 }
 0x48c   : > { %v1089_v50 = vpop.permute.xlu1 %1088  ;;  %v1557_v53 = vpop.permute.xlu0 %1556 }
 0x48d   : > { %v2313_v43 = vpop.eup %2312  ;;  %v1092_v23 = vmul.f32 0.0, %v1089_v50 }
 0x48e   : > { %1695 = vperm.xlu0 %2236, %v2313_v43   ;;  %v1724_v44 = vld [vmem:[#allocation4 + $0x38] sm:$0xff] }
 0x48f   : > { %2318 = vrcp.f32 %v1724_v44 }
 0x490   : > { %v1245_v58 = vpop.permute.xlu1 %1244  ;;  %v1644_v17 = vpop.permute.xlu0 %1643 }
 0x491   : > { %v2315_v45 = vpop.eup %2314  ;;  %vm1646_vm1 = vcmp.eq.s32.totalorder %v1644_v17, 1  ;;  %v1248_v19 = vmul.f32 0.0, %v1245_v58 }
 0x492   : > { %1700 = vperm.xlu1 %2235, %v2315_v45  }
 0x494   : > { %v1401_v63 = vpop.permute.xlu1 %1400  ;;  %v1680_v20 = vpop.permute.xlu0 %1679 }
 0x495   : > { %v2317_v49 = vpop.eup %2316  ;;  %vm1682_vm3 = vcmp.eq.s32.totalorder %v1680_v20, 1  ;;  %v1404_v57 = vmul.f32 0.0, %v1401_v63 }
 0x496   : > { %1731 = vperm.xlu0 %2236, %v2317_v49  }
 0x498   : > { %v1641_v6 = vpop.permute.xlu1 %1640  ;;  %v1716_v25 = vpop.permute.xlu0 %1715 }
 0x499   : > { %v2319_v55 = vpop.eup %2318  ;;  %vm1645_vm0 = vcmp.eq.s32.totalorder %v1641_v6, 1  ;;  %vm1718_vm5 = vcmp.eq.s32.totalorder %v1716_v25, 1 }
 0x49a   : > { %1736 = vperm.xlu1 %2235, %v2319_v55   ;;  %1751 = vperm.xlu0 %2236, %v1746_v56   ;;  %v1560_v55 = vmul.f32 0.0, %v1557_v53 }
 0x49c   : > { %v1677_v28 = vpop.permute.xlu1 %1676 }
 0x49d   : > { %vm1681_vm2 = vcmp.eq.s32.totalorder %v1677_v28, 1 }
 0x49e   : > { %1748 = vperm.xlu1 %2235, %v1745_v59   ;;  %v1559_v59 = vmul.f32 0.0, %v1552_v12 }
 0x4a0   : > { %v1713_v2 = vpop.permute.xlu1 %1712 }
 0x4a1   : > { %vm1717_vm4 = vcmp.eq.s32.totalorder %v1713_v2, 1 }
 0x4b3   : > { %v1131_v60 = vpop.f32.mrb[12].mxu1 }
 0x4b4   : > { %v2079_v61 = vpop.f32.mrb[13].mxu1  ;;  %v1138_v15 = vadd.f32 %v1131_v60, %v1091_v11 }
 0x4b5   : > { %v1134_v1 = vpop.f32.mrb[14].mxu1 }
 0x4b6   : > { %v2080_v4 = vpop.f32.mrb[15].mxu1  ;;  %v1139_v26 = vadd.f32 %v1134_v1, %v1092_v23 }
 0x4bb   : > { %v1287_v5 = vpop.f32.mrb[16].mxu1 }
 0x4bc   : > { %v2091_v7 = vpop.f32.mrb[17].mxu1  ;;  %v1294_v29 = vadd.f32 %v1287_v5, %v1247_v34 }
 0x4bd   : > { %v1290_v8 = vpop.f32.mrb[18].mxu1 }
 0x4be   : > { %v2092_v10 = vpop.f32.mrb[19].mxu1  ;;  %v1295_v33 = vadd.f32 %v1290_v8, %v1248_v19 }
 0x4c3   : > { %v1443_v13 = vpop.f32.mrb[20].mxu1 }
 0x4c4   : > { %v2103_v14 = vpop.f32.mrb[21].mxu1  ;;  %v1450_v48 = vadd.f32 %v1443_v13, %v1403_v16 }
 0x4c5   : > { %v1446_v21 = vpop.f32.mrb[22].mxu1 }
 0x4c6   : > { %v2104_v22 = vpop.f32.mrb[23].mxu1  ;;  %v1451_v43 = vadd.f32 %v1446_v21, %v1404_v57 }
 0x4cb   : > { %v3334_v38 = vpop.f32.mrb[24].mxu1 }
 0x4cc   : > { %v2115_v39 = vpop.f32.mrb[25].mxu1  ;;  %v1606_v4 = vadd.f32 %v3334_v38, %v1559_v59 }
 0x4cd   : > { %v1602_v40 = vpop.f32.mrb[26].mxu1 }
 0x4ce   : > { %v2116_v42 = vpop.f32.mrb[27].mxu1  ;;  %v1607_v56 = vadd.f32 %v1602_v40, %v1560_v55 }
 0x4fd   : > { %v1624_v18 = vpop.permute.xlu0 %1623 }
 0x4fe   : > { %v1631_v24 = vmul.f32 %v1624_v18, %v1138_v15 }
 0x500   : > { %v1647_v62 = vsel %vm1645_vm0, %v1631_v24, 0.0 }
 0x501   : > { %1649 = vst [vmem:[%s3337_s11] sm:$0xff] %v1647_v62  ;;  %v1629_v3 = vpop.permute.xlu0 %1628 }
 0x502   : > { %v1632_v27 = vmul.f32 %v1629_v3, %v1139_v26 }
 0x504   : > { %v1648_v31 = vsel %vm1646_vm1, %v1632_v27, 0.0 }
 0x505   : > { %1650 = vst [vmem:[%s3337_s11 + $0x20] sm:$0xff] %v1648_v31  ;;  %v1660_v37 = vpop.permute.xlu1 %1659 }
 0x506   : > { %v1667_v32 = vmul.f32 %v1660_v37, %v1294_v29 }
 0x508   : > { %v1683_v35 = vsel %vm1681_vm2, %v1667_v32, 0.0 }
 0x509   : > { %1685 = vst [vmem:[%s3337_s11 + $0x8] sm:$0xff] %v1683_v35  ;;  %v1665_v36 = vpop.permute.xlu0 %1664 }
 0x50a   : > { %v1668_v30 = vmul.f32 %v1665_v36, %v1295_v33 }
 0x50c   : > { %v1684_v52 = vsel %vm1682_vm3, %v1668_v30, 0.0 }
 0x50d   : > { %1686 = vst [vmem:[%s3337_s11 + $0x28] sm:$0xff] %v1684_v52  ;;  %v1696_v54 = vpop.permute.xlu0 %1695 }
 0x50e   : > { %v1703_v41 = vmul.f32 %v1696_v54, %v1450_v48 }
 0x510   : > { %v1719_v44 = vsel %vm1717_vm4, %v1703_v41, 0.0 }
 0x511   : > { %1721 = vst [vmem:[%s3337_s11 + $0x10] sm:$0xff] %v1719_v44  ;;  %v1701_v45 = vpop.permute.xlu1 %1700 }
 0x512   : > { %v1704_v47 = vmul.f32 %v1701_v45, %v1451_v43 }
 0x514   : > { %v1720_v49 = vsel %vm1718_vm5, %v1704_v47, 0.0 }
 0x515   : > { %1722 = vst [vmem:[%s3337_s11 + $0x30] sm:$0xff] %v1720_v49  ;;  %v1732_v51 = vpop.permute.xlu0 %1731 }
 0x516   : > { %v1739_v7 = vmul.f32 %v1732_v51, %v1606_v4 }
 0x519   : > { %v1737_v60 = vpop.permute.xlu1 %1736  ;;  %v1752_v61 = vpop.permute.xlu0 %1751 }
 0x51a   : > { %v1740_v1 = vmul.f32 %v1737_v60, %v1607_v56  ;;  %vm1754_vm6 = vcmp.eq.s32.totalorder %v1752_v61, 1 }
 0x51c   : > { %v1756_v5 = vsel %vm1754_vm6, %v1740_v1, 0.0 }
 0x51d   : > { %1758 = vst [vmem:[%s3337_s11 + $0x38] sm:$0xff] %v1756_v5  ;;  %v1749_v8 = vpop.permute.xlu1 %1748 }
 0x51e   : > { %vm1753_vm7 = vcmp.eq.s32.totalorder %v1749_v8, 1 }
 0x51f   : > { %v1755_v10 = vsel %vm1753_vm7, %v1739_v7, 0.0 }
 0x520   : > { %1757 = vst [vmem:[%s3337_s11 + $0x18] sm:$0xff] %v1755_v10 }
 0x521   : > { %2537 = shalt.err (!%p2534_p12)
}
 0x522   : > { %s2538_s18 = scalar_lea.hbm %s3354_s7, 1024  ;;  %s2542_s5 = scalar_lea.hbm %s3473_s23, 2048 }
 0x523   : > { %p2539_p11 = scmp.ne.s32.totalorder %s3354_s7, %s2538_s18  ;;  %p2543_p0 = scmp.lt.u32.totalorder %s3354_s7, %s3473_s23 }
 0x524   : > { %p2544_p1 = scmp.lt.u32.totalorder %s2542_s5, %s2538_s18  ;;  %p2546_p7 = scmp.lt.u32.totalorder %s2538_s18, %s3354_s7 }
 0x525   : > { %p2540_p6 = pnand %p2539_p11, %p3474_p8 }
 0x526   : > { %p2545_p2 = por %p2544_p1, %p2543_p0 }
 0x527   : > { %p2541_p4 = pneg %p2540_p6 }
 0x528   : > { %p2547_p10 = por %p2546_p7, %p2545_p2 }
 0x52a   : > { %p2548_p5 = pnand %p2547_p10, %p2541_p4 }
 0x52c   : > { %2551 = shalt.err (!%p2548_p5)
}
 0x52d   : > { %s2640_s28 = smov 512   ;;  %s2641_s24 = smov 32  }
 0x52e   : > { %2137 = dma.vmem_to_hbm [thread:$0]  (%p3474_p8), %s3348_s9, 1024, %s3354_s7, %s1760_s13, %s2640_s28, %s2640_s28, %s2641_s24  }
 0x52f PF: > { %s3475_s30 = sld [smem:[#allocation25_spill]]  ;;  %s3476_s11 = sld [smem:[#allocation29_spill]] }
 0x530   : > { %p3478_p13 = scmp.ge.s32.totalorder %s2622_s29, 2 }
 0x535   : > { %s1791_s27 = sand.u32 1, %s3475_s30   ;;  %p3477_p9 = scmp.ne.s32.totalorder %s3476_s11, 0 }
 0x536   : > { %s1792_s21 = scalar_lea.sflag [#allocation8], %s1791_s27 }
 0x537   : > { %p2163_p3 = pnand %p3478_p13, %p3477_p9 }
 0x539   : > { %2597 = dma.done.wait (!%p2163_p3), %s1792_s21, 1024  }
 0x53a   : > { %2599 = vsyncadd (!%p2163_p3), %s1792_s21, 4294966272  ;;  %s30_s29 = sadd.s32 1, %s2622_s29   ;;  %s3479_s22 = sld [smem:[#allocation31_spill]] }
 0x53b   : > { %p27_p12 = scmp.ge.s32.totalorder %s30_s29, 4   ;;  %s3480_s27 = sld [smem:[#allocation27_spill]] }
 0x53c   : > { %s3481_s28 = sld [smem:[#allocation30_spill]]  ;;  %s3482_s24 = smov %s2606_s25 }
 0x53d   : > { %s3483_s25 = smov %s2610_s26  ;;  %29 = sbr.rel (!%p27_p12) target bundleno = 16 (0x10), region = 159 }
 0x540   : > { %s3484_s26 = smov %s3479_s22 }
 0x544   :  { %1797 = vsyncpa [#allocation7], 1 }
 0x545   :  { %1799 = vsyncpa [#allocation7 + $0x1], 1 }
 0x546   :  { %1800 = vsyncpa [#allocation10], 1 }
 0x547   :  { %1802 = vsyncpa [#allocation10 + $0x1], 1 }
 0x548   :  { %1803 = vsyncpa [#allocation13], 1 }
 0x549   :  { %1805 = vsyncpa [#allocation13 + $0x1], 1 }
 0x54a   :  { %1806 = vsyncpa [#allocation16], 1 }
 0x54b   :  { %1807 = vsyncpa [#allocation8], 1 }
 0x54c   :  { %1809 = vsyncpa [#allocation8 + $0x1], 1 }

</bundles_post_ra>
